<compile_context>
chip_gen: v5e
topology: v5e:2x2
jax: 0.10.0
libtpu: 0.0.40
codegen_flags: <defaults>
</compile_context>

<pallas_src>
import math
import functools

import jax
import jax.numpy as jnp
from jax import lax
from jax.experimental import pallas as pl
from jax.experimental.pallas import tpu as pltpu

# ----------------------------- model hyper-params ---------------------------
B = 2            # batch
T = 8            # frames
H = 32           # hidden_size
NH = 15          # n_harmonic
NB = 9           # n_bands  (irfft length = 2*(NB-1) = 16 = BLOCK)
SR = 64          # sampling_rate (small synthetic value)
BLOCK = 16       # block_size
N = T * BLOCK    # audio samples (128) -- must be >= SR for the Reverb pad
TB = T * B       # frame rows, time-major ordering: row = t*B + b
LANES = 128

LOG10 = math.log(10.0)

# ----------------------- packed-slab layout (static) ------------------------
# weight slab: (W_ROWS, 128), each block left-aligned in lanes, 8-aligned rows
R_IN_W2 = 0
R_IN_W3 = 32
R_GRU_WIH = 64        # 64 rows: [0:32] pitch-half, [32:64] loudness-half
R_GRU_WHH = 128
R_OUT_W1 = 160        # gru_out part of out_mlp layer-1 weight (first H rows)
R_OUT_W2 = 192
R_OUT_W3 = 224
R_PROJ_W = 256        # (H, NH+1+NB) zero-padded to 128 lanes
W_ROWS = 288

# vector slab: (V_ROWS, 128), one (1, <=128) vector per row, left-aligned
(VR_IN_W1, VR_IN_B1, VR_IN_G1, VR_IN_BE1,
 VR_IN_B2, VR_IN_G2, VR_IN_BE2,
 VR_IN_B3, VR_IN_G3, VR_IN_BE3,
 VR_GRU_BIH, VR_GRU_BHH,
 VR_OUT_WP, VR_OUT_WL,
 VR_OUT_B1, VR_OUT_G1, VR_OUT_BE1,
 VR_OUT_B2, VR_OUT_G2, VR_OUT_BE2,
 VR_OUT_B3, VR_OUT_G3, VR_OUT_BE3,
 VR_PROJ_B) = range(24)
V_ROWS = 24


# ------------------------------- pallas helpers -----------------------------
def _full_spec(shape):
    nd = len(shape)
    return pl.BlockSpec(shape, lambda i, _nd=nd: (0,) * _nd)


def pcall(kernel, args, out_shape, scratch_shapes=()):
    """Run `kernel` once (grid=(1,)) with whole-array VMEM blocks."""
    if isinstance(out_shape, (tuple, list)):
        out_specs = tuple(_full_spec(o.shape) for o in out_shape)
        out_shape = tuple(out_shape)
    else:
        out_specs = _full_spec(out_shape.shape)
    return pl.pallas_call(
        kernel,
        grid=(1,),
        in_specs=[_full_spec(a.shape) for a in args],
        out_specs=out_specs,
        out_shape=out_shape,
        scratch_shapes=list(scratch_shapes),
        compiler_params=pltpu.CompilerParams(
            dimension_semantics=("arbitrary",)),
    )(*args)


# ----------------------------- fused pre-FFT kernel --------------------------
def fused_ddsp_kernel(data_ref, w_ref, v_ref, out_ref, bank_ref, gru_ref, *,
                      sr, hidden, n_harm, n_frames, batch, block):
    f32 = jnp.float32
    Hs = hidden
    tb = n_frames * batch
    npts = n_frames * block

    def vrow(r, width):
        return v_ref[r:r + 1, 0:width]                 # static (1, width) view

    def ln_lrelu(y, g_row, b_row):
        # single-pass LayerNorm: var = E[x^2] - mean^2 (halves XLU reductions)
        mean = jnp.mean(y, axis=-1, keepdims=True)
        ex2 = jnp.mean(y * y, axis=-1, keepdims=True)
        var = ex2 - mean * mean
        yn = (y - mean) * lax.rsqrt(var + 1e-5) * vrow(g_row, Hs) + vrow(b_row, Hs)
        return jnp.where(yn > 0.0, yn, 0.01 * yn)      # LeakyReLU(0.01)

    def scale_fn(x):
        # 2*sigmoid(x)**log(10) + 1e-7 == 2*exp(-log(10)*softplus(-x)) + 1e-7
        sp = jnp.maximum(-x, 0.0) + jnp.log(1.0 + jnp.exp(-jnp.abs(x)))
        return 2.0 * jnp.exp(-LOG10 * sp) + 1e-7

    # ---- packed data input ---------------------------------------------------
    x_in = data_ref[0:2 * tb, 0:1]                      # (2*tb,1) pitch then loud
    p_tm = x_in[:tb, :]                                 # (tb,1) time-major pitch
    l_tm = x_in[tb:, :]                                 # (tb,1) time-major loud
    pitch_bt = data_ref[2 * tb:2 * tb + batch, 0:n_frames]     # (B, T)

    # ---- stacked shared-weight in-MLP (rows 0:tb = pitch, tb:2tb = loudness) --
    h = ln_lrelu(x_in * vrow(VR_IN_W1, Hs) + vrow(VR_IN_B1, Hs),
                 VR_IN_G1, VR_IN_BE1)                   # Din==1: broadcast
    h = ln_lrelu(jnp.dot(h, w_ref[R_IN_W2:R_IN_W2 + Hs, 0:Hs],
                         preferred_element_type=f32) + vrow(VR_IN_B2, Hs),
                 VR_IN_G2, VR_IN_BE2)
    h = ln_lrelu(jnp.dot(h, w_ref[R_IN_W3:R_IN_W3 + Hs, 0:Hs],
                         preferred_element_type=f32) + vrow(VR_IN_B3, Hs),
                 VR_IN_G3, VR_IN_BE3)

    # ---- GRU: input projection hoisted; lane-axis concat replaced by 2 dots ---
    gi_all = (jnp.dot(h[:tb, :], w_ref[R_GRU_WIH:R_GRU_WIH + Hs, 0:3 * Hs],
                      preferred_element_type=f32)
              + jnp.dot(h[tb:, :], w_ref[R_GRU_WIH + Hs:R_GRU_WIH + 2 * Hs, 0:3 * Hs],
                        preferred_element_type=f32)
              + vrow(VR_GRU_BIH, 3 * Hs))               # (tb, 3H)
    whh = w_ref[R_GRU_WHH:R_GRU_WHH + Hs, 0:3 * Hs]
    bhh = vrow(VR_GRU_BHH, 3 * Hs)
    # TODO(synk): whh could be held MXU weight-stationary via pltpu.matmul_push_rhs
    # across the 8 recurrent steps; kept as plain f32 dots for robustness.
    h_t = jnp.zeros((batch, Hs), f32)
    for t in range(n_frames):                           # static unroll (T=8)
        gi = gi_all[t * batch:(t + 1) * batch, :]       # (B, 3H) static slice
        gh = jnp.dot(h_t, whh, preferred_element_type=f32) + bhh
        r = jax.nn.sigmoid(gi[:, :Hs] + gh[:, :Hs])
        z = jax.nn.sigmoid(gi[:, Hs:2 * Hs] + gh[:, Hs:2 * Hs])
        n = jnp.tanh(gi[:, 2 * Hs:] + r * gh[:, 2 * Hs:])
        h_t = (1.0 - z) * n + z * h_t
        gru_ref[t * batch:(t + 1) * batch, :] = h_t     # slice-store, no concat
    gru_out = gru_ref[...]                              # (tb, H) time-major

    # ---- out MLP; concat([gru, pitch, loud]) folded into the first matmul -----
    y = (jnp.dot(gru_out, w_ref[R_OUT_W1:R_OUT_W1 + Hs, 0:Hs],
                 preferred_element_type=f32)
         + p_tm * vrow(VR_OUT_WP, Hs) + l_tm * vrow(VR_OUT_WL, Hs)
         + vrow(VR_OUT_B1, Hs))
    h3 = ln_lrelu(y, VR_OUT_G1, VR_OUT_BE1)
    h3 = ln_lrelu(jnp.dot(h3, w_ref[R_OUT_W2:R_OUT_W2 + Hs, 0:Hs],
                          preferred_element_type=f32) + vrow(VR_OUT_B2, Hs),
                  VR_OUT_G2, VR_OUT_BE2)
    h3 = ln_lrelu(jnp.dot(h3, w_ref[R_OUT_W3:R_OUT_W3 + Hs, 0:Hs],
                          preferred_element_type=f32) + vrow(VR_OUT_B3, Hs),
                  VR_OUT_G3, VR_OUT_BE3)

    # ---- fused projections + scale_function + nyquist mask + normalization ----
    p = (jnp.dot(h3, w_ref[R_PROJ_W:R_PROJ_W + Hs, :], preferred_element_type=f32)
         + v_ref[VR_PROJ_B:VR_PROJ_B + 1, :])           # (tb, 128) lane-dense
    # lane-dense padded mags store; wrapper slices cols NH+1 : NH+1+NB
    out_ref[0:tb, :] = scale_fn(p - 5.0)

    param0 = scale_fn(p[:, :n_harm + 1])
    total_amp = param0[:, :1]
    amps = param0[:, 1:]
    k_row = (lax.broadcasted_iota(jnp.int32, (1, n_harm), 1) + 1).astype(f32)
    aa = (p_tm * k_row < sr / 2.0).astype(f32) + 1e-4   # remove_above_nyquist
    amps = amps * aa
    amps = amps / jnp.sum(amps, axis=-1, keepdims=True)
    amps = amps * total_amp                             # (tb, NH)

    # ---- harmonic synthesis (constants generated in-kernel, lane-dense N=128) -
    t_i = lax.broadcasted_iota(jnp.int32, (n_frames, npts), 0).astype(f32)
    i_i = lax.broadcasted_iota(jnp.int32, (n_frames, npts), 1).astype(f32)
    # cumsum of nearest-neighbour-upsampled pitch folded into one (B,T)@(T,N) dot
    cumu = (2.0 * math.pi / sr) * jnp.clip(i_i - t_i * block + 1.0, 0.0, float(block))
    omega = jnp.dot(pitch_bt, cumu, preferred_element_type=f32)     # (B, N)
    sin1 = jnp.sin(omega)                               # only 2 EUP vreg ops total
    two_cos1 = 2.0 * jnp.cos(omega)

    row_i = lax.broadcasted_iota(jnp.int32, (tb, npts), 0)
    col_i = lax.broadcasted_iota(jnp.int32, (tb, npts), 1)
    if block & (block - 1) == 0:
        frame_i = col_i >> (block.bit_length() - 1)     # i // block (power of 2)
    else:
        frame_i = col_i // block

    for b in range(batch):                              # static unroll (B=2)
        # sin bank via angle-addition: sin((k+1)w) = 2cos(w)sin(kw) - sin((k-1)w)
        s_prev = jnp.zeros((1, npts), f32)
        s_cur = sin1[b:b + 1, :]
        tc = two_cos1[b:b + 1, :]
        bank_ref[0:1, :] = s_cur
        for k in range(1, n_harm):
            s_prev, s_cur = s_cur, tc * s_cur - s_prev
            bank_ref[k:k + 1, :] = s_cur                # slice-store, no concat
        inner = jnp.dot(amps, bank_ref[...], preferred_element_type=f32)  # (tb, N)
        # block-constant amplitude upsample == masked sublane reduction
        sel = (row_i == frame_i * batch + b).astype(f32)
        out_ref[tb + b:tb + b + 1, :] = jnp.sum(sel * inner, axis=0, keepdims=True)


# ------------------------------- JAX glue (FFT) ------------------------------
# TODO(synk): FFT (rfft/irfft) has no Pallas TPU primitive; kept in plain JAX.
def fft_convolve(signal, kernel):
    n = signal.shape[-1]
    s = jnp.concatenate([signal, jnp.zeros_like(signal)], axis=-1)
    k = jnp.concatenate([jnp.zeros_like(kernel), kernel], axis=-1)
    out = jnp.fft.irfft(jnp.fft.rfft(s) * jnp.fft.rfft(k), n=2 * n)
    return out[..., out.shape[-1] // 2:]


def amp_to_impulse_response(amp, target_size):
    ir = jnp.fft.irfft(amp.astype(jnp.complex64), axis=-1)          # len 2*(NB-1)
    filter_size = ir.shape[-1]
    ir = jnp.roll(ir, filter_size // 2, axis=-1)
    win = 0.5 * (1.0 - jnp.cos(2.0 * jnp.pi * jnp.arange(filter_size) / filter_size))
    ir = ir * win
    ir = jnp.pad(ir, [(0, 0)] * (ir.ndim - 1) + [(0, int(target_size) - filter_size)])
    ir = jnp.roll(ir, (-filter_size) // 2, axis=-1)
    return ir


def reverb_apply(x, noise_param, decay, wet, length, sr):
    lenx = x.shape[1]
    t = (jnp.arange(length, dtype=jnp.float32) / sr).reshape(1, -1, 1)
    env = jnp.exp(-jax.nn.softplus(-decay) * t * 500.0)
    impulse = noise_param[None, :, :] * env * jax.nn.sigmoid(wet)   # (1, length, 1)
    impulse = impulse.at[:, 0].set(1.0)
    impulse = jnp.pad(impulse, ((0, 0), (0, lenx - length), (0, 0)))
    out = fft_convolve(x[..., 0], impulse[..., 0])[..., None]
    return out


# ------------------------------ parameter setup ------------------------------
def init_params(key):
    ks = iter(jax.random.split(key, 64))

    def lin(din, dout):
        w = jax.random.normal(next(ks), (din, dout), jnp.float32) * 0.1
        b = jax.random.normal(next(ks), (1, dout), jnp.float32) * 0.1
        return w, b

    def mlp_params(din, hid):
        out = []
        dims = [din, hid, hid, hid]
        for i in range(3):
            w, b = lin(dims[i], dims[i + 1])
            out += [w, b, jnp.ones((1, dims[i + 1]), jnp.float32),
                    jnp.zeros((1, dims[i + 1]), jnp.float32)]
        return out

    p = {}
    # NOTE: nn.ModuleList([mlp(1,H,3)] * 2) shares the SAME mlp for pitch & loudness.
    p['in_mlp'] = mlp_params(1, H)
    p['out_mlp'] = mlp_params(H + 2, H)
    p['gru_wih_t'] = jax.random.normal(next(ks), (2 * H, 3 * H), jnp.float32) * 0.1
    p['gru_whh_t'] = jax.random.normal(next(ks), (H, 3 * H), jnp.float32) * 0.1
    p['gru_bih'] = jax.random.normal(next(ks), (1, 3 * H), jnp.float32) * 0.1
    p['gru_bhh'] = jax.random.normal(next(ks), (1, 3 * H), jnp.float32) * 0.1
    w0, b0 = lin(H, NH + 1)
    w1, b1 = lin(H, NB)
    p['proj_w'] = jnp.concatenate([w0, w1], axis=1)     # fused (H, NH+1+NB)
    p['proj_b'] = jnp.concatenate([b0, b1], axis=1)     # fused (1, NH+1+NB)
    p['reverb_noise'] = (jax.random.uniform(next(ks), (SR, 1), jnp.float32) * 2.0 - 1.0)
    p['reverb_decay'] = jnp.float32(5.0)
    p['reverb_wet'] = jnp.float32(0.0)
    return p


def pack_params(p):
    """Pack the ~34 tiny parameter tensors into two lane-padded slabs (host-side,
    done ONCE) so the kernel needs only 3 input DMAs instead of ~36."""
    iw1, ib1, ig1, ibe1, iw2, ib2, ig2, ibe2, iw3, ib3, ig3, ibe3 = p['in_mlp']
    ow1, ob1, og1, obe1, ow2, ob2, og2, obe2, ow3, ob3, og3, obe3 = p['out_mlp']

    w = jnp.zeros((W_ROWS, LANES), jnp.float32)

    def put(slab, row, arr):
        return slab.at[row:row + arr.shape[0], :arr.shape[1]].set(arr)

    w = put(w, R_IN_W2, iw2)
    w = put(w, R_IN_W3, iw3)
    w = put(w, R_GRU_WIH, p['gru_wih_t'])
    w = put(w, R_GRU_WHH, p['gru_whh_t'])
    w = put(w, R_OUT_W1, ow1[:H, :])                    # gru_out rows only
    w = put(w, R_OUT_W2, ow2)
    w = put(w, R_OUT_W3, ow3)
    w = put(w, R_PROJ_W, p['proj_w'])

    v = jnp.zeros((V_ROWS, LANES), jnp.float32)

    def putv(slab, row, arr):
        arr = jnp.asarray(arr).reshape(1, -1)
        return slab.at[row:row + 1, :arr.shape[1]].set(arr)

    v = putv(v, VR_IN_W1, iw1)
    v = putv(v, VR_IN_B1, ib1); v = putv(v, VR_IN_G1, ig1); v = putv(v, VR_IN_BE1, ibe1)
    v = putv(v, VR_IN_B2, ib2); v = putv(v, VR_IN_G2, ig2); v = putv(v, VR_IN_BE2, ibe2)
    v = putv(v, VR_IN_B3, ib3); v = putv(v, VR_IN_G3, ig3); v = putv(v, VR_IN_BE3, ibe3)
    v = putv(v, VR_GRU_BIH, p['gru_bih']); v = putv(v, VR_GRU_BHH, p['gru_bhh'])
    v = putv(v, VR_OUT_WP, ow1[H, :]); v = putv(v, VR_OUT_WL, ow1[H + 1, :])
    v = putv(v, VR_OUT_B1, ob1); v = putv(v, VR_OUT_G1, og1); v = putv(v, VR_OUT_BE1, obe1)
    v = putv(v, VR_OUT_B2, ob2); v = putv(v, VR_OUT_G2, og2); v = putv(v, VR_OUT_BE2, obe2)
    v = putv(v, VR_OUT_B3, ob3); v = putv(v, VR_OUT_G3, og3); v = putv(v, VR_OUT_BE3, obe3)
    v = putv(v, VR_PROJ_B, p['proj_b'])

    return {'wslab': w, 'vslab': v,
            'reverb_noise': p['reverb_noise'],
            'reverb_decay': p['reverb_decay'],
            'reverb_wet': p['reverb_wet']}


# --------------------------------- forward -----------------------------------
@jax.jit
def ddsp_decoder_forward(packed, pitch, loudness, noise_key):
    Bn, Tn, _ = pitch.shape
    tb = Tn * Bn
    npts = Tn * BLOCK
    # time-major frame rows (row = t*B + b) so the GRU can take contiguous slices
    p_tm = jnp.transpose(pitch, (1, 0, 2)).reshape(tb, 1).astype(jnp.float32)
    l_tm = jnp.transpose(loudness, (1, 0, 2)).reshape(tb, 1).astype(jnp.float32)
    data = jnp.zeros((2 * tb + Bn, Tn), jnp.float32)    # single packed data input
    data = data.at[:tb, 0:1].set(p_tm)
    data = data.at[tb:2 * tb, 0:1].set(l_tm)
    data = data.at[2 * tb:, :].set(pitch[..., 0].astype(jnp.float32))

    # TODO(synk): on v7x the batch dim could be split over a grid=(B,) /
    # core_map across the 2 TensorCores; kept grid=(1,) (single TC on v5e/v6e).
    out = pcall(
        functools.partial(fused_ddsp_kernel, sr=float(SR), hidden=H, n_harm=NH,
                          n_frames=Tn, batch=Bn, block=BLOCK),
        [data, packed['wslab'], packed['vslab']],
        jax.ShapeDtypeStruct((tb + Bn, LANES), jnp.float32),
        scratch_shapes=[pltpu.VMEM((NH, npts), jnp.float32),   # sin bank
                        pltpu.VMEM((tb, H), jnp.float32)],     # GRU outputs
    )

    mags_tm = out[:tb, NH + 1:NH + 1 + NB]                        # (tb, NB)
    harmonic = out[tb:tb + Bn, :npts][..., None]                  # (B, N, 1)
    mags = jnp.transpose(mags_tm.reshape(Tn, Bn, NB), (1, 0, 2))  # (B, T, NB)

    # filtered noise branch (FFT glue)
    impulse = amp_to_impulse_response(mags, BLOCK)                # (B, T, BLOCK)
    noise = jax.random.uniform(noise_key, (Bn, Tn, BLOCK), jnp.float32) * 2.0 - 1.0
    noise = fft_convolve(noise, impulse)
    noise = noise.reshape(Bn, -1, 1)                              # (B, N, 1)

    signal = harmonic + noise
    signal = reverb_apply(signal, packed['reverb_noise'],
                          packed['reverb_decay'], packed['reverb_wet'], SR, SR)
    return signal                                                 # (B, N, 1)


# ----------------------------------- main ------------------------------------
if __name__ == "__main__":
    key = jax.random.PRNGKey(0)
    k_param, k_pitch, k_loud, k_noise = jax.random.split(key, 4)

    params = init_params(k_param)
    packed = pack_params(params)          # pack once, outside the jitted forward
    pitch = jax.random.uniform(k_pitch, (B, T, 1), jnp.float32, minval=2.0, maxval=10.0)
    loudness = jax.random.normal(k_loud, (B, T, 1), jnp.float32)

    out = ddsp_decoder_forward(packed, pitch, loudness, k_noise)
    out = jax.block_until_ready(out)

    assert out.shape == (B, T * BLOCK, 1), out.shape
    assert bool(jnp.all(jnp.isfinite(out)))
    print("KERNEL_OK")
</pallas_src>

<mosaic_0001>
module attributes {stable_mosaic.version = 11 : i64} {
  func.func @fused_ddsp_kernel(%arg0: i32, %arg1: memref<34x8xf32, #tpu.memory_space<vmem>>, %arg2: memref<288x128xf32, #tpu.memory_space<vmem>>, %arg3: memref<24x128xf32, #tpu.memory_space<vmem>>, %arg4: memref<18x128xf32, #tpu.memory_space<vmem>>, %arg5: memref<15x128xf32, #tpu.memory_space<vmem>>, %arg6: memref<16x32xf32, #tpu.memory_space<vmem>>) attributes {dimension_semantics = [#tpu.dimension_semantics<arbitrary>], iteration_bounds = array<i64: 1>, scalar_prefetch = 0 : i64, scratch_operands = 2 : i64, tpu.core_type = #tpu.core_type<tc>, window_params = [{pipeline_mode = #tpu.pipeline_mode<synchronous>, transform_indices = @transform_0, window_bounds = array<i64: 34, 8>}, {pipeline_mode = #tpu.pipeline_mode<synchronous>, transform_indices = @transform_1, window_bounds = array<i64: 288, 128>}, {pipeline_mode = #tpu.pipeline_mode<synchronous>, transform_indices = @transform_2, window_bounds = array<i64: 24, 128>}, {pipeline_mode = #tpu.pipeline_mode<synchronous>, transform_indices = @transform_3, window_bounds = array<i64: 18, 128>}]} {
    %c0 = arith.constant 0 : index
    %c0_0 = arith.constant 0 : index
    %0 = vector.load %arg1[%c0, %c0_0] : memref<34x8xf32, #tpu.memory_space<vmem>>, vector<32x1xf32>
    %1 = vector.extract_strided_slice %0 {offsets = [0, 0], sizes = [16, 1], strides = [1, 1]} : vector<32x1xf32> to vector<16x1xf32>
    %2 = vector.extract_strided_slice %0 {offsets = [16, 0], sizes = [16, 1], strides = [1, 1]} : vector<32x1xf32> to vector<16x1xf32>
    %c32 = arith.constant 32 : index
    %c0_1 = arith.constant 0 : index
    %3 = vector.load %arg1[%c32, %c0_1] : memref<34x8xf32, #tpu.memory_space<vmem>>, vector<2x8xf32>
    %c0_2 = arith.constant 0 : index
    %c0_3 = arith.constant 0 : index
    %4 = vector.load %arg3[%c0_2, %c0_3] : memref<24x128xf32, #tpu.memory_space<vmem>>, vector<1x32xf32>
    %5 = vector.broadcast %0 : vector<32x1xf32> to vector<32x32xf32>
    %6 = vector.broadcast %4 : vector<1x32xf32> to vector<32x32xf32>
    %7 = arith.mulf %5, %6 : vector<32x32xf32>
    %c1 = arith.constant 1 : index
    %c0_4 = arith.constant 0 : index
    %8 = vector.load %arg3[%c1, %c0_4] : memref<24x128xf32, #tpu.memory_space<vmem>>, vector<1x32xf32>
    %9 = vector.broadcast %8 : vector<1x32xf32> to vector<32x32xf32>
    %10 = arith.addf %7, %9 : vector<32x32xf32>
    %cst = arith.constant dense<0.000000e+00> : vector<32xf32>
    %11 = vector.multi_reduction <add>, %10, %cst [1] : vector<32x32xf32> to vector<32xf32>
    %12 = vector.shape_cast %11 : vector<32xf32> to vector<32x1xf32>
    %cst_5 = arith.constant 3.200000e+01 : f32
    %13 = vector.broadcast %cst_5 : f32 to vector<32x1xf32>
    %14 = arith.divf %12, %13 : vector<32x1xf32>
    %15 = arith.mulf %10, %10 : vector<32x32xf32>
    %cst_6 = arith.constant dense<0.000000e+00> : vector<32xf32>
    %16 = vector.multi_reduction <add>, %15, %cst_6 [1] : vector<32x32xf32> to vector<32xf32>
    %17 = vector.shape_cast %16 : vector<32xf32> to vector<32x1xf32>
    %cst_7 = arith.constant 3.200000e+01 : f32
    %18 = vector.broadcast %cst_7 : f32 to vector<32x1xf32>
    %19 = arith.divf %17, %18 : vector<32x1xf32>
    %20 = arith.mulf %14, %14 : vector<32x1xf32>
    %21 = arith.subf %19, %20 : vector<32x1xf32>
    %22 = vector.broadcast %14 : vector<32x1xf32> to vector<32x32xf32>
    %23 = arith.subf %10, %22 : vector<32x32xf32>
    %cst_8 = arith.constant 9.99999974E-6 : f32
    %24 = vector.broadcast %cst_8 : f32 to vector<32x1xf32>
    %25 = arith.addf %21, %24 : vector<32x1xf32>
    %26 = math.rsqrt %25 : vector<32x1xf32>
    %27 = vector.broadcast %26 : vector<32x1xf32> to vector<32x32xf32>
    %28 = arith.mulf %23, %27 : vector<32x32xf32>
    %c2 = arith.constant 2 : index
    %c0_9 = arith.constant 0 : index
    %29 = vector.load %arg3[%c2, %c0_9] : memref<24x128xf32, #tpu.memory_space<vmem>>, vector<1x32xf32>
    %30 = vector.broadcast %29 : vector<1x32xf32> to vector<32x32xf32>
    %31 = arith.mulf %28, %30 : vector<32x32xf32>
    %c3 = arith.constant 3 : index
    %c0_10 = arith.constant 0 : index
    %32 = vector.load %arg3[%c3, %c0_10] : memref<24x128xf32, #tpu.memory_space<vmem>>, vector<1x32xf32>
    %33 = vector.broadcast %32 : vector<1x32xf32> to vector<32x32xf32>
    %34 = arith.addf %31, %33 : vector<32x32xf32>
    %cst_11 = arith.constant 0.000000e+00 : f32
    %35 = vector.broadcast %cst_11 : f32 to vector<32x32xf32>
    %36 = arith.cmpf ogt, %34, %35 : vector<32x32xf32>
    %cst_12 = arith.constant 0.00999999977 : f32
    %37 = vector.broadcast %cst_12 : f32 to vector<32x32xf32>
    %38 = arith.mulf %37, %34 : vector<32x32xf32>
    %39 = arith.select %36, %34, %38 : vector<32x32xi1>, vector<32x32xf32>
    %c0_13 = arith.constant 0 : index
    %c0_14 = arith.constant 0 : index
    %40 = vector.load %arg2[%c0_13, %c0_14] : memref<288x128xf32, #tpu.memory_space<vmem>>, vector<32x32xf32>
    %cst_15 = arith.constant dense<0.000000e+00> : vector<32x32xf32>
    %41 = tpu.matmul %39, %40, %cst_15 {dimension_numbers = #tpu.dot_dimension_numbers<[1], [0], [0], [1], [0, 0, 1, 1], [], []>} : vector<32x32xf32>, vector<32x32xf32>, vector<32x32xf32> -> vector<32x32xf32>
    %c4 = arith.constant 4 : index
    %c0_16 = arith.constant 0 : index
    %42 = vector.load %arg3[%c4, %c0_16] : memref<24x128xf32, #tpu.memory_space<vmem>>, vector<1x32xf32>
    %43 = vector.broadcast %42 : vector<1x32xf32> to vector<32x32xf32>
    %44 = arith.addf %41, %43 : vector<32x32xf32>
    %cst_17 = arith.constant dense<0.000000e+00> : vector<32xf32>
    %45 = vector.multi_reduction <add>, %44, %cst_17 [1] : vector<32x32xf32> to vector<32xf32>
    %46 = vector.shape_cast %45 : vector<32xf32> to vector<32x1xf32>
    %cst_18 = arith.constant 3.200000e+01 : f32
    %47 = vector.broadcast %cst_18 : f32 to vector<32x1xf32>
    %48 = arith.divf %46, %47 : vector<32x1xf32>
    %49 = arith.mulf %44, %44 : vector<32x32xf32>
    %cst_19 = arith.constant dense<0.000000e+00> : vector<32xf32>
    %50 = vector.multi_reduction <add>, %49, %cst_19 [1] : vector<32x32xf32> to vector<32xf32>
    %51 = vector.shape_cast %50 : vector<32xf32> to vector<32x1xf32>
    %cst_20 = arith.constant 3.200000e+01 : f32
    %52 = vector.broadcast %cst_20 : f32 to vector<32x1xf32>
    %53 = arith.divf %51, %52 : vector<32x1xf32>
    %54 = arith.mulf %48, %48 : vector<32x1xf32>
    %55 = arith.subf %53, %54 : vector<32x1xf32>
    %56 = vector.broadcast %48 : vector<32x1xf32> to vector<32x32xf32>
    %57 = arith.subf %44, %56 : vector<32x32xf32>
    %cst_21 = arith.constant 9.99999974E-6 : f32
    %58 = vector.broadcast %cst_21 : f32 to vector<32x1xf32>
    %59 = arith.addf %55, %58 : vector<32x1xf32>
    %60 = math.rsqrt %59 : vector<32x1xf32>
    %61 = vector.broadcast %60 : vector<32x1xf32> to vector<32x32xf32>
    %62 = arith.mulf %57, %61 : vector<32x32xf32>
    %c5 = arith.constant 5 : index
    %c0_22 = arith.constant 0 : index
    %63 = vector.load %arg3[%c5, %c0_22] : memref<24x128xf32, #tpu.memory_space<vmem>>, vector<1x32xf32>
    %64 = vector.broadcast %63 : vector<1x32xf32> to vector<32x32xf32>
    %65 = arith.mulf %62, %64 : vector<32x32xf32>
    %c6 = arith.constant 6 : index
    %c0_23 = arith.constant 0 : index
    %66 = vector.load %arg3[%c6, %c0_23] : memref<24x128xf32, #tpu.memory_space<vmem>>, vector<1x32xf32>
    %67 = vector.broadcast %66 : vector<1x32xf32> to vector<32x32xf32>
    %68 = arith.addf %65, %67 : vector<32x32xf32>
    %cst_24 = arith.constant 0.000000e+00 : f32
    %69 = vector.broadcast %cst_24 : f32 to vector<32x32xf32>
    %70 = arith.cmpf ogt, %68, %69 : vector<32x32xf32>
    %cst_25 = arith.constant 0.00999999977 : f32
    %71 = vector.broadcast %cst_25 : f32 to vector<32x32xf32>
    %72 = arith.mulf %71, %68 : vector<32x32xf32>
    %73 = arith.select %70, %68, %72 : vector<32x32xi1>, vector<32x32xf32>
    %c32_26 = arith.constant 32 : index
    %c0_27 = arith.constant 0 : index
    %74 = vector.load %arg2[%c32_26, %c0_27] : memref<288x128xf32, #tpu.memory_space<vmem>>, vector<32x32xf32>
    %cst_28 = arith.constant dense<0.000000e+00> : vector<32x32xf32>
    %75 = tpu.matmul %73, %74, %cst_28 {dimension_numbers = #tpu.dot_dimension_numbers<[1], [0], [0], [1], [0, 0, 1, 1], [], []>} : vector<32x32xf32>, vector<32x32xf32>, vector<32x32xf32> -> vector<32x32xf32>
    %c7 = arith.constant 7 : index
    %c0_29 = arith.constant 0 : index
    %76 = vector.load %arg3[%c7, %c0_29] : memref<24x128xf32, #tpu.memory_space<vmem>>, vector<1x32xf32>
    %77 = vector.broadcast %76 : vector<1x32xf32> to vector<32x32xf32>
    %78 = arith.addf %75, %77 : vector<32x32xf32>
    %cst_30 = arith.constant dense<0.000000e+00> : vector<32xf32>
    %79 = vector.multi_reduction <add>, %78, %cst_30 [1] : vector<32x32xf32> to vector<32xf32>
    %80 = vector.shape_cast %79 : vector<32xf32> to vector<32x1xf32>
    %cst_31 = arith.constant 3.200000e+01 : f32
    %81 = vector.broadcast %cst_31 : f32 to vector<32x1xf32>
    %82 = arith.divf %80, %81 : vector<32x1xf32>
    %83 = arith.mulf %78, %78 : vector<32x32xf32>
    %cst_32 = arith.constant dense<0.000000e+00> : vector<32xf32>
    %84 = vector.multi_reduction <add>, %83, %cst_32 [1] : vector<32x32xf32> to vector<32xf32>
    %85 = vector.shape_cast %84 : vector<32xf32> to vector<32x1xf32>
    %cst_33 = arith.constant 3.200000e+01 : f32
    %86 = vector.broadcast %cst_33 : f32 to vector<32x1xf32>
    %87 = arith.divf %85, %86 : vector<32x1xf32>
    %88 = arith.mulf %82, %82 : vector<32x1xf32>
    %89 = arith.subf %87, %88 : vector<32x1xf32>
    %90 = vector.broadcast %82 : vector<32x1xf32> to vector<32x32xf32>
    %91 = arith.subf %78, %90 : vector<32x32xf32>
    %cst_34 = arith.constant 9.99999974E-6 : f32
    %92 = vector.broadcast %cst_34 : f32 to vector<32x1xf32>
    %93 = arith.addf %89, %92 : vector<32x1xf32>
    %94 = math.rsqrt %93 : vector<32x1xf32>
    %95 = vector.broadcast %94 : vector<32x1xf32> to vector<32x32xf32>
    %96 = arith.mulf %91, %95 : vector<32x32xf32>
    %c8 = arith.constant 8 : index
    %c0_35 = arith.constant 0 : index
    %97 = vector.load %arg3[%c8, %c0_35] : memref<24x128xf32, #tpu.memory_space<vmem>>, vector<1x32xf32>
    %98 = vector.broadcast %97 : vector<1x32xf32> to vector<32x32xf32>
    %99 = arith.mulf %96, %98 : vector<32x32xf32>
    %c9 = arith.constant 9 : index
    %c0_36 = arith.constant 0 : index
    %100 = vector.load %arg3[%c9, %c0_36] : memref<24x128xf32, #tpu.memory_space<vmem>>, vector<1x32xf32>
    %101 = vector.broadcast %100 : vector<1x32xf32> to vector<32x32xf32>
    %102 = arith.addf %99, %101 : vector<32x32xf32>
    %cst_37 = arith.constant 0.000000e+00 : f32
    %103 = vector.broadcast %cst_37 : f32 to vector<32x32xf32>
    %104 = arith.cmpf ogt, %102, %103 : vector<32x32xf32>
    %cst_38 = arith.constant 0.00999999977 : f32
    %105 = vector.broadcast %cst_38 : f32 to vector<32x32xf32>
    %106 = arith.mulf %105, %102 : vector<32x32xf32>
    %107 = arith.select %104, %102, %106 : vector<32x32xi1>, vector<32x32xf32>
    %108 = vector.extract_strided_slice %107 {offsets = [0, 0], sizes = [16, 32], strides = [1, 1]} : vector<32x32xf32> to vector<16x32xf32>
    %c64 = arith.constant 64 : index
    %c0_39 = arith.constant 0 : index
    %109 = vector.load %arg2[%c64, %c0_39] : memref<288x128xf32, #tpu.memory_space<vmem>>, vector<32x96xf32>
    %cst_40 = arith.constant dense<0.000000e+00> : vector<16x96xf32>
    %110 = tpu.matmul %108, %109, %cst_40 {dimension_numbers = #tpu.dot_dimension_numbers<[1], [0], [0], [1], [0, 0, 1, 1], [], []>} : vector<16x32xf32>, vector<32x96xf32>, vector<16x96xf32> -> vector<16x96xf32>
    %111 = vector.extract_strided_slice %107 {offsets = [16, 0], sizes = [16, 32], strides = [1, 1]} : vector<32x32xf32> to vector<16x32xf32>
    %c96 = arith.constant 96 : index
    %c0_41 = arith.constant 0 : index
    %112 = vector.load %arg2[%c96, %c0_41] : memref<288x128xf32, #tpu.memory_space<vmem>>, vector<32x96xf32>
    %cst_42 = arith.constant dense<0.000000e+00> : vector<16x96xf32>
    %113 = tpu.matmul %111, %112, %cst_42 {dimension_numbers = #tpu.dot_dimension_numbers<[1], [0], [0], [1], [0, 0, 1, 1], [], []>} : vector<16x32xf32>, vector<32x96xf32>, vector<16x96xf32> -> vector<16x96xf32>
    %114 = arith.addf %110, %113 : vector<16x96xf32>
    %c10 = arith.constant 10 : index
    %c0_43 = arith.constant 0 : index
    %115 = vector.load %arg3[%c10, %c0_43] : memref<24x128xf32, #tpu.memory_space<vmem>>, vector<1x96xf32>
    %116 = vector.broadcast %115 : vector<1x96xf32> to vector<16x96xf32>
    %117 = arith.addf %114, %116 : vector<16x96xf32>
    %c128 = arith.constant 128 : index
    %c0_44 = arith.constant 0 : index
    %118 = vector.load %arg2[%c128, %c0_44] : memref<288x128xf32, #tpu.memory_space<vmem>>, vector<32x96xf32>
    %c11 = arith.constant 11 : index
    %c0_45 = arith.constant 0 : index
    %119 = vector.load %arg3[%c11, %c0_45] : memref<24x128xf32, #tpu.memory_space<vmem>>, vector<1x96xf32>
    %cst_46 = arith.constant 0.000000e+00 : f32
    %120 = vector.broadcast %cst_46 : f32 to vector<2x32xf32>
    %121 = vector.extract_strided_slice %117 {offsets = [0, 0], sizes = [2, 96], strides = [1, 1]} : vector<16x96xf32> to vector<2x96xf32>
    %cst_47 = arith.constant dense<0.000000e+00> : vector<2x96xf32>
    %122 = tpu.matmul %120, %118, %cst_47 {dimension_numbers = #tpu.dot_dimension_numbers<[1], [0], [0], [1], [0, 0, 1, 1], [], []>} : vector<2x32xf32>, vector<32x96xf32>, vector<2x96xf32> -> vector<2x96xf32>
    %123 = vector.broadcast %119 : vector<1x96xf32> to vector<2x96xf32>
    %124 = arith.addf %122, %123 : vector<2x96xf32>
    %125 = vector.extract_strided_slice %121 {offsets = [0, 0], sizes = [2, 32], strides = [1, 1]} : vector<2x96xf32> to vector<2x32xf32>
    %126 = vector.extract_strided_slice %124 {offsets = [0, 0], sizes = [2, 32], strides = [1, 1]} : vector<2x96xf32> to vector<2x32xf32>
    %127 = arith.addf %125, %126 : vector<2x32xf32>
    %128 = arith.negf %127 : vector<2x32xf32>
    %129 = math.exp %128 : vector<2x32xf32>
    %cst_48 = arith.constant 1.000000e+00 : f32
    %130 = vector.broadcast %cst_48 : f32 to vector<2x32xf32>
    %131 = arith.addf %130, %129 : vector<2x32xf32>
    %132 = arith.divf %130, %131 : vector<2x32xf32>
    %133 = vector.extract_strided_slice %121 {offsets = [0, 32], sizes = [2, 32], strides = [1, 1]} : vector<2x96xf32> to vector<2x32xf32>
    %134 = vector.extract_strided_slice %124 {offsets = [0, 32], sizes = [2, 32], strides = [1, 1]} : vector<2x96xf32> to vector<2x32xf32>
    %135 = arith.addf %133, %134 : vector<2x32xf32>
    %136 = arith.negf %135 : vector<2x32xf32>
    %137 = math.exp %136 : vector<2x32xf32>
    %cst_49 = arith.constant 1.000000e+00 : f32
    %138 = vector.broadcast %cst_49 : f32 to vector<2x32xf32>
    %139 = arith.addf %138, %137 : vector<2x32xf32>
    %140 = arith.divf %138, %139 : vector<2x32xf32>
    %141 = vector.extract_strided_slice %121 {offsets = [0, 64], sizes = [2, 32], strides = [1, 1]} : vector<2x96xf32> to vector<2x32xf32>
    %142 = vector.extract_strided_slice %124 {offsets = [0, 64], sizes = [2, 32], strides = [1, 1]} : vector<2x96xf32> to vector<2x32xf32>
    %143 = arith.mulf %132, %142 : vector<2x32xf32>
    %144 = arith.addf %141, %143 : vector<2x32xf32>
    %145 = math.tanh %144 : vector<2x32xf32>
    %cst_50 = arith.constant 1.000000e+00 : f32
    %146 = vector.broadcast %cst_50 : f32 to vector<2x32xf32>
    %147 = arith.subf %146, %140 : vector<2x32xf32>
    %148 = arith.mulf %147, %145 : vector<2x32xf32>
    %149 = arith.mulf %140, %120 : vector<2x32xf32>
    %150 = arith.addf %148, %149 : vector<2x32xf32>
    %c0_51 = arith.constant 0 : index
    %c0_52 = arith.constant 0 : index
    %151 = vector.load %arg6[%c0_51, %c0_52] : memref<16x32xf32, #tpu.memory_space<vmem>>, vector<2x32xf32>
    tpu.vector_store %arg6[%c0_51, %c0_52], %150 {strides = array<i32>} : memref<16x32xf32, #tpu.memory_space<vmem>>, vector<2x32xf32>,
    %152 = vector.extract_strided_slice %117 {offsets = [2, 0], sizes = [2, 96], strides = [1, 1]} : vector<16x96xf32> to vector<2x96xf32>
    %cst_53 = arith.constant dense<0.000000e+00> : vector<2x96xf32>
    %153 = tpu.matmul %150, %118, %cst_53 {dimension_numbers = #tpu.dot_dimension_numbers<[1], [0], [0], [1], [0, 0, 1, 1], [], []>} : vector<2x32xf32>, vector<32x96xf32>, vector<2x96xf32> -> vector<2x96xf32>
    %154 = vector.broadcast %119 : vector<1x96xf32> to vector<2x96xf32>
    %155 = arith.addf %153, %154 : vector<2x96xf32>
    %156 = vector.extract_strided_slice %152 {offsets = [0, 0], sizes = [2, 32], strides = [1, 1]} : vector<2x96xf32> to vector<2x32xf32>
    %157 = vector.extract_strided_slice %155 {offsets = [0, 0], sizes = [2, 32], strides = [1, 1]} : vector<2x96xf32> to vector<2x32xf32>
    %158 = arith.addf %156, %157 : vector<2x32xf32>
    %159 = arith.negf %158 : vector<2x32xf32>
    %160 = math.exp %159 : vector<2x32xf32>
    %cst_54 = arith.constant 1.000000e+00 : f32
    %161 = vector.broadcast %cst_54 : f32 to vector<2x32xf32>
    %162 = arith.addf %161, %160 : vector<2x32xf32>
    %163 = arith.divf %161, %162 : vector<2x32xf32>
    %164 = vector.extract_strided_slice %152 {offsets = [0, 32], sizes = [2, 32], strides = [1, 1]} : vector<2x96xf32> to vector<2x32xf32>
    %165 = vector.extract_strided_slice %155 {offsets = [0, 32], sizes = [2, 32], strides = [1, 1]} : vector<2x96xf32> to vector<2x32xf32>
    %166 = arith.addf %164, %165 : vector<2x32xf32>
    %167 = arith.negf %166 : vector<2x32xf32>
    %168 = math.exp %167 : vector<2x32xf32>
    %cst_55 = arith.constant 1.000000e+00 : f32
    %169 = vector.broadcast %cst_55 : f32 to vector<2x32xf32>
    %170 = arith.addf %169, %168 : vector<2x32xf32>
    %171 = arith.divf %169, %170 : vector<2x32xf32>
    %172 = vector.extract_strided_slice %152 {offsets = [0, 64], sizes = [2, 32], strides = [1, 1]} : vector<2x96xf32> to vector<2x32xf32>
    %173 = vector.extract_strided_slice %155 {offsets = [0, 64], sizes = [2, 32], strides = [1, 1]} : vector<2x96xf32> to vector<2x32xf32>
    %174 = arith.mulf %163, %173 : vector<2x32xf32>
    %175 = arith.addf %172, %174 : vector<2x32xf32>
    %176 = math.tanh %175 : vector<2x32xf32>
    %cst_56 = arith.constant 1.000000e+00 : f32
    %177 = vector.broadcast %cst_56 : f32 to vector<2x32xf32>
    %178 = arith.subf %177, %171 : vector<2x32xf32>
    %179 = arith.mulf %178, %176 : vector<2x32xf32>
    %180 = arith.mulf %171, %150 : vector<2x32xf32>
    %181 = arith.addf %179, %180 : vector<2x32xf32>
    %c2_57 = arith.constant 2 : index
    %c0_58 = arith.constant 0 : index
    %182 = vector.load %arg6[%c2_57, %c0_58] : memref<16x32xf32, #tpu.memory_space<vmem>>, vector<2x32xf32>
    tpu.vector_store %arg6[%c2_57, %c0_58], %181 {strides = array<i32>} : memref<16x32xf32, #tpu.memory_space<vmem>>, vector<2x32xf32>,
    %183 = vector.extract_strided_slice %117 {offsets = [4, 0], sizes = [2, 96], strides = [1, 1]} : vector<16x96xf32> to vector<2x96xf32>
    %cst_59 = arith.constant dense<0.000000e+00> : vector<2x96xf32>
    %184 = tpu.matmul %181, %118, %cst_59 {dimension_numbers = #tpu.dot_dimension_numbers<[1], [0], [0], [1], [0, 0, 1, 1], [], []>} : vector<2x32xf32>, vector<32x96xf32>, vector<2x96xf32> -> vector<2x96xf32>
    %185 = vector.broadcast %119 : vector<1x96xf32> to vector<2x96xf32>
    %186 = arith.addf %184, %185 : vector<2x96xf32>
    %187 = vector.extract_strided_slice %183 {offsets = [0, 0], sizes = [2, 32], strides = [1, 1]} : vector<2x96xf32> to vector<2x32xf32>
    %188 = vector.extract_strided_slice %186 {offsets = [0, 0], sizes = [2, 32], strides = [1, 1]} : vector<2x96xf32> to vector<2x32xf32>
    %189 = arith.addf %187, %188 : vector<2x32xf32>
    %190 = arith.negf %189 : vector<2x32xf32>
    %191 = math.exp %190 : vector<2x32xf32>
    %cst_60 = arith.constant 1.000000e+00 : f32
    %192 = vector.broadcast %cst_60 : f32 to vector<2x32xf32>
    %193 = arith.addf %192, %191 : vector<2x32xf32>
    %194 = arith.divf %192, %193 : vector<2x32xf32>
    %195 = vector.extract_strided_slice %183 {offsets = [0, 32], sizes = [2, 32], strides = [1, 1]} : vector<2x96xf32> to vector<2x32xf32>
    %196 = vector.extract_strided_slice %186 {offsets = [0, 32], sizes = [2, 32], strides = [1, 1]} : vector<2x96xf32> to vector<2x32xf32>
    %197 = arith.addf %195, %196 : vector<2x32xf32>
    %198 = arith.negf %197 : vector<2x32xf32>
    %199 = math.exp %198 : vector<2x32xf32>
    %cst_61 = arith.constant 1.000000e+00 : f32
    %200 = vector.broadcast %cst_61 : f32 to vector<2x32xf32>
    %201 = arith.addf %200, %199 : vector<2x32xf32>
    %202 = arith.divf %200, %201 : vector<2x32xf32>
    %203 = vector.extract_strided_slice %183 {offsets = [0, 64], sizes = [2, 32], strides = [1, 1]} : vector<2x96xf32> to vector<2x32xf32>
    %204 = vector.extract_strided_slice %186 {offsets = [0, 64], sizes = [2, 32], strides = [1, 1]} : vector<2x96xf32> to vector<2x32xf32>
    %205 = arith.mulf %194, %204 : vector<2x32xf32>
    %206 = arith.addf %203, %205 : vector<2x32xf32>
    %207 = math.tanh %206 : vector<2x32xf32>
    %cst_62 = arith.constant 1.000000e+00 : f32
    %208 = vector.broadcast %cst_62 : f32 to vector<2x32xf32>
    %209 = arith.subf %208, %202 : vector<2x32xf32>
    %210 = arith.mulf %209, %207 : vector<2x32xf32>
    %211 = arith.mulf %202, %181 : vector<2x32xf32>
    %212 = arith.addf %210, %211 : vector<2x32xf32>
    %c4_63 = arith.constant 4 : index
    %c0_64 = arith.constant 0 : index
    %213 = vector.load %arg6[%c4_63, %c0_64] : memref<16x32xf32, #tpu.memory_space<vmem>>, vector<2x32xf32>
    tpu.vector_store %arg6[%c4_63, %c0_64], %212 {strides = array<i32>} : memref<16x32xf32, #tpu.memory_space<vmem>>, vector<2x32xf32>,
    %214 = vector.extract_strided_slice %117 {offsets = [6, 0], sizes = [2, 96], strides = [1, 1]} : vector<16x96xf32> to vector<2x96xf32>
    %cst_65 = arith.constant dense<0.000000e+00> : vector<2x96xf32>
    %215 = tpu.matmul %212, %118, %cst_65 {dimension_numbers = #tpu.dot_dimension_numbers<[1], [0], [0], [1], [0, 0, 1, 1], [], []>} : vector<2x32xf32>, vector<32x96xf32>, vector<2x96xf32> -> vector<2x96xf32>
    %216 = vector.broadcast %119 : vector<1x96xf32> to vector<2x96xf32>
    %217 = arith.addf %215, %216 : vector<2x96xf32>
    %218 = vector.extract_strided_slice %214 {offsets = [0, 0], sizes = [2, 32], strides = [1, 1]} : vector<2x96xf32> to vector<2x32xf32>
    %219 = vector.extract_strided_slice %217 {offsets = [0, 0], sizes = [2, 32], strides = [1, 1]} : vector<2x96xf32> to vector<2x32xf32>
    %220 = arith.addf %218, %219 : vector<2x32xf32>
    %221 = arith.negf %220 : vector<2x32xf32>
    %222 = math.exp %221 : vector<2x32xf32>
    %cst_66 = arith.constant 1.000000e+00 : f32
    %223 = vector.broadcast %cst_66 : f32 to vector<2x32xf32>
    %224 = arith.addf %223, %222 : vector<2x32xf32>
    %225 = arith.divf %223, %224 : vector<2x32xf32>
    %226 = vector.extract_strided_slice %214 {offsets = [0, 32], sizes = [2, 32], strides = [1, 1]} : vector<2x96xf32> to vector<2x32xf32>
    %227 = vector.extract_strided_slice %217 {offsets = [0, 32], sizes = [2, 32], strides = [1, 1]} : vector<2x96xf32> to vector<2x32xf32>
    %228 = arith.addf %226, %227 : vector<2x32xf32>
    %229 = arith.negf %228 : vector<2x32xf32>
    %230 = math.exp %229 : vector<2x32xf32>
    %cst_67 = arith.constant 1.000000e+00 : f32
    %231 = vector.broadcast %cst_67 : f32 to vector<2x32xf32>
    %232 = arith.addf %231, %230 : vector<2x32xf32>
    %233 = arith.divf %231, %232 : vector<2x32xf32>
    %234 = vector.extract_strided_slice %214 {offsets = [0, 64], sizes = [2, 32], strides = [1, 1]} : vector<2x96xf32> to vector<2x32xf32>
    %235 = vector.extract_strided_slice %217 {offsets = [0, 64], sizes = [2, 32], strides = [1, 1]} : vector<2x96xf32> to vector<2x32xf32>
    %236 = arith.mulf %225, %235 : vector<2x32xf32>
    %237 = arith.addf %234, %236 : vector<2x32xf32>
    %238 = math.tanh %237 : vector<2x32xf32>
    %cst_68 = arith.constant 1.000000e+00 : f32
    %239 = vector.broadcast %cst_68 : f32 to vector<2x32xf32>
    %240 = arith.subf %239, %233 : vector<2x32xf32>
    %241 = arith.mulf %240, %238 : vector<2x32xf32>
    %242 = arith.mulf %233, %212 : vector<2x32xf32>
    %243 = arith.addf %241, %242 : vector<2x32xf32>
    %c6_69 = arith.constant 6 : index
    %c0_70 = arith.constant 0 : index
    %244 = vector.load %arg6[%c6_69, %c0_70] : memref<16x32xf32, #tpu.memory_space<vmem>>, vector<2x32xf32>
    tpu.vector_store %arg6[%c6_69, %c0_70], %243 {strides = array<i32>} : memref<16x32xf32, #tpu.memory_space<vmem>>, vector<2x32xf32>,
    %245 = vector.extract_strided_slice %117 {offsets = [8, 0], sizes = [2, 96], strides = [1, 1]} : vector<16x96xf32> to vector<2x96xf32>
    %cst_71 = arith.constant dense<0.000000e+00> : vector<2x96xf32>
    %246 = tpu.matmul %243, %118, %cst_71 {dimension_numbers = #tpu.dot_dimension_numbers<[1], [0], [0], [1], [0, 0, 1, 1], [], []>} : vector<2x32xf32>, vector<32x96xf32>, vector<2x96xf32> -> vector<2x96xf32>
    %247 = vector.broadcast %119 : vector<1x96xf32> to vector<2x96xf32>
    %248 = arith.addf %246, %247 : vector<2x96xf32>
    %249 = vector.extract_strided_slice %245 {offsets = [0, 0], sizes = [2, 32], strides = [1, 1]} : vector<2x96xf32> to vector<2x32xf32>
    %250 = vector.extract_strided_slice %248 {offsets = [0, 0], sizes = [2, 32], strides = [1, 1]} : vector<2x96xf32> to vector<2x32xf32>
    %251 = arith.addf %249, %250 : vector<2x32xf32>
    %252 = arith.negf %251 : vector<2x32xf32>
    %253 = math.exp %252 : vector<2x32xf32>
    %cst_72 = arith.constant 1.000000e+00 : f32
    %254 = vector.broadcast %cst_72 : f32 to vector<2x32xf32>
    %255 = arith.addf %254, %253 : vector<2x32xf32>
    %256 = arith.divf %254, %255 : vector<2x32xf32>
    %257 = vector.extract_strided_slice %245 {offsets = [0, 32], sizes = [2, 32], strides = [1, 1]} : vector<2x96xf32> to vector<2x32xf32>
    %258 = vector.extract_strided_slice %248 {offsets = [0, 32], sizes = [2, 32], strides = [1, 1]} : vector<2x96xf32> to vector<2x32xf32>
    %259 = arith.addf %257, %258 : vector<2x32xf32>
    %260 = arith.negf %259 : vector<2x32xf32>
    %261 = math.exp %260 : vector<2x32xf32>
    %cst_73 = arith.constant 1.000000e+00 : f32
    %262 = vector.broadcast %cst_73 : f32 to vector<2x32xf32>
    %263 = arith.addf %262, %261 : vector<2x32xf32>
    %264 = arith.divf %262, %263 : vector<2x32xf32>
    %265 = vector.extract_strided_slice %245 {offsets = [0, 64], sizes = [2, 32], strides = [1, 1]} : vector<2x96xf32> to vector<2x32xf32>
    %266 = vector.extract_strided_slice %248 {offsets = [0, 64], sizes = [2, 32], strides = [1, 1]} : vector<2x96xf32> to vector<2x32xf32>
    %267 = arith.mulf %256, %266 : vector<2x32xf32>
    %268 = arith.addf %265, %267 : vector<2x32xf32>
    %269 = math.tanh %268 : vector<2x32xf32>
    %cst_74 = arith.constant 1.000000e+00 : f32
    %270 = vector.broadcast %cst_74 : f32 to vector<2x32xf32>
    %271 = arith.subf %270, %264 : vector<2x32xf32>
    %272 = arith.mulf %271, %269 : vector<2x32xf32>
    %273 = arith.mulf %264, %243 : vector<2x32xf32>
    %274 = arith.addf %272, %273 : vector<2x32xf32>
    %c8_75 = arith.constant 8 : index
    %c0_76 = arith.constant 0 : index
    %275 = vector.load %arg6[%c8_75, %c0_76] : memref<16x32xf32, #tpu.memory_space<vmem>>, vector<2x32xf32>
    tpu.vector_store %arg6[%c8_75, %c0_76], %274 {strides = array<i32>} : memref<16x32xf32, #tpu.memory_space<vmem>>, vector<2x32xf32>,
    %276 = vector.extract_strided_slice %117 {offsets = [10, 0], sizes = [2, 96], strides = [1, 1]} : vector<16x96xf32> to vector<2x96xf32>
    %cst_77 = arith.constant dense<0.000000e+00> : vector<2x96xf32>
    %277 = tpu.matmul %274, %118, %cst_77 {dimension_numbers = #tpu.dot_dimension_numbers<[1], [0], [0], [1], [0, 0, 1, 1], [], []>} : vector<2x32xf32>, vector<32x96xf32>, vector<2x96xf32> -> vector<2x96xf32>
    %278 = vector.broadcast %119 : vector<1x96xf32> to vector<2x96xf32>
    %279 = arith.addf %277, %278 : vector<2x96xf32>
    %280 = vector.extract_strided_slice %276 {offsets = [0, 0], sizes = [2, 32], strides = [1, 1]} : vector<2x96xf32> to vector<2x32xf32>
    %281 = vector.extract_strided_slice %279 {offsets = [0, 0], sizes = [2, 32], strides = [1, 1]} : vector<2x96xf32> to vector<2x32xf32>
    %282 = arith.addf %280, %281 : vector<2x32xf32>
    %283 = arith.negf %282 : vector<2x32xf32>
    %284 = math.exp %283 : vector<2x32xf32>
    %cst_78 = arith.constant 1.000000e+00 : f32
    %285 = vector.broadcast %cst_78 : f32 to vector<2x32xf32>
    %286 = arith.addf %285, %284 : vector<2x32xf32>
    %287 = arith.divf %285, %286 : vector<2x32xf32>
    %288 = vector.extract_strided_slice %276 {offsets = [0, 32], sizes = [2, 32], strides = [1, 1]} : vector<2x96xf32> to vector<2x32xf32>
    %289 = vector.extract_strided_slice %279 {offsets = [0, 32], sizes = [2, 32], strides = [1, 1]} : vector<2x96xf32> to vector<2x32xf32>
    %290 = arith.addf %288, %289 : vector<2x32xf32>
    %291 = arith.negf %290 : vector<2x32xf32>
    %292 = math.exp %291 : vector<2x32xf32>
    %cst_79 = arith.constant 1.000000e+00 : f32
    %293 = vector.broadcast %cst_79 : f32 to vector<2x32xf32>
    %294 = arith.addf %293, %292 : vector<2x32xf32>
    %295 = arith.divf %293, %294 : vector<2x32xf32>
    %296 = vector.extract_strided_slice %276 {offsets = [0, 64], sizes = [2, 32], strides = [1, 1]} : vector<2x96xf32> to vector<2x32xf32>
    %297 = vector.extract_strided_slice %279 {offsets = [0, 64], sizes = [2, 32], strides = [1, 1]} : vector<2x96xf32> to vector<2x32xf32>
    %298 = arith.mulf %287, %297 : vector<2x32xf32>
    %299 = arith.addf %296, %298 : vector<2x32xf32>
    %300 = math.tanh %299 : vector<2x32xf32>
    %cst_80 = arith.constant 1.000000e+00 : f32
    %301 = vector.broadcast %cst_80 : f32 to vector<2x32xf32>
    %302 = arith.subf %301, %295 : vector<2x32xf32>
    %303 = arith.mulf %302, %300 : vector<2x32xf32>
    %304 = arith.mulf %295, %274 : vector<2x32xf32>
    %305 = arith.addf %303, %304 : vector<2x32xf32>
    %c10_81 = arith.constant 10 : index
    %c0_82 = arith.constant 0 : index
    %306 = vector.load %arg6[%c10_81, %c0_82] : memref<16x32xf32, #tpu.memory_space<vmem>>, vector<2x32xf32>
    tpu.vector_store %arg6[%c10_81, %c0_82], %305 {strides = array<i32>} : memref<16x32xf32, #tpu.memory_space<vmem>>, vector<2x32xf32>,
    %307 = vector.extract_strided_slice %117 {offsets = [12, 0], sizes = [2, 96], strides = [1, 1]} : vector<16x96xf32> to vector<2x96xf32>
    %cst_83 = arith.constant dense<0.000000e+00> : vector<2x96xf32>
    %308 = tpu.matmul %305, %118, %cst_83 {dimension_numbers = #tpu.dot_dimension_numbers<[1], [0], [0], [1], [0, 0, 1, 1], [], []>} : vector<2x32xf32>, vector<32x96xf32>, vector<2x96xf32> -> vector<2x96xf32>
    %309 = vector.broadcast %119 : vector<1x96xf32> to vector<2x96xf32>
    %310 = arith.addf %308, %309 : vector<2x96xf32>
    %311 = vector.extract_strided_slice %307 {offsets = [0, 0], sizes = [2, 32], strides = [1, 1]} : vector<2x96xf32> to vector<2x32xf32>
    %312 = vector.extract_strided_slice %310 {offsets = [0, 0], sizes = [2, 32], strides = [1, 1]} : vector<2x96xf32> to vector<2x32xf32>
    %313 = arith.addf %311, %312 : vector<2x32xf32>
    %314 = arith.negf %313 : vector<2x32xf32>
    %315 = math.exp %314 : vector<2x32xf32>
    %cst_84 = arith.constant 1.000000e+00 : f32
    %316 = vector.broadcast %cst_84 : f32 to vector<2x32xf32>
    %317 = arith.addf %316, %315 : vector<2x32xf32>
    %318 = arith.divf %316, %317 : vector<2x32xf32>
    %319 = vector.extract_strided_slice %307 {offsets = [0, 32], sizes = [2, 32], strides = [1, 1]} : vector<2x96xf32> to vector<2x32xf32>
    %320 = vector.extract_strided_slice %310 {offsets = [0, 32], sizes = [2, 32], strides = [1, 1]} : vector<2x96xf32> to vector<2x32xf32>
    %321 = arith.addf %319, %320 : vector<2x32xf32>
    %322 = arith.negf %321 : vector<2x32xf32>
    %323 = math.exp %322 : vector<2x32xf32>
    %cst_85 = arith.constant 1.000000e+00 : f32
    %324 = vector.broadcast %cst_85 : f32 to vector<2x32xf32>
    %325 = arith.addf %324, %323 : vector<2x32xf32>
    %326 = arith.divf %324, %325 : vector<2x32xf32>
    %327 = vector.extract_strided_slice %307 {offsets = [0, 64], sizes = [2, 32], strides = [1, 1]} : vector<2x96xf32> to vector<2x32xf32>
    %328 = vector.extract_strided_slice %310 {offsets = [0, 64], sizes = [2, 32], strides = [1, 1]} : vector<2x96xf32> to vector<2x32xf32>
    %329 = arith.mulf %318, %328 : vector<2x32xf32>
    %330 = arith.addf %327, %329 : vector<2x32xf32>
    %331 = math.tanh %330 : vector<2x32xf32>
    %cst_86 = arith.constant 1.000000e+00 : f32
    %332 = vector.broadcast %cst_86 : f32 to vector<2x32xf32>
    %333 = arith.subf %332, %326 : vector<2x32xf32>
    %334 = arith.mulf %333, %331 : vector<2x32xf32>
    %335 = arith.mulf %326, %305 : vector<2x32xf32>
    %336 = arith.addf %334, %335 : vector<2x32xf32>
    %c12 = arith.constant 12 : index
    %c0_87 = arith.constant 0 : index
    %337 = vector.load %arg6[%c12, %c0_87] : memref<16x32xf32, #tpu.memory_space<vmem>>, vector<2x32xf32>
    tpu.vector_store %arg6[%c12, %c0_87], %336 {strides = array<i32>} : memref<16x32xf32, #tpu.memory_space<vmem>>, vector<2x32xf32>,
    %338 = vector.extract_strided_slice %117 {offsets = [14, 0], sizes = [2, 96], strides = [1, 1]} : vector<16x96xf32> to vector<2x96xf32>
    %cst_88 = arith.constant dense<0.000000e+00> : vector<2x96xf32>
    %339 = tpu.matmul %336, %118, %cst_88 {dimension_numbers = #tpu.dot_dimension_numbers<[1], [0], [0], [1], [0, 0, 1, 1], [], []>} : vector<2x32xf32>, vector<32x96xf32>, vector<2x96xf32> -> vector<2x96xf32>
    %340 = vector.broadcast %119 : vector<1x96xf32> to vector<2x96xf32>
    %341 = arith.addf %339, %340 : vector<2x96xf32>
    %342 = vector.extract_strided_slice %338 {offsets = [0, 0], sizes = [2, 32], strides = [1, 1]} : vector<2x96xf32> to vector<2x32xf32>
    %343 = vector.extract_strided_slice %341 {offsets = [0, 0], sizes = [2, 32], strides = [1, 1]} : vector<2x96xf32> to vector<2x32xf32>
    %344 = arith.addf %342, %343 : vector<2x32xf32>
    %345 = arith.negf %344 : vector<2x32xf32>
    %346 = math.exp %345 : vector<2x32xf32>
    %cst_89 = arith.constant 1.000000e+00 : f32
    %347 = vector.broadcast %cst_89 : f32 to vector<2x32xf32>
    %348 = arith.addf %347, %346 : vector<2x32xf32>
    %349 = arith.divf %347, %348 : vector<2x32xf32>
    %350 = vector.extract_strided_slice %338 {offsets = [0, 32], sizes = [2, 32], strides = [1, 1]} : vector<2x96xf32> to vector<2x32xf32>
    %351 = vector.extract_strided_slice %341 {offsets = [0, 32], sizes = [2, 32], strides = [1, 1]} : vector<2x96xf32> to vector<2x32xf32>
    %352 = arith.addf %350, %351 : vector<2x32xf32>
    %353 = arith.negf %352 : vector<2x32xf32>
    %354 = math.exp %353 : vector<2x32xf32>
    %cst_90 = arith.constant 1.000000e+00 : f32
    %355 = vector.broadcast %cst_90 : f32 to vector<2x32xf32>
    %356 = arith.addf %355, %354 : vector<2x32xf32>
    %357 = arith.divf %355, %356 : vector<2x32xf32>
    %358 = vector.extract_strided_slice %338 {offsets = [0, 64], sizes = [2, 32], strides = [1, 1]} : vector<2x96xf32> to vector<2x32xf32>
    %359 = vector.extract_strided_slice %341 {offsets = [0, 64], sizes = [2, 32], strides = [1, 1]} : vector<2x96xf32> to vector<2x32xf32>
    %360 = arith.mulf %349, %359 : vector<2x32xf32>
    %361 = arith.addf %358, %360 : vector<2x32xf32>
    %362 = math.tanh %361 : vector<2x32xf32>
    %cst_91 = arith.constant 1.000000e+00 : f32
    %363 = vector.broadcast %cst_91 : f32 to vector<2x32xf32>
    %364 = arith.subf %363, %357 : vector<2x32xf32>
    %365 = arith.mulf %364, %362 : vector<2x32xf32>
    %366 = arith.mulf %357, %336 : vector<2x32xf32>
    %367 = arith.addf %365, %366 : vector<2x32xf32>
    %c14 = arith.constant 14 : index
    %c0_92 = arith.constant 0 : index
    %368 = vector.load %arg6[%c14, %c0_92] : memref<16x32xf32, #tpu.memory_space<vmem>>, vector<2x32xf32>
    tpu.vector_store %arg6[%c14, %c0_92], %367 {strides = array<i32>} : memref<16x32xf32, #tpu.memory_space<vmem>>, vector<2x32xf32>,
    %c0_93 = arith.constant 0 : index
    %c0_94 = arith.constant 0 : index
    %369 = vector.load %arg6[%c0_93, %c0_94] : memref<16x32xf32, #tpu.memory_space<vmem>>, vector<16x32xf32>
    %c160 = arith.constant 160 : index
    %c0_95 = arith.constant 0 : index
    %370 = vector.load %arg2[%c160, %c0_95] : memref<288x128xf32, #tpu.memory_space<vmem>>, vector<32x32xf32>
    %cst_96 = arith.constant dense<0.000000e+00> : vector<16x32xf32>
    %371 = tpu.matmul %369, %370, %cst_96 {dimension_numbers = #tpu.dot_dimension_numbers<[1], [0], [0], [1], [0, 0, 1, 1], [], []>} : vector<16x32xf32>, vector<32x32xf32>, vector<16x32xf32> -> vector<16x32xf32>
    %c12_97 = arith.constant 12 : index
    %c0_98 = arith.constant 0 : index
    %372 = vector.load %arg3[%c12_97, %c0_98] : memref<24x128xf32, #tpu.memory_space<vmem>>, vector<1x32xf32>
    %373 = vector.broadcast %1 : vector<16x1xf32> to vector<16x32xf32>
    %374 = vector.broadcast %372 : vector<1x32xf32> to vector<16x32xf32>
    %375 = arith.mulf %373, %374 : vector<16x32xf32>
    %376 = arith.addf %371, %375 : vector<16x32xf32>
    %c13 = arith.constant 13 : index
    %c0_99 = arith.constant 0 : index
    %377 = vector.load %arg3[%c13, %c0_99] : memref<24x128xf32, #tpu.memory_space<vmem>>, vector<1x32xf32>
    %378 = vector.broadcast %2 : vector<16x1xf32> to vector<16x32xf32>
    %379 = vector.broadcast %377 : vector<1x32xf32> to vector<16x32xf32>
    %380 = arith.mulf %378, %379 : vector<16x32xf32>
    %381 = arith.addf %376, %380 : vector<16x32xf32>
    %c14_100 = arith.constant 14 : index
    %c0_101 = arith.constant 0 : index
    %382 = vector.load %arg3[%c14_100, %c0_101] : memref<24x128xf32, #tpu.memory_space<vmem>>, vector<1x32xf32>
    %383 = vector.broadcast %382 : vector<1x32xf32> to vector<16x32xf32>
    %384 = arith.addf %381, %383 : vector<16x32xf32>
    %cst_102 = arith.constant dense<0.000000e+00> : vector<16xf32>
    %385 = vector.multi_reduction <add>, %384, %cst_102 [1] : vector<16x32xf32> to vector<16xf32>
    %386 = vector.shape_cast %385 : vector<16xf32> to vector<16x1xf32>
    %cst_103 = arith.constant 3.200000e+01 : f32
    %387 = vector.broadcast %cst_103 : f32 to vector<16x1xf32>
    %388 = arith.divf %386, %387 : vector<16x1xf32>
    %389 = arith.mulf %384, %384 : vector<16x32xf32>
    %cst_104 = arith.constant dense<0.000000e+00> : vector<16xf32>
    %390 = vector.multi_reduction <add>, %389, %cst_104 [1] : vector<16x32xf32> to vector<16xf32>
    %391 = vector.shape_cast %390 : vector<16xf32> to vector<16x1xf32>
    %cst_105 = arith.constant 3.200000e+01 : f32
    %392 = vector.broadcast %cst_105 : f32 to vector<16x1xf32>
    %393 = arith.divf %391, %392 : vector<16x1xf32>
    %394 = arith.mulf %388, %388 : vector<16x1xf32>
    %395 = arith.subf %393, %394 : vector<16x1xf32>
    %396 = vector.broadcast %388 : vector<16x1xf32> to vector<16x32xf32>
    %397 = arith.subf %384, %396 : vector<16x32xf32>
    %cst_106 = arith.constant 9.99999974E-6 : f32
    %398 = vector.broadcast %cst_106 : f32 to vector<16x1xf32>
    %399 = arith.addf %395, %398 : vector<16x1xf32>
    %400 = math.rsqrt %399 : vector<16x1xf32>
    %401 = vector.broadcast %400 : vector<16x1xf32> to vector<16x32xf32>
    %402 = arith.mulf %397, %401 : vector<16x32xf32>
    %c15 = arith.constant 15 : index
    %c0_107 = arith.constant 0 : index
    %403 = vector.load %arg3[%c15, %c0_107] : memref<24x128xf32, #tpu.memory_space<vmem>>, vector<1x32xf32>
    %404 = vector.broadcast %403 : vector<1x32xf32> to vector<16x32xf32>
    %405 = arith.mulf %402, %404 : vector<16x32xf32>
    %c16 = arith.constant 16 : index
    %c0_108 = arith.constant 0 : index
    %406 = vector.load %arg3[%c16, %c0_108] : memref<24x128xf32, #tpu.memory_space<vmem>>, vector<1x32xf32>
    %407 = vector.broadcast %406 : vector<1x32xf32> to vector<16x32xf32>
    %408 = arith.addf %405, %407 : vector<16x32xf32>
    %cst_109 = arith.constant 0.000000e+00 : f32
    %409 = vector.broadcast %cst_109 : f32 to vector<16x32xf32>
    %410 = arith.cmpf ogt, %408, %409 : vector<16x32xf32>
    %cst_110 = arith.constant 0.00999999977 : f32
    %411 = vector.broadcast %cst_110 : f32 to vector<16x32xf32>
    %412 = arith.mulf %411, %408 : vector<16x32xf32>
    %413 = arith.select %410, %408, %412 : vector<16x32xi1>, vector<16x32xf32>
    %c192 = arith.constant 192 : index
    %c0_111 = arith.constant 0 : index
    %414 = vector.load %arg2[%c192, %c0_111] : memref<288x128xf32, #tpu.memory_space<vmem>>, vector<32x32xf32>
    %cst_112 = arith.constant dense<0.000000e+00> : vector<16x32xf32>
    %415 = tpu.matmul %413, %414, %cst_112 {dimension_numbers = #tpu.dot_dimension_numbers<[1], [0], [0], [1], [0, 0, 1, 1], [], []>} : vector<16x32xf32>, vector<32x32xf32>, vector<16x32xf32> -> vector<16x32xf32>
    %c17 = arith.constant 17 : index
    %c0_113 = arith.constant 0 : index
    %416 = vector.load %arg3[%c17, %c0_113] : memref<24x128xf32, #tpu.memory_space<vmem>>, vector<1x32xf32>
    %417 = vector.broadcast %416 : vector<1x32xf32> to vector<16x32xf32>
    %418 = arith.addf %415, %417 : vector<16x32xf32>
    %cst_114 = arith.constant dense<0.000000e+00> : vector<16xf32>
    %419 = vector.multi_reduction <add>, %418, %cst_114 [1] : vector<16x32xf32> to vector<16xf32>
    %420 = vector.shape_cast %419 : vector<16xf32> to vector<16x1xf32>
    %cst_115 = arith.constant 3.200000e+01 : f32
    %421 = vector.broadcast %cst_115 : f32 to vector<16x1xf32>
    %422 = arith.divf %420, %421 : vector<16x1xf32>
    %423 = arith.mulf %418, %418 : vector<16x32xf32>
    %cst_116 = arith.constant dense<0.000000e+00> : vector<16xf32>
    %424 = vector.multi_reduction <add>, %423, %cst_116 [1] : vector<16x32xf32> to vector<16xf32>
    %425 = vector.shape_cast %424 : vector<16xf32> to vector<16x1xf32>
    %cst_117 = arith.constant 3.200000e+01 : f32
    %426 = vector.broadcast %cst_117 : f32 to vector<16x1xf32>
    %427 = arith.divf %425, %426 : vector<16x1xf32>
    %428 = arith.mulf %422, %422 : vector<16x1xf32>
    %429 = arith.subf %427, %428 : vector<16x1xf32>
    %430 = vector.broadcast %422 : vector<16x1xf32> to vector<16x32xf32>
    %431 = arith.subf %418, %430 : vector<16x32xf32>
    %cst_118 = arith.constant 9.99999974E-6 : f32
    %432 = vector.broadcast %cst_118 : f32 to vector<16x1xf32>
    %433 = arith.addf %429, %432 : vector<16x1xf32>
    %434 = math.rsqrt %433 : vector<16x1xf32>
    %435 = vector.broadcast %434 : vector<16x1xf32> to vector<16x32xf32>
    %436 = arith.mulf %431, %435 : vector<16x32xf32>
    %c18 = arith.constant 18 : index
    %c0_119 = arith.constant 0 : index
    %437 = vector.load %arg3[%c18, %c0_119] : memref<24x128xf32, #tpu.memory_space<vmem>>, vector<1x32xf32>
    %438 = vector.broadcast %437 : vector<1x32xf32> to vector<16x32xf32>
    %439 = arith.mulf %436, %438 : vector<16x32xf32>
    %c19 = arith.constant 19 : index
    %c0_120 = arith.constant 0 : index
    %440 = vector.load %arg3[%c19, %c0_120] : memref<24x128xf32, #tpu.memory_space<vmem>>, vector<1x32xf32>
    %441 = vector.broadcast %440 : vector<1x32xf32> to vector<16x32xf32>
    %442 = arith.addf %439, %441 : vector<16x32xf32>
    %cst_121 = arith.constant 0.000000e+00 : f32
    %443 = vector.broadcast %cst_121 : f32 to vector<16x32xf32>
    %444 = arith.cmpf ogt, %442, %443 : vector<16x32xf32>
    %cst_122 = arith.constant 0.00999999977 : f32
    %445 = vector.broadcast %cst_122 : f32 to vector<16x32xf32>
    %446 = arith.mulf %445, %442 : vector<16x32xf32>
    %447 = arith.select %444, %442, %446 : vector<16x32xi1>, vector<16x32xf32>
    %c224 = arith.constant 224 : index
    %c0_123 = arith.constant 0 : index
    %448 = vector.load %arg2[%c224, %c0_123] : memref<288x128xf32, #tpu.memory_space<vmem>>, vector<32x32xf32>
    %cst_124 = arith.constant dense<0.000000e+00> : vector<16x32xf32>
    %449 = tpu.matmul %447, %448, %cst_124 {dimension_numbers = #tpu.dot_dimension_numbers<[1], [0], [0], [1], [0, 0, 1, 1], [], []>} : vector<16x32xf32>, vector<32x32xf32>, vector<16x32xf32> -> vector<16x32xf32>
    %c20 = arith.constant 20 : index
    %c0_125 = arith.constant 0 : index
    %450 = vector.load %arg3[%c20, %c0_125] : memref<24x128xf32, #tpu.memory_space<vmem>>, vector<1x32xf32>
    %451 = vector.broadcast %450 : vector<1x32xf32> to vector<16x32xf32>
    %452 = arith.addf %449, %451 : vector<16x32xf32>
    %cst_126 = arith.constant dense<0.000000e+00> : vector<16xf32>
    %453 = vector.multi_reduction <add>, %452, %cst_126 [1] : vector<16x32xf32> to vector<16xf32>
    %454 = vector.shape_cast %453 : vector<16xf32> to vector<16x1xf32>
    %cst_127 = arith.constant 3.200000e+01 : f32
    %455 = vector.broadcast %cst_127 : f32 to vector<16x1xf32>
    %456 = arith.divf %454, %455 : vector<16x1xf32>
    %457 = arith.mulf %452, %452 : vector<16x32xf32>
    %cst_128 = arith.constant dense<0.000000e+00> : vector<16xf32>
    %458 = vector.multi_reduction <add>, %457, %cst_128 [1] : vector<16x32xf32> to vector<16xf32>
    %459 = vector.shape_cast %458 : vector<16xf32> to vector<16x1xf32>
    %cst_129 = arith.constant 3.200000e+01 : f32
    %460 = vector.broadcast %cst_129 : f32 to vector<16x1xf32>
    %461 = arith.divf %459, %460 : vector<16x1xf32>
    %462 = arith.mulf %456, %456 : vector<16x1xf32>
    %463 = arith.subf %461, %462 : vector<16x1xf32>
    %464 = vector.broadcast %456 : vector<16x1xf32> to vector<16x32xf32>
    %465 = arith.subf %452, %464 : vector<16x32xf32>
    %cst_130 = arith.constant 9.99999974E-6 : f32
    %466 = vector.broadcast %cst_130 : f32 to vector<16x1xf32>
    %467 = arith.addf %463, %466 : vector<16x1xf32>
    %468 = math.rsqrt %467 : vector<16x1xf32>
    %469 = vector.broadcast %468 : vector<16x1xf32> to vector<16x32xf32>
    %470 = arith.mulf %465, %469 : vector<16x32xf32>
    %c21 = arith.constant 21 : index
    %c0_131 = arith.constant 0 : index
    %471 = vector.load %arg3[%c21, %c0_131] : memref<24x128xf32, #tpu.memory_space<vmem>>, vector<1x32xf32>
    %472 = vector.broadcast %471 : vector<1x32xf32> to vector<16x32xf32>
    %473 = arith.mulf %470, %472 : vector<16x32xf32>
    %c22 = arith.constant 22 : index
    %c0_132 = arith.constant 0 : index
    %474 = vector.load %arg3[%c22, %c0_132] : memref<24x128xf32, #tpu.memory_space<vmem>>, vector<1x32xf32>
    %475 = vector.broadcast %474 : vector<1x32xf32> to vector<16x32xf32>
    %476 = arith.addf %473, %475 : vector<16x32xf32>
    %cst_133 = arith.constant 0.000000e+00 : f32
    %477 = vector.broadcast %cst_133 : f32 to vector<16x32xf32>
    %478 = arith.cmpf ogt, %476, %477 : vector<16x32xf32>
    %cst_134 = arith.constant 0.00999999977 : f32
    %479 = vector.broadcast %cst_134 : f32 to vector<16x32xf32>
    %480 = arith.mulf %479, %476 : vector<16x32xf32>
    %481 = arith.select %478, %476, %480 : vector<16x32xi1>, vector<16x32xf32>
    %c256 = arith.constant 256 : index
    %c0_135 = arith.constant 0 : index
    %482 = vector.load %arg2[%c256, %c0_135] : memref<288x128xf32, #tpu.memory_space<vmem>>, vector<32x128xf32>
    %cst_136 = arith.constant dense<0.000000e+00> : vector<16x128xf32>
    %483 = tpu.matmul %481, %482, %cst_136 {dimension_numbers = #tpu.dot_dimension_numbers<[1], [0], [0], [1], [0, 0, 1, 1], [], []>} : vector<16x32xf32>, vector<32x128xf32>, vector<16x128xf32> -> vector<16x128xf32>
    %c23 = arith.constant 23 : index
    %c0_137 = arith.constant 0 : index
    %484 = vector.load %arg3[%c23, %c0_137] : memref<24x128xf32, #tpu.memory_space<vmem>>, vector<1x128xf32>
    %485 = vector.broadcast %484 : vector<1x128xf32> to vector<16x128xf32>
    %486 = arith.addf %483, %485 : vector<16x128xf32>
    %cst_138 = arith.constant 5.000000e+00 : f32
    %487 = vector.broadcast %cst_138 : f32 to vector<16x128xf32>
    %488 = arith.subf %486, %487 : vector<16x128xf32>
    %cst_139 = arith.constant 0.000000e+00 : f32
    %489 = vector.broadcast %cst_139 : f32 to vector<16x128xf32>
    %490 = arith.subf %489, %488 : vector<16x128xf32>
    %cst_140 = arith.constant 0.000000e+00 : f32
    %491 = vector.broadcast %cst_140 : f32 to vector<16x128xf32>
    %492 = arith.maximumf %490, %491 : vector<16x128xf32>
    %493 = math.absf %488 : vector<16x128xf32>
    %cst_141 = arith.constant 0.000000e+00 : f32
    %494 = vector.broadcast %cst_141 : f32 to vector<16x128xf32>
    %495 = arith.subf %494, %493 : vector<16x128xf32>
    %496 = math.exp %495 : vector<16x128xf32>
    %cst_142 = arith.constant 1.000000e+00 : f32
    %497 = vector.broadcast %cst_142 : f32 to vector<16x128xf32>
    %498 = arith.addf %497, %496 : vector<16x128xf32>
    %499 = math.log %498 : vector<16x128xf32>
    %500 = arith.addf %492, %499 : vector<16x128xf32>
    %cst_143 = arith.constant -2.30258512 : f32
    %501 = vector.broadcast %cst_143 : f32 to vector<16x128xf32>
    %502 = arith.mulf %501, %500 : vector<16x128xf32>
    %503 = math.exp %502 : vector<16x128xf32>
    %cst_144 = arith.constant 2.000000e+00 : f32
    %504 = vector.broadcast %cst_144 : f32 to vector<16x128xf32>
    %505 = arith.mulf %504, %503 : vector<16x128xf32>
    %cst_145 = arith.constant 1.000000e-07 : f32
    %506 = vector.broadcast %cst_145 : f32 to vector<16x128xf32>
    %507 = arith.addf %505, %506 : vector<16x128xf32>
    %c0_146 = arith.constant 0 : index
    %c0_147 = arith.constant 0 : index
    %508 = vector.load %arg4[%c0_146, %c0_147] : memref<18x128xf32, #tpu.memory_space<vmem>>, vector<16x128xf32>
    tpu.vector_store %arg4[%c0_146, %c0_147], %507 {strides = array<i32>} : memref<18x128xf32, #tpu.memory_space<vmem>>, vector<16x128xf32>,
    %509 = vector.extract_strided_slice %486 {offsets = [0, 0], sizes = [16, 16], strides = [1, 1]} : vector<16x128xf32> to vector<16x16xf32>
    %cst_148 = arith.constant 0.000000e+00 : f32
    %510 = vector.broadcast %cst_148 : f32 to vector<16x16xf32>
    %511 = arith.subf %510, %509 : vector<16x16xf32>
    %cst_149 = arith.constant 0.000000e+00 : f32
    %512 = vector.broadcast %cst_149 : f32 to vector<16x16xf32>
    %513 = arith.maximumf %511, %512 : vector<16x16xf32>
    %514 = math.absf %509 : vector<16x16xf32>
    %cst_150 = arith.constant 0.000000e+00 : f32
    %515 = vector.broadcast %cst_150 : f32 to vector<16x16xf32>
    %516 = arith.subf %515, %514 : vector<16x16xf32>
    %517 = math.exp %516 : vector<16x16xf32>
    %cst_151 = arith.constant 1.000000e+00 : f32
    %518 = vector.broadcast %cst_151 : f32 to vector<16x16xf32>
    %519 = arith.addf %518, %517 : vector<16x16xf32>
    %520 = math.log %519 : vector<16x16xf32>
    %521 = arith.addf %513, %520 : vector<16x16xf32>
    %cst_152 = arith.constant -2.30258512 : f32
    %522 = vector.broadcast %cst_152 : f32 to vector<16x16xf32>
    %523 = arith.mulf %522, %521 : vector<16x16xf32>
    %524 = math.exp %523 : vector<16x16xf32>
    %cst_153 = arith.constant 2.000000e+00 : f32
    %525 = vector.broadcast %cst_153 : f32 to vector<16x16xf32>
    %526 = arith.mulf %525, %524 : vector<16x16xf32>
    %cst_154 = arith.constant 1.000000e-07 : f32
    %527 = vector.broadcast %cst_154 : f32 to vector<16x16xf32>
    %528 = arith.addf %526, %527 : vector<16x16xf32>
    %529 = vector.extract_strided_slice %528 {offsets = [0, 0], sizes = [16, 1], strides = [1, 1]} : vector<16x16xf32> to vector<16x1xf32>
    %530 = vector.extract_strided_slice %528 {offsets = [0, 1], sizes = [16, 15], strides = [1, 1]} : vector<16x16xf32> to vector<16x15xf32>
    %531 = tpu.iota {dimensions = array<i32: 1>} : vector<1x15xi32>
    %c1_i32 = arith.constant 1 : i32
    %532 = vector.broadcast %c1_i32 : i32 to vector<1x15xi32>
    %533 = arith.addi %531, %532 : vector<1x15xi32>
    %534 = arith.sitofp %533 : vector<1x15xi32> to vector<1x15xf32>
    %535 = vector.broadcast %1 : vector<16x1xf32> to vector<16x15xf32>
    %536 = vector.broadcast %534 : vector<1x15xf32> to vector<16x15xf32>
    %537 = arith.mulf %535, %536 : vector<16x15xf32>
    %cst_155 = arith.constant 3.200000e+01 : f32
    %538 = vector.broadcast %cst_155 : f32 to vector<16x15xf32>
    %539 = arith.cmpf olt, %537, %538 : vector<16x15xf32>
    %540 = arith.extui %539 : vector<16x15xi1> to vector<16x15xi32>
    %541 = arith.sitofp %540 : vector<16x15xi32> to vector<16x15xf32>
    %cst_156 = arith.constant 9.99999974E-5 : f32
    %542 = vector.broadcast %cst_156 : f32 to vector<16x15xf32>
    %543 = arith.addf %541, %542 : vector<16x15xf32>
    %544 = arith.mulf %530, %543 : vector<16x15xf32>
    %cst_157 = arith.constant dense<0.000000e+00> : vector<16xf32>
    %545 = vector.multi_reduction <add>, %544, %cst_157 [1] : vector<16x15xf32> to vector<16xf32>
    %546 = vector.shape_cast %545 : vector<16xf32> to vector<16x1xf32>
    %547 = vector.broadcast %546 : vector<16x1xf32> to vector<16x15xf32>
    %548 = arith.divf %544, %547 : vector<16x15xf32>
    %549 = vector.broadcast %529 : vector<16x1xf32> to vector<16x15xf32>
    %550 = arith.mulf %548, %549 : vector<16x15xf32>
    %551 = tpu.iota {dimensions = array<i32: 0>} : vector<8x128xi32>
    %552 = arith.sitofp %551 : vector<8x128xi32> to vector<8x128xf32>
    %553 = tpu.iota {dimensions = array<i32: 1>} : vector<8x128xi32>
    %554 = arith.sitofp %553 : vector<8x128xi32> to vector<8x128xf32>
    %cst_158 = arith.constant 1.600000e+01 : f32
    %555 = vector.broadcast %cst_158 : f32 to vector<8x128xf32>
    %556 = arith.mulf %552, %555 : vector<8x128xf32>
    %557 = arith.subf %554, %556 : vector<8x128xf32>
    %cst_159 = arith.constant 1.000000e+00 : f32
    %558 = vector.broadcast %cst_159 : f32 to vector<8x128xf32>
    %559 = arith.addf %557, %558 : vector<8x128xf32>
    %cst_160 = arith.constant 0.000000e+00 : f32
    %cst_161 = arith.constant 1.600000e+01 : f32
    %560 = vector.broadcast %cst_160 : f32 to vector<8x128xf32>
    %561 = arith.maximumf %560, %559 : vector<8x128xf32>
    %562 = vector.broadcast %cst_161 : f32 to vector<8x128xf32>
    %563 = arith.minimumf %562, %561 : vector<8x128xf32>
    %cst_162 = arith.constant 0.0981747731 : f32
    %564 = vector.broadcast %cst_162 : f32 to vector<8x128xf32>
    %565 = arith.mulf %564, %563 : vector<8x128xf32>
    %cst_163 = arith.constant dense<0.000000e+00> : vector<2x128xf32>
    %566 = tpu.matmul %3, %565, %cst_163 {dimension_numbers = #tpu.dot_dimension_numbers<[1], [0], [0], [1], [0, 0, 1, 1], [], []>} : vector<2x8xf32>, vector<8x128xf32>, vector<2x128xf32> -> vector<2x128xf32>
    %567 = math.sin %566 : vector<2x128xf32>
    %568 = math.cos %566 : vector<2x128xf32>
    %cst_164 = arith.constant 2.000000e+00 : f32
    %569 = vector.broadcast %cst_164 : f32 to vector<2x128xf32>
    %570 = arith.mulf %569, %568 : vector<2x128xf32>
    %571 = tpu.iota {dimensions = array<i32: 0>} : vector<16x128xi32>
    %572 = tpu.iota {dimensions = array<i32: 1>} : vector<16x128xi32>
    %c4_i32 = arith.constant 4 : i32
    %573 = vector.broadcast %c4_i32 : i32 to vector<16x128xi32>
    %574 = arith.shrsi %572, %573 : vector<16x128xi32>
    %cst_165 = arith.constant 0.000000e+00 : f32
    %575 = vector.broadcast %cst_165 : f32 to vector<1x128xf32>
    %576 = vector.extract_strided_slice %567 {offsets = [0, 0], sizes = [1, 128], strides = [1, 1]} : vector<2x128xf32> to vector<1x128xf32>
    %577 = vector.extract_strided_slice %570 {offsets = [0, 0], sizes = [1, 128], strides = [1, 1]} : vector<2x128xf32> to vector<1x128xf32>
    %c0_166 = arith.constant 0 : index
    %c0_167 = arith.constant 0 : index
    %578 = vector.load %arg5[%c0_166, %c0_167] : memref<15x128xf32, #tpu.memory_space<vmem>>, vector<1x128xf32>
    tpu.vector_store %arg5[%c0_166, %c0_167], %576 {strides = array<i32>} : memref<15x128xf32, #tpu.memory_space<vmem>>, vector<1x128xf32>,
    %579 = arith.mulf %577, %576 : vector<1x128xf32>
    %580 = arith.subf %579, %575 : vector<1x128xf32>
    %c1_168 = arith.constant 1 : index
    %c0_169 = arith.constant 0 : index
    %581 = vector.load %arg5[%c1_168, %c0_169] : memref<15x128xf32, #tpu.memory_space<vmem>>, vector<1x128xf32>
    tpu.vector_store %arg5[%c1_168, %c0_169], %580 {strides = array<i32>} : memref<15x128xf32, #tpu.memory_space<vmem>>, vector<1x128xf32>,
    %582 = arith.mulf %577, %580 : vector<1x128xf32>
    %583 = arith.subf %582, %576 : vector<1x128xf32>
    %c2_170 = arith.constant 2 : index
    %c0_171 = arith.constant 0 : index
    %584 = vector.load %arg5[%c2_170, %c0_171] : memref<15x128xf32, #tpu.memory_space<vmem>>, vector<1x128xf32>
    tpu.vector_store %arg5[%c2_170, %c0_171], %583 {strides = array<i32>} : memref<15x128xf32, #tpu.memory_space<vmem>>, vector<1x128xf32>,
    %585 = arith.mulf %577, %583 : vector<1x128xf32>
    %586 = arith.subf %585, %580 : vector<1x128xf32>
    %c3_172 = arith.constant 3 : index
    %c0_173 = arith.constant 0 : index
    %587 = vector.load %arg5[%c3_172, %c0_173] : memref<15x128xf32, #tpu.memory_space<vmem>>, vector<1x128xf32>
    tpu.vector_store %arg5[%c3_172, %c0_173], %586 {strides = array<i32>} : memref<15x128xf32, #tpu.memory_space<vmem>>, vector<1x128xf32>,
    %588 = arith.mulf %577, %586 : vector<1x128xf32>
    %589 = arith.subf %588, %583 : vector<1x128xf32>
    %c4_174 = arith.constant 4 : index
    %c0_175 = arith.constant 0 : index
    %590 = vector.load %arg5[%c4_174, %c0_175] : memref<15x128xf32, #tpu.memory_space<vmem>>, vector<1x128xf32>
    tpu.vector_store %arg5[%c4_174, %c0_175], %589 {strides = array<i32>} : memref<15x128xf32, #tpu.memory_space<vmem>>, vector<1x128xf32>,
    %591 = arith.mulf %577, %589 : vector<1x128xf32>
    %592 = arith.subf %591, %586 : vector<1x128xf32>
    %c5_176 = arith.constant 5 : index
    %c0_177 = arith.constant 0 : index
    %593 = vector.load %arg5[%c5_176, %c0_177] : memref<15x128xf32, #tpu.memory_space<vmem>>, vector<1x128xf32>
    tpu.vector_store %arg5[%c5_176, %c0_177], %592 {strides = array<i32>} : memref<15x128xf32, #tpu.memory_space<vmem>>, vector<1x128xf32>,
    %594 = arith.mulf %577, %592 : vector<1x128xf32>
    %595 = arith.subf %594, %589 : vector<1x128xf32>
    %c6_178 = arith.constant 6 : index
    %c0_179 = arith.constant 0 : index
    %596 = vector.load %arg5[%c6_178, %c0_179] : memref<15x128xf32, #tpu.memory_space<vmem>>, vector<1x128xf32>
    tpu.vector_store %arg5[%c6_178, %c0_179], %595 {strides = array<i32>} : memref<15x128xf32, #tpu.memory_space<vmem>>, vector<1x128xf32>,
    %597 = arith.mulf %577, %595 : vector<1x128xf32>
    %598 = arith.subf %597, %592 : vector<1x128xf32>
    %c7_180 = arith.constant 7 : index
    %c0_181 = arith.constant 0 : index
    %599 = vector.load %arg5[%c7_180, %c0_181] : memref<15x128xf32, #tpu.memory_space<vmem>>, vector<1x128xf32>
    tpu.vector_store %arg5[%c7_180, %c0_181], %598 {strides = array<i32>} : memref<15x128xf32, #tpu.memory_space<vmem>>, vector<1x128xf32>,
    %600 = arith.mulf %577, %598 : vector<1x128xf32>
    %601 = arith.subf %600, %595 : vector<1x128xf32>
    %c8_182 = arith.constant 8 : index
    %c0_183 = arith.constant 0 : index
    %602 = vector.load %arg5[%c8_182, %c0_183] : memref<15x128xf32, #tpu.memory_space<vmem>>, vector<1x128xf32>
    tpu.vector_store %arg5[%c8_182, %c0_183], %601 {strides = array<i32>} : memref<15x128xf32, #tpu.memory_space<vmem>>, vector<1x128xf32>,
    %603 = arith.mulf %577, %601 : vector<1x128xf32>
    %604 = arith.subf %603, %598 : vector<1x128xf32>
    %c9_184 = arith.constant 9 : index
    %c0_185 = arith.constant 0 : index
    %605 = vector.load %arg5[%c9_184, %c0_185] : memref<15x128xf32, #tpu.memory_space<vmem>>, vector<1x128xf32>
    tpu.vector_store %arg5[%c9_184, %c0_185], %604 {strides = array<i32>} : memref<15x128xf32, #tpu.memory_space<vmem>>, vector<1x128xf32>,
    %606 = arith.mulf %577, %604 : vector<1x128xf32>
    %607 = arith.subf %606, %601 : vector<1x128xf32>
    %c10_186 = arith.constant 10 : index
    %c0_187 = arith.constant 0 : index
    %608 = vector.load %arg5[%c10_186, %c0_187] : memref<15x128xf32, #tpu.memory_space<vmem>>, vector<1x128xf32>
    tpu.vector_store %arg5[%c10_186, %c0_187], %607 {strides = array<i32>} : memref<15x128xf32, #tpu.memory_space<vmem>>, vector<1x128xf32>,
    %609 = arith.mulf %577, %607 : vector<1x128xf32>
    %610 = arith.subf %609, %604 : vector<1x128xf32>
    %c11_188 = arith.constant 11 : index
    %c0_189 = arith.constant 0 : index
    %611 = vector.load %arg5[%c11_188, %c0_189] : memref<15x128xf32, #tpu.memory_space<vmem>>, vector<1x128xf32>
    tpu.vector_store %arg5[%c11_188, %c0_189], %610 {strides = array<i32>} : memref<15x128xf32, #tpu.memory_space<vmem>>, vector<1x128xf32>,
    %612 = arith.mulf %577, %610 : vector<1x128xf32>
    %613 = arith.subf %612, %607 : vector<1x128xf32>
    %c12_190 = arith.constant 12 : index
    %c0_191 = arith.constant 0 : index
    %614 = vector.load %arg5[%c12_190, %c0_191] : memref<15x128xf32, #tpu.memory_space<vmem>>, vector<1x128xf32>
    tpu.vector_store %arg5[%c12_190, %c0_191], %613 {strides = array<i32>} : memref<15x128xf32, #tpu.memory_space<vmem>>, vector<1x128xf32>,
    %615 = arith.mulf %577, %613 : vector<1x128xf32>
    %616 = arith.subf %615, %610 : vector<1x128xf32>
    %c13_192 = arith.constant 13 : index
    %c0_193 = arith.constant 0 : index
    %617 = vector.load %arg5[%c13_192, %c0_193] : memref<15x128xf32, #tpu.memory_space<vmem>>, vector<1x128xf32>
    tpu.vector_store %arg5[%c13_192, %c0_193], %616 {strides = array<i32>} : memref<15x128xf32, #tpu.memory_space<vmem>>, vector<1x128xf32>,
    %618 = arith.mulf %577, %616 : vector<1x128xf32>
    %619 = arith.subf %618, %613 : vector<1x128xf32>
    %c14_194 = arith.constant 14 : index
    %c0_195 = arith.constant 0 : index
    %620 = vector.load %arg5[%c14_194, %c0_195] : memref<15x128xf32, #tpu.memory_space<vmem>>, vector<1x128xf32>
    tpu.vector_store %arg5[%c14_194, %c0_195], %619 {strides = array<i32>} : memref<15x128xf32, #tpu.memory_space<vmem>>, vector<1x128xf32>,
    %c0_196 = arith.constant 0 : index
    %c0_197 = arith.constant 0 : index
    %621 = vector.load %arg5[%c0_196, %c0_197] : memref<15x128xf32, #tpu.memory_space<vmem>>, vector<15x128xf32>
    %cst_198 = arith.constant dense<0.000000e+00> : vector<16x128xf32>
    %622 = tpu.matmul %550, %621, %cst_198 {dimension_numbers = #tpu.dot_dimension_numbers<[1], [0], [0], [1], [0, 0, 1, 1], [], []>} : vector<16x15xf32>, vector<15x128xf32>, vector<16x128xf32> -> vector<16x128xf32>
    %c2_i32 = arith.constant 2 : i32
    %623 = vector.broadcast %c2_i32 : i32 to vector<16x128xi32>
    %624 = arith.muli %574, %623 : vector<16x128xi32>
    %c0_i32 = arith.constant 0 : i32
    %625 = vector.broadcast %c0_i32 : i32 to vector<16x128xi32>
    %626 = arith.addi %624, %625 : vector<16x128xi32>
    %627 = arith.cmpi eq, %571, %626 : vector<16x128xi32>
    %628 = arith.extui %627 : vector<16x128xi1> to vector<16x128xi32>
    %629 = arith.sitofp %628 : vector<16x128xi32> to vector<16x128xf32>
    %630 = arith.mulf %629, %622 : vector<16x128xf32>
    %cst_199 = arith.constant dense<0.000000e+00> : vector<128xf32>
    %631 = vector.multi_reduction <add>, %630, %cst_199 [0] : vector<16x128xf32> to vector<128xf32>
    %632 = vector.shape_cast %631 : vector<128xf32> to vector<1x128xf32>
    %c16_200 = arith.constant 16 : index
    %c0_201 = arith.constant 0 : index
    %633 = vector.load %arg4[%c16_200, %c0_201] : memref<18x128xf32, #tpu.memory_space<vmem>>, vector<1x128xf32>
    tpu.vector_store %arg4[%c16_200, %c0_201], %632 {strides = array<i32>} : memref<18x128xf32, #tpu.memory_space<vmem>>, vector<1x128xf32>,
    %cst_202 = arith.constant 0.000000e+00 : f32
    %634 = vector.broadcast %cst_202 : f32 to vector<1x128xf32>
    %635 = vector.extract_strided_slice %567 {offsets = [1, 0], sizes = [1, 128], strides = [1, 1]} : vector<2x128xf32> to vector<1x128xf32>
    %636 = vector.extract_strided_slice %570 {offsets = [1, 0], sizes = [1, 128], strides = [1, 1]} : vector<2x128xf32> to vector<1x128xf32>
    %c0_203 = arith.constant 0 : index
    %c0_204 = arith.constant 0 : index
    %637 = vector.load %arg5[%c0_203, %c0_204] : memref<15x128xf32, #tpu.memory_space<vmem>>, vector<1x128xf32>
    tpu.vector_store %arg5[%c0_203, %c0_204], %635 {strides = array<i32>} : memref<15x128xf32, #tpu.memory_space<vmem>>, vector<1x128xf32>,
    %638 = arith.mulf %636, %635 : vector<1x128xf32>
    %639 = arith.subf %638, %634 : vector<1x128xf32>
    %c1_205 = arith.constant 1 : index
    %c0_206 = arith.constant 0 : index
    %640 = vector.load %arg5[%c1_205, %c0_206] : memref<15x128xf32, #tpu.memory_space<vmem>>, vector<1x128xf32>
    tpu.vector_store %arg5[%c1_205, %c0_206], %639 {strides = array<i32>} : memref<15x128xf32, #tpu.memory_space<vmem>>, vector<1x128xf32>,
    %641 = arith.mulf %636, %639 : vector<1x128xf32>
    %642 = arith.subf %641, %635 : vector<1x128xf32>
    %c2_207 = arith.constant 2 : index
    %c0_208 = arith.constant 0 : index
    %643 = vector.load %arg5[%c2_207, %c0_208] : memref<15x128xf32, #tpu.memory_space<vmem>>, vector<1x128xf32>
    tpu.vector_store %arg5[%c2_207, %c0_208], %642 {strides = array<i32>} : memref<15x128xf32, #tpu.memory_space<vmem>>, vector<1x128xf32>,
    %644 = arith.mulf %636, %642 : vector<1x128xf32>
    %645 = arith.subf %644, %639 : vector<1x128xf32>
    %c3_209 = arith.constant 3 : index
    %c0_210 = arith.constant 0 : index
    %646 = vector.load %arg5[%c3_209, %c0_210] : memref<15x128xf32, #tpu.memory_space<vmem>>, vector<1x128xf32>
    tpu.vector_store %arg5[%c3_209, %c0_210], %645 {strides = array<i32>} : memref<15x128xf32, #tpu.memory_space<vmem>>, vector<1x128xf32>,
    %647 = arith.mulf %636, %645 : vector<1x128xf32>
    %648 = arith.subf %647, %642 : vector<1x128xf32>
    %c4_211 = arith.constant 4 : index
    %c0_212 = arith.constant 0 : index
    %649 = vector.load %arg5[%c4_211, %c0_212] : memref<15x128xf32, #tpu.memory_space<vmem>>, vector<1x128xf32>
    tpu.vector_store %arg5[%c4_211, %c0_212], %648 {strides = array<i32>} : memref<15x128xf32, #tpu.memory_space<vmem>>, vector<1x128xf32>,
    %650 = arith.mulf %636, %648 : vector<1x128xf32>
    %651 = arith.subf %650, %645 : vector<1x128xf32>
    %c5_213 = arith.constant 5 : index
    %c0_214 = arith.constant 0 : index
    %652 = vector.load %arg5[%c5_213, %c0_214] : memref<15x128xf32, #tpu.memory_space<vmem>>, vector<1x128xf32>
    tpu.vector_store %arg5[%c5_213, %c0_214], %651 {strides = array<i32>} : memref<15x128xf32, #tpu.memory_space<vmem>>, vector<1x128xf32>,
    %653 = arith.mulf %636, %651 : vector<1x128xf32>
    %654 = arith.subf %653, %648 : vector<1x128xf32>
    %c6_215 = arith.constant 6 : index
    %c0_216 = arith.constant 0 : index
    %655 = vector.load %arg5[%c6_215, %c0_216] : memref<15x128xf32, #tpu.memory_space<vmem>>, vector<1x128xf32>
    tpu.vector_store %arg5[%c6_215, %c0_216], %654 {strides = array<i32>} : memref<15x128xf32, #tpu.memory_space<vmem>>, vector<1x128xf32>,
    %656 = arith.mulf %636, %654 : vector<1x128xf32>
    %657 = arith.subf %656, %651 : vector<1x128xf32>
    %c7_217 = arith.constant 7 : index
    %c0_218 = arith.constant 0 : index
    %658 = vector.load %arg5[%c7_217, %c0_218] : memref<15x128xf32, #tpu.memory_space<vmem>>, vector<1x128xf32>
    tpu.vector_store %arg5[%c7_217, %c0_218], %657 {strides = array<i32>} : memref<15x128xf32, #tpu.memory_space<vmem>>, vector<1x128xf32>,
    %659 = arith.mulf %636, %657 : vector<1x128xf32>
    %660 = arith.subf %659, %654 : vector<1x128xf32>
    %c8_219 = arith.constant 8 : index
    %c0_220 = arith.constant 0 : index
    %661 = vector.load %arg5[%c8_219, %c0_220] : memref<15x128xf32, #tpu.memory_space<vmem>>, vector<1x128xf32>
    tpu.vector_store %arg5[%c8_219, %c0_220], %660 {strides = array<i32>} : memref<15x128xf32, #tpu.memory_space<vmem>>, vector<1x128xf32>,
    %662 = arith.mulf %636, %660 : vector<1x128xf32>
    %663 = arith.subf %662, %657 : vector<1x128xf32>
    %c9_221 = arith.constant 9 : index
    %c0_222 = arith.constant 0 : index
    %664 = vector.load %arg5[%c9_221, %c0_222] : memref<15x128xf32, #tpu.memory_space<vmem>>, vector<1x128xf32>
    tpu.vector_store %arg5[%c9_221, %c0_222], %663 {strides = array<i32>} : memref<15x128xf32, #tpu.memory_space<vmem>>, vector<1x128xf32>,
    %665 = arith.mulf %636, %663 : vector<1x128xf32>
    %666 = arith.subf %665, %660 : vector<1x128xf32>
    %c10_223 = arith.constant 10 : index
    %c0_224 = arith.constant 0 : index
    %667 = vector.load %arg5[%c10_223, %c0_224] : memref<15x128xf32, #tpu.memory_space<vmem>>, vector<1x128xf32>
    tpu.vector_store %arg5[%c10_223, %c0_224], %666 {strides = array<i32>} : memref<15x128xf32, #tpu.memory_space<vmem>>, vector<1x128xf32>,
    %668 = arith.mulf %636, %666 : vector<1x128xf32>
    %669 = arith.subf %668, %663 : vector<1x128xf32>
    %c11_225 = arith.constant 11 : index
    %c0_226 = arith.constant 0 : index
    %670 = vector.load %arg5[%c11_225, %c0_226] : memref<15x128xf32, #tpu.memory_space<vmem>>, vector<1x128xf32>
    tpu.vector_store %arg5[%c11_225, %c0_226], %669 {strides = array<i32>} : memref<15x128xf32, #tpu.memory_space<vmem>>, vector<1x128xf32>,
    %671 = arith.mulf %636, %669 : vector<1x128xf32>
    %672 = arith.subf %671, %666 : vector<1x128xf32>
    %c12_227 = arith.constant 12 : index
    %c0_228 = arith.constant 0 : index
    %673 = vector.load %arg5[%c12_227, %c0_228] : memref<15x128xf32, #tpu.memory_space<vmem>>, vector<1x128xf32>
    tpu.vector_store %arg5[%c12_227, %c0_228], %672 {strides = array<i32>} : memref<15x128xf32, #tpu.memory_space<vmem>>, vector<1x128xf32>,
    %674 = arith.mulf %636, %672 : vector<1x128xf32>
    %675 = arith.subf %674, %669 : vector<1x128xf32>
    %c13_229 = arith.constant 13 : index
    %c0_230 = arith.constant 0 : index
    %676 = vector.load %arg5[%c13_229, %c0_230] : memref<15x128xf32, #tpu.memory_space<vmem>>, vector<1x128xf32>
    tpu.vector_store %arg5[%c13_229, %c0_230], %675 {strides = array<i32>} : memref<15x128xf32, #tpu.memory_space<vmem>>, vector<1x128xf32>,
    %677 = arith.mulf %636, %675 : vector<1x128xf32>
    %678 = arith.subf %677, %672 : vector<1x128xf32>
    %c14_231 = arith.constant 14 : index
    %c0_232 = arith.constant 0 : index
    %679 = vector.load %arg5[%c14_231, %c0_232] : memref<15x128xf32, #tpu.memory_space<vmem>>, vector<1x128xf32>
    tpu.vector_store %arg5[%c14_231, %c0_232], %678 {strides = array<i32>} : memref<15x128xf32, #tpu.memory_space<vmem>>, vector<1x128xf32>,
    %c0_233 = arith.constant 0 : index
    %c0_234 = arith.constant 0 : index
    %680 = vector.load %arg5[%c0_233, %c0_234] : memref<15x128xf32, #tpu.memory_space<vmem>>, vector<15x128xf32>
    %cst_235 = arith.constant dense<0.000000e+00> : vector<16x128xf32>
    %681 = tpu.matmul %550, %680, %cst_235 {dimension_numbers = #tpu.dot_dimension_numbers<[1], [0], [0], [1], [0, 0, 1, 1], [], []>} : vector<16x15xf32>, vector<15x128xf32>, vector<16x128xf32> -> vector<16x128xf32>
    %c2_i32_236 = arith.constant 2 : i32
    %682 = vector.broadcast %c2_i32_236 : i32 to vector<16x128xi32>
    %683 = arith.muli %574, %682 : vector<16x128xi32>
    %c1_i32_237 = arith.constant 1 : i32
    %684 = vector.broadcast %c1_i32_237 : i32 to vector<16x128xi32>
    %685 = arith.addi %683, %684 : vector<16x128xi32>
    %686 = arith.cmpi eq, %571, %685 : vector<16x128xi32>
    %687 = arith.extui %686 : vector<16x128xi1> to vector<16x128xi32>
    %688 = arith.sitofp %687 : vector<16x128xi32> to vector<16x128xf32>
    %689 = arith.mulf %688, %681 : vector<16x128xf32>
    %cst_238 = arith.constant dense<0.000000e+00> : vector<128xf32>
    %690 = vector.multi_reduction <add>, %689, %cst_238 [0] : vector<16x128xf32> to vector<128xf32>
    %691 = vector.shape_cast %690 : vector<128xf32> to vector<1x128xf32>
    %c17_239 = arith.constant 17 : index
    %c0_240 = arith.constant 0 : index
    %692 = vector.load %arg4[%c17_239, %c0_240] : memref<18x128xf32, #tpu.memory_space<vmem>>, vector<1x128xf32>
    tpu.vector_store %arg4[%c17_239, %c0_240], %691 {strides = array<i32>} : memref<18x128xf32, #tpu.memory_space<vmem>>, vector<1x128xf32>,
    return
  }
  func.func @transform_0(%arg0: i32) -> (i32, i32) {
    %c0_i32 = arith.constant 0 : i32
    %c0_i32_0 = arith.constant 0 : i32
    %c0_i32_1 = arith.constant 0 : i32
    return %c0_i32, %c0_i32_0 : i32, i32
  }
  func.func @transform_1(%arg0: i32) -> (i32, i32) {
    %c0_i32 = arith.constant 0 : i32
    %c0_i32_0 = arith.constant 0 : i32
    %c0_i32_1 = arith.constant 0 : i32
    return %c0_i32, %c0_i32_0 : i32, i32
  }
  func.func @transform_2(%arg0: i32) -> (i32, i32) {
    %c0_i32 = arith.constant 0 : i32
    %c0_i32_0 = arith.constant 0 : i32
    %c0_i32_1 = arith.constant 0 : i32
    return %c0_i32, %c0_i32_0 : i32, i32
  }
  func.func @transform_3(%arg0: i32) -> (i32, i32) {
    %c0_i32 = arith.constant 0 : i32
    %c0_i32_0 = arith.constant 0 : i32
    %c0_i32_1 = arith.constant 0 : i32
    return %c0_i32, %c0_i32_0 : i32, i32
  }
}

</mosaic_0001>

<bundles_post_ra>
// kernel: reverse.3
= control target key start
LH: loop header
LB: loop body
LE: loop exit
PB: predicated region body
PF: predicated region fallthrough
CT: control target
= control target key end

     0   :  { %v2_v0 = vlaneseq  ;;  %s119_s0 = inlined_call_operand.vmem [shape: f32[2,8,7], index: 0, kind: input, shape index: {}]   ;;  %s120_s1 = inlined_call_operand.vmem [shape: f32[2,8,7], index: 1, kind: output, shape index: {}]  }
   0x1   :  { %v35_v2 = vld [vmem:[%s119_s0] sm:$0xff]  ;;  %v37_v3 = vld [vmem:[%s119_s0 + $0x8] sm:$0xff] }
   0x2   :  { %v3_v1 = vsub.s32 6, %v2_v0 }
   0x4   :  { %4 = vset.pattern.permute.xlu0 %v3_v1 }
   0x5   :  { %43 = vperm.xlu0 %4, %v35_v2  }
   0xd   :  { %49 = vperm.xlu0 %4, %v37_v3  }
  0x77   :  { %v44_v4 = vpop.permute.xlu0 %43 }
  0x78   :  { %83 = vst [vmem:[%s120_s1] sm:$0xff] %v44_v4 }
  0x7f   :  { %v50_v5 = vpop.permute.xlu0 %49 }
  0x80   :  { %85 = vst [vmem:[%s120_s1 + $0x8] sm:$0xff] %v50_v5 }

// kernel: reverse.1
= control target key start
LH: loop header
LB: loop body
LE: loop exit
PB: predicated region body
PF: predicated region fallthrough
CT: control target
= control target key end

     0   :  { %v2_v0 = vlaneseq  ;;  %s119_s0 = inlined_call_operand.vmem [shape: f32[2,8,15], index: 0, kind: input, shape index: {}]   ;;  %s120_s1 = inlined_call_operand.vmem [shape: f32[2,8,15], index: 1, kind: output, shape index: {}]  }
   0x1   :  { %v35_v2 = vld [vmem:[%s119_s0] sm:$0xff]  ;;  %v37_v3 = vld [vmem:[%s119_s0 + $0x8] sm:$0xff] }
   0x2   :  { %v3_v1 = vsub.s32 14, %v2_v0 }
   0x4   :  { %4 = vset.pattern.permute.xlu0 %v3_v1 }
   0x5   :  { %43 = vperm.xlu0 %4, %v35_v2  }
   0xd   :  { %49 = vperm.xlu0 %4, %v37_v3  }
  0x77   :  { %v44_v4 = vpop.permute.xlu0 %43 }
  0x78   :  { %83 = vst [vmem:[%s120_s1] sm:$0xff] %v44_v4 }
  0x7f   :  { %v50_v5 = vpop.permute.xlu0 %49 }
  0x80   :  { %85 = vst [vmem:[%s120_s1 + $0x8] sm:$0xff] %v50_v5 }

// kernel: ddsp_decoder_forward.1
= control target key start
LH: loop header
LB: loop body
LE: loop exit
PB: predicated region body
PF: predicated region fallthrough
CT: control target
= control target key end

     0   :  { %8 = vsyncpa [#allocation5], 0  ;;  %s2411_s15 = smov [#allocation4]   ;;  %s2412_s17 = smov 128   ;;  %s3049_s0 = inlined_call_operand.vmem [shape: f32[34,8], index: 0, kind: input, shape index: {}]   ;;  %s3050_s1 = inlined_call_operand.hbm [shape: f32[288,128], index: 1, kind: input, shape index: {}]   ;;  %s3051_s2 = inlined_call_operand.vmem [shape: f32[24,128], index: 2, kind: input, shape index: {}]   ;;  %s3052_s3 = inlined_call_operand.vmem [shape: f32[18,128], index: 3, kind: output, shape index: {}]  }
   0x1   :  { %s15_s14 = sshll.u32 %s3050_s1, 4  ;;  %s17_s16 = sshll.u32 %s2411_s15, 4  ;;  %s16_s14 = int_to_ptr.hbm [resolvable:$true] %s15_s14  ;;  %s18_s16 = int_to_ptr.vmem [resolvable:$true] %s17_s16 }
   0x2   :  { %s2413_s18 = smov 8  }
   0x3   :  { %23 = dma.hbm_to_vmem [thread:$0]  %s16_s14, 4608, %s18_s16, [#allocation5], %s2412_s17, %s2412_s17, %s2413_s18  }
   0x4   :  { %2409 = dma.done.wait [#allocation5], 4608  }
   0x5   :  { %2410 = vsyncadd [#allocation5], 4294962688  ;;  %v2414_v0 = vmov 0   ;;  %v30_v1 = vld [vmem:[%s3049_s0] sm:$0xff]  ;;  %v32_v2 = vld [vmem:[%s3049_s0 + $0x10] sm:$0xff]  ;;  %vm67_vm0 = vcmask 261120  }
   0x6   :  { %2244 = vset.pattern.permute.xlu0 %v2414_v0  ;;  %2245 = vset.pattern.permute.xlu1 %v2414_v0  ;;  %v31_v3 = vld [vmem:[%s3049_s0 + $0x8] sm:$0xff]  ;;  %v33_v4 = vld [vmem:[%s3049_s0 + $0x18] sm:$0xff]  ;;  %v2247_v5 = vld [vmem:[%s3051_s2] ss:$0 sm:$0xff]  ;;  %v2415_v31 = vmov 32.0   ;;  %s2417_s1 = smov 64  }
   0x7   :  { %2246 = vset.pattern.permute.xlu2 %v2414_v0  ;;  %38 = vperm.xlu0 %2244, %v30_v1   ;;  %v2248_v6 = vld [vmem:[%s3051_s2 + $0x1] ss:$0 sm:$0xff]  ;;  %2271 = vrcp.f32 %v2415_v31  ;;  %v198_v39 = vld [vmem:[#allocation4 + $0x18] sm:$0xff]  ;;  %v197_v40 = vld [vmem:[#allocation4 + $0x10] sm:$0xff]  ;;  %s2418_s23 = smov 96   ;;  %s2419_s15 = smov 1  }
   0x8   :  { %48 = vperm.xlu1 %2245, %v32_v2   ;;  %225 = vmatpush.msra.mxu0 %v198_v39  ;;  %v196_v42 = vld [vmem:[#allocation4 + $0x8] sm:$0xff]  ;;  %v195_v45 = vld [vmem:[#allocation4] sm:$0xff] }
   0xa   :  { %226 = vmatpush.msra.mxu0 %v197_v40 }
   0xc   :  { %227 = vmatpush.msra.mxu0 %v196_v42 }
   0xd   :  { %v2272_v32 = vpop.eup %2271 }
   0xe   :  { %v81_v33 = vmul.f32 32.0, %v2272_v32  ;;  %vm85_vm1 = vweird.f32 %v2272_v32  ;;  %228 = vmatpush.msra.mxu0 %v195_v45 }
   0xf   :  { %43 = vperm.xlu0 %2244, %v31_v3  }
  0x10   :  { %53 = vperm.xlu1 %2245, %v33_v4   ;;  %v82_v34 = vsub.f32 1.0, %v81_v33 }
  0x12   :  { %v83_v35 = vmul.f32 %v2272_v32, %v82_v34 }
  0x14   :  { %v84_v36 = vadd.f32 %v2272_v32, %v83_v35 }
  0x16   :  { %v2511_v38 = vsel %vm85_vm1, %v2272_v32, %v84_v36 }
  0x79   :  { %v2471_v7 = vpop.permute.xlu0 %38 }
  0x7a   :  { %v57_v8 = vmul.f32 %v2247_v5, %v2471_v7  ;;  %v2478_v11 = vpop.permute.xlu1 %48 }
  0x7b   :  { %v59_v15 = vmul.f32 %v2247_v5, %v2478_v11 }
  0x7c   :  { %v2474_v9 = vadd.f32 %v2248_v6, %v57_v8 }
  0x7d   :  { %v2493_v20 = vadd.f32 %v2248_v6, %v59_v15 }
  0x7e   :  { %v68_v10 = vsel %vm67_vm0, %v2474_v9, 0.0  ;;  %v91_v14 = vmul.f32 %v2474_v9, %v2474_v9 }
  0x7f   :  { %69 = vadd.xlane.f32.xlu2 %v68_v10  ;;  %v74_v23 = vsel %vm67_vm0, %v2493_v20, 0.0  ;;  %v93_v27 = vmul.f32 %v2493_v20, %v2493_v20  ;;  %v2522_v10 = vld [vmem:[%s3051_s2 + $0x2] ss:$0 sm:$0xff] }
  0x80   :  { %v95_v17 = vsel %vm67_vm0, %v91_v14, 0.0 }
  0x81   :  { %v2480_v12 = vpop.permute.xlu0 %43  ;;  %v101_v28 = vsel %vm67_vm0, %v93_v27, 0.0 }
  0x82   :  { %v58_v13 = vmul.f32 %v2247_v5, %v2480_v12  ;;  %v2496_v22 = vpop.permute.xlu1 %53 }
  0x83   :  { %v60_v24 = vmul.f32 %v2247_v5, %v2496_v22 }
  0x84   :  { %v2486_v16 = vadd.f32 %v2248_v6, %v58_v13 }
  0x85   :  { %v2501_v25 = vadd.f32 %v2248_v6, %v60_v24 }
  0x86   :  { %v71_v18 = vsel %vm67_vm0, %v2486_v16, 0.0  ;;  %v92_v19 = vmul.f32 %v2486_v16, %v2486_v16 }
  0x87   :  { %96 = vadd.xlane.f32.xlu2 %v95_v17  ;;  %72 = vadd.xlane.f32.xlu0 %v71_v18  ;;  %v77_v26 = vsel %vm67_vm0, %v2501_v25, 0.0  ;;  %v94_v29 = vmul.f32 %v2501_v25, %v2501_v25 }
  0x88   :  { %v98_v21 = vsel %vm67_vm0, %v92_v19, 0.0 }
  0x89   :  { %99 = vadd.xlane.f32.xlu1 %v98_v21  ;;  %v104_v30 = vsel %vm67_vm0, %v94_v29, 0.0 }
  0x8f   :  { %75 = vadd.xlane.f32.xlu2 %v74_v23 }
  0x97   :  { %78 = vadd.xlane.f32.xlu2 %v77_v26 }
  0x9f   :  { %102 = vadd.xlane.f32.xlu2 %v101_v28 }
  0xa7   :  { %105 = vadd.xlane.f32.xlu2 %v104_v30 }
  0xf2   :  { %v70_v37 = vpop.xlane.xlu2 %69 }
  0xf3   :  { %v87_v41 = vmul.f32 %v2511_v38, %v70_v37 }
  0xf5   :  { %v111_v46 = vmul.f32 %v87_v41, %v87_v41  ;;  %v119_v8 = vsub.f32 %v2474_v9, %v87_v41  ;;  %v2251_v9 = vld [vmem:[%s3051_s2 + $0x3] ss:$0 sm:$0xff] }
  0xfa   :  { %v97_v43 = vpop.xlane.xlu2 %96  ;;  %v73_v44 = vpop.xlane.xlu0 %72 }
  0xfb   :  { %v107_v47 = vmul.f32 %v97_v43, %v2511_v38  ;;  %v88_v48 = vmul.f32 %v2511_v38, %v73_v44 }
  0xfc   :  { %v100_v49 = vpop.xlane.xlu1 %99 }
  0xfd   :  { %v115_v50 = vsub.f32 %v107_v47, %v111_v46  ;;  %v112_v51 = vmul.f32 %v88_v48, %v88_v48  ;;  %v108_v52 = vmul.f32 %v100_v49, %v2511_v38  ;;  %v120_v17 = vsub.f32 %v2486_v16, %v88_v48 }
  0xff   :  { %v123_v53 = vadd.f32 1e-05, %v115_v50  ;;  %v116_v54 = vsub.f32 %v108_v52, %v112_v51 }
 0x101   :  { %2273 = vrsqrt.f32 %v123_v53  ;;  %v124_v55 = vadd.f32 1e-05, %v116_v54  ;;  %vm133_vm3 = vweird.f32 %v123_v53 }
 0x102   :  { %v76_v56 = vpop.xlane.xlu2 %75 }
 0x103   :  { %2275 = vrsqrt.f32 %v124_v55  ;;  %v89_v4 = vmul.f32 %v2511_v38, %v76_v56  ;;  %vm143_vm6 = vweird.f32 %v124_v55 }
 0x105   :  { %v113_v18 = vmul.f32 %v89_v4, %v89_v4  ;;  %v121_v50 = vsub.f32 %v2493_v20, %v89_v4 }
 0x107   :  { %v2274_v57 = vpop.eup %2273 }
 0x108   :  { %v128_v58 = vmul.f32 %v2274_v57, %v123_v53  ;;  %vm134_vm2 = vweird.f32 %v2274_v57 }
 0x109   :  { %v2276_v59 = vpop.eup %2275  ;;  %vm135_vm5 = vmor %vm133_vm3, %vm134_vm2 }
 0x10a   :  { %v129_v60 = vmul.f32 %v2274_v57, %v128_v58  ;;  %v138_v61 = vmul.f32 %v2276_v59, %v124_v55  ;;  %v79_v62 = vpop.xlane.xlu2 %78  ;;  %vm144_vm4 = vweird.f32 %v2276_v59 }
 0x10b   :  { %vm145_vm7 = vmor %vm143_vm6, %vm144_vm4  ;;  %v90_v28 = vmul.f32 %v2511_v38, %v79_v62 }
 0x10c   :  { %v130_v63 = vmul.f32 0.5, %v129_v60  ;;  %v139_v1 = vmul.f32 %v2276_v59, %v138_v61 }
 0x10d   :  { %v114_v33 = vmul.f32 %v90_v28, %v90_v28 }
 0x10e   :  { %v131_v2 = vsub.f32 1.5, %v130_v63  ;;  %v140_v3 = vmul.f32 0.5, %v139_v1 }
 0x110   :  { %v132_v5 = vmul.f32 %v2274_v57, %v131_v2  ;;  %v141_v6 = vsub.f32 1.5, %v140_v3 }
 0x112   :  { %v136_v13 = vsel %vm135_vm5, %v2274_v57, %v132_v5  ;;  %v142_v14 = vmul.f32 %v2276_v59, %v141_v6  ;;  %v103_v15 = vpop.xlane.xlu2 %102 }
 0x113   :  { %v109_v19 = vmul.f32 %v103_v15, %v2511_v38  ;;  %v167_v21 = vmul.f32 %v136_v13, %v119_v8 }
 0x114   :  { %v146_v23 = vsel %vm145_vm7, %v2276_v59, %v142_v14  ;;  %v122_v59 = vsub.f32 %v2501_v25, %v90_v28  ;;  %v2252_v25 = vld [vmem:[%s3051_s2 + $0x4] ss:$0 sm:$0xff] }
 0x115   :  { %v117_v24 = vsub.f32 %v109_v19, %v113_v18  ;;  %v173_v26 = vmul.f32 %v2522_v10, %v167_v21  ;;  %v168_v27 = vmul.f32 %v146_v23, %v120_v17 }
 0x117   :  { %v125_v29 = vadd.f32 1e-05, %v117_v24  ;;  %v179_v30 = vadd.f32 %v2251_v9, %v173_v26  ;;  %v174_v16 = vmul.f32 %v2522_v10, %v168_v27 }
 0x119   :  { %2277 = vrsqrt.f32 %v125_v29  ;;  %vm183_vm8 = vcmp.gt.f32.partialorder %v179_v30, 0.0  ;;  %v187_v31 = vmul.f32 0.01, %v179_v30  ;;  %v180_v36 = vadd.f32 %v2251_v9, %v174_v16 }
 0x11a   :  { %v106_v32 = vpop.xlane.xlu2 %105  ;;  %vm153_vm11 = vweird.f32 %v125_v29 }
 0x11b   :  { %v110_v34 = vmul.f32 %v106_v32, %v2511_v38  ;;  %v191_v35 = vsel %vm183_vm8, %v179_v30, %v187_v31  ;;  %v188_v41 = vmul.f32 0.01, %v180_v36  ;;  %vm184_vm9 = vcmp.gt.f32.partialorder %v180_v36, 0.0  ;;  %v365_v31 = vld [vmem:[#allocation4 + $0x38] sm:$0xff] }
 0x11c   :  { %2172 = vmatmul.msk.f32.vlgmr.msra.gmra.mxu0 %vm67_vm0, %v191_v35  ;;  %392 = vmatpush.msra.mxu1 %v365_v31 }
 0x11d   :  { %v118_v37 = vsub.f32 %v110_v34, %v114_v33  ;;  %v192_v44 = vsel %vm184_vm9, %v180_v36, %v188_v41  ;;  %v364_v33 = vld [vmem:[#allocation4 + $0x30] sm:$0xff]  ;;  %v363_v34 = vld [vmem:[#allocation4 + $0x28] sm:$0xff]  ;;  %v362_v41 = vld [vmem:[#allocation4 + $0x20] sm:$0xff] }
 0x11e   :  { %393 = vmatpush.msra.mxu1 %v364_v33 }
 0x11f   :  { %v2278_v39 = vpop.eup %2277  ;;  %v126_v40 = vadd.f32 1e-05, %v118_v37 }
 0x120   :  { %v148_v42 = vmul.f32 %v2278_v39, %v125_v29  ;;  %vm154_vm10 = vweird.f32 %v2278_v39  ;;  %394 = vmatpush.msra.mxu1 %v363_v34 }
 0x121   :  { %2279 = vrsqrt.f32 %v126_v40  ;;  %vm155_vm12 = vmor %vm153_vm11, %vm154_vm10  ;;  %vm163_vm14 = vweird.f32 %v126_v40 }
 0x122   :  { %v149_v43 = vmul.f32 %v2278_v39, %v148_v42  ;;  %395 = vmatpush.msra.mxu1 %v362_v41 }
 0x124   :  { %v150_v45 = vmul.f32 0.5, %v149_v43  ;;  %2173 = vmatmul.msk.f32.gmra.mxu0 %vm67_vm0, %v192_v44 }
 0x126   :  { %v151_v46 = vsub.f32 1.5, %v150_v45 }
 0x127   :  { %v2280_v47 = vpop.eup %2279 }
 0x128   :  { %v152_v48 = vmul.f32 %v2278_v39, %v151_v46  ;;  %v158_v49 = vmul.f32 %v2280_v47, %v126_v40  ;;  %vm164_vm13 = vweird.f32 %v2280_v47 }
 0x129   :  { %vm165_vm15 = vmor %vm163_vm14, %vm164_vm13 }
 0x12a   :  { %v156_v51 = vsel %vm155_vm12, %v2278_v39, %v152_v48  ;;  %v159_v52 = vmul.f32 %v2280_v47, %v158_v49 }
 0x12b   :  { %v169_v53 = vmul.f32 %v156_v51, %v121_v50 }
 0x12c   :  { %v160_v54 = vmul.f32 0.5, %v159_v52 }
 0x12d   :  { %v175_v55 = vmul.f32 %v2522_v10, %v169_v53 }
 0x12e   :  { %v161_v56 = vsub.f32 1.5, %v160_v54 }
 0x12f   :  { %v181_v57 = vadd.f32 %v2251_v9, %v175_v55 }
 0x130   :  { %v162_v58 = vmul.f32 %v2280_v47, %v161_v56 }
 0x131   :  { %vm185_vm1 = vcmp.gt.f32.partialorder %v181_v57, 0.0  ;;  %v189_v60 = vmul.f32 0.01, %v181_v57 }
 0x132   :  { %v166_v61 = vsel %vm165_vm15, %v2280_v47, %v162_v58 }
 0x133   :  { %v193_v62 = vsel %vm185_vm1, %v181_v57, %v189_v60  ;;  %v170_v20 = vmul.f32 %v166_v61, %v122_v59 }
 0x134   :  { %2174 = vmatmul.msk.f32.gmra.mxu0 %vm67_vm0, %v193_v62 }
 0x135   :  { %v176_v63 = vmul.f32 %v2522_v10, %v170_v20 }
 0x137   :  { %v182_v1 = vadd.f32 %v2251_v9, %v176_v63 }
 0x139   :  { %vm186_vm2 = vcmp.gt.f32.partialorder %v182_v1, 0.0  ;;  %v190_v2 = vmul.f32 0.01, %v182_v1 }
 0x13b   :  { %v194_v3 = vsel %vm186_vm2, %v182_v1, %v190_v2 }
 0x13c   :  { %2175 = vmatmul.msk.f32.gmra.mxu0 %vm67_vm0, %v194_v3 }
 0x199   :  { %v230_v4 = vpop.f32.mrf.mxu0 }
 0x19a   :  { %v2544_v5 = vadd.f32 %v2252_v25, %v230_v4 }
 0x19c   :  { %v242_v6 = vsel %vm67_vm0, %v2544_v5, 0.0  ;;  %v258_v8 = vmul.f32 %v2544_v5, %v2544_v5 }
 0x19d   :  { %243 = vadd.xlane.f32.xlu2 %v242_v6 }
 0x19e   :  { %v262_v14 = vsel %vm67_vm0, %v258_v8, 0.0 }
 0x1a1   :  { %v233_v10 = vpop.f32.mrf.mxu0 }
 0x1a2   :  { %v2550_v13 = vadd.f32 %v2252_v25, %v233_v10 }
 0x1a4   :  { %v245_v15 = vsel %vm67_vm0, %v2550_v13, 0.0  ;;  %v259_v17 = vmul.f32 %v2550_v13, %v2550_v13 }
 0x1a5   :  { %263 = vadd.xlane.f32.xlu2 %v262_v14  ;;  %246 = vadd.xlane.f32.xlu0 %v245_v15  ;;  %v2254_v15 = vld [vmem:[%s3051_s2 + $0x6] ss:$0 sm:$0xff] }
 0x1a6   :  { %v265_v18 = vsel %vm67_vm0, %v259_v17, 0.0 }
 0x1a7   :  { %266 = vadd.xlane.f32.xlu1 %v265_v18 }
 0x1b1   :  { %v236_v19 = vpop.f32.mrf.mxu0 }
 0x1b2   :  { %v2558_v21 = vadd.f32 %v2252_v25, %v236_v19 }
 0x1b4   :  { %v248_v9 = vsel %vm67_vm0, %v2558_v21, 0.0  ;;  %v260_v23 = vmul.f32 %v2558_v21, %v2558_v21 }
 0x1b5   :  { %249 = vadd.xlane.f32.xlu2 %v248_v9 }
 0x1b6   :  { %v268_v24 = vsel %vm67_vm0, %v260_v23, 0.0 }
 0x1b7   :  { %269 = vadd.xlane.f32.xlu0 %v268_v24 }
 0x1b9   :  { %v239_v26 = vpop.f32.mrf.mxu0 }
 0x1ba   :  { %v2565_v27 = vadd.f32 %v2252_v25, %v239_v26  ;;  %v2253_v25 = vld [vmem:[%s3051_s2 + $0x5] ss:$0 sm:$0xff] }
 0x1bc   :  { %v251_v28 = vsel %vm67_vm0, %v2565_v27, 0.0  ;;  %v261_v29 = vmul.f32 %v2565_v27, %v2565_v27 }
 0x1bd   :  { %252 = vadd.xlane.f32.xlu1 %v251_v28 }
 0x1be   :  { %v271_v30 = vsel %vm67_vm0, %v261_v29, 0.0 }
 0x1bf   :  { %272 = vadd.xlane.f32.xlu2 %v271_v30 }
 0x210   :  { %v244_v16 = vpop.xlane.xlu2 %243 }
 0x211   :  { %v254_v32 = vmul.f32 %v244_v16, %v2511_v38 }
 0x213   :  { %v278_v37 = vmul.f32 %v254_v32, %v254_v32  ;;  %v286_v2 = vsub.f32 %v2544_v5, %v254_v32 }
 0x218   :  { %v264_v35 = vpop.xlane.xlu2 %263  ;;  %v247_v36 = vpop.xlane.xlu0 %246 }
 0x219   :  { %v274_v39 = vmul.f32 %v264_v35, %v2511_v38  ;;  %v255_v40 = vmul.f32 %v247_v36, %v2511_v38 }
 0x21a   :  { %v267_v42 = vpop.xlane.xlu1 %266 }
 0x21b   :  { %v282_v43 = vsub.f32 %v274_v39, %v278_v37  ;;  %v279_v44 = vmul.f32 %v255_v40, %v255_v40  ;;  %v275_v45 = vmul.f32 %v267_v42, %v2511_v38  ;;  %v287_v5 = vsub.f32 %v2550_v13, %v255_v40 }
 0x21d   :  { %v290_v46 = vadd.f32 1e-05, %v282_v43  ;;  %v283_v47 = vsub.f32 %v275_v45, %v279_v44 }
 0x21f   :  { %2281 = vrsqrt.f32 %v290_v46  ;;  %v291_v48 = vadd.f32 1e-05, %v283_v47  ;;  %vm300_vm4 = vweird.f32 %v290_v46 }
 0x221   :  { %2283 = vrsqrt.f32 %v291_v48  ;;  %vm310_vm7 = vweird.f32 %v291_v48 }
 0x225   :  { %v2282_v49 = vpop.eup %2281 }
 0x226   :  { %v295_v50 = vmul.f32 %v2282_v49, %v290_v46  ;;  %vm301_vm3 = vweird.f32 %v2282_v49 }
 0x227   :  { %v2284_v51 = vpop.eup %2283  ;;  %vm302_vm6 = vmor %vm300_vm4, %vm301_vm3 }
 0x228   :  { %v296_v52 = vmul.f32 %v2282_v49, %v295_v50  ;;  %v305_v53 = vmul.f32 %v2284_v51, %v291_v48  ;;  %v250_v54 = vpop.xlane.xlu2 %249  ;;  %vm311_vm5 = vweird.f32 %v2284_v51 }
 0x229   :  { %v2577_v55 = vmul.f32 %v250_v54, %v2511_v38  ;;  %vm312_vm8 = vmor %vm310_vm7, %vm311_vm5 }
 0x22a   :  { %v297_v56 = vmul.f32 0.5, %v296_v52  ;;  %v306_v57 = vmul.f32 %v2284_v51, %v305_v53  ;;  %v270_v58 = vpop.xlane.xlu0 %269 }
 0x22b   :  { %v280_v59 = vmul.f32 %v2577_v55, %v2577_v55  ;;  %v276_v60 = vmul.f32 %v270_v58, %v2511_v38  ;;  %v288_v42 = vsub.f32 %v2558_v21, %v2577_v55 }
 0x22c   :  { %v298_v61 = vsub.f32 1.5, %v297_v56  ;;  %v307_v62 = vmul.f32 0.5, %v306_v57 }
 0x22d   :  { %v284_v20 = vsub.f32 %v276_v60, %v280_v59 }
 0x22e   :  { %v299_v63 = vmul.f32 %v2282_v49, %v298_v61  ;;  %v308_v1 = vsub.f32 1.5, %v307_v62 }
 0x22f   :  { %v292_v3 = vadd.f32 1e-05, %v284_v20 }
 0x230   :  { %v303_v4 = vsel %vm302_vm6, %v2282_v49, %v299_v63  ;;  %v309_v6 = vmul.f32 %v2284_v51, %v308_v1  ;;  %v253_v8 = vpop.xlane.xlu1 %252 }
 0x231   :  { %2285 = vrsqrt.f32 %v292_v3  ;;  %v257_v10 = vmul.f32 %v253_v8, %v2511_v38  ;;  %v334_v14 = vmul.f32 %v303_v4, %v286_v2  ;;  %vm320_vm12 = vweird.f32 %v292_v3 }
 0x232   :  { %v313_v17 = vsel %vm312_vm8, %v2284_v51, %v309_v6  ;;  %v273_v18 = vpop.xlane.xlu2 %272 }
 0x233   :  { %v281_v19 = vmul.f32 %v257_v10, %v257_v10  ;;  %v277_v9 = vmul.f32 %v273_v18, %v2511_v38  ;;  %v340_v23 = vmul.f32 %v2253_v25, %v334_v14  ;;  %v335_v24 = vmul.f32 %v313_v17, %v287_v5 }
 0x234   :  { %v289_v52 = vsub.f32 %v2565_v27, %v257_v10  ;;  %v2255_v27 = vld [vmem:[%s3051_s2 + $0x7] ss:$0 sm:$0xff] }
 0x235   :  { %v285_v26 = vsub.f32 %v277_v9, %v281_v19  ;;  %v346_v28 = vadd.f32 %v2254_v15, %v340_v23  ;;  %v341_v29 = vmul.f32 %v2253_v25, %v335_v24  ;;  %v536_v19 = vld [vmem:[#allocation4 + $0x78] sm:$0xff]  ;;  %v535_v9 = vld [vmem:[#allocation4 + $0x70] sm:$0xff] }
 0x236   :  { %555 = vmatpush.msra.mxu2 %v536_v19 }
 0x237   :  { %v2286_v30 = vpop.eup %2285  ;;  %v293_v16 = vadd.f32 1e-05, %v285_v26  ;;  %vm350_vm9 = vcmp.gt.f32.partialorder %v346_v28, 0.0  ;;  %v354_v31 = vmul.f32 0.01, %v346_v28  ;;  %v347_v34 = vadd.f32 %v2254_v15, %v341_v29  ;;  %v534_v26 = vld [vmem:[#allocation4 + $0x68] sm:$0xff] }
 0x238   :  { %v315_v32 = vmul.f32 %v2286_v30, %v292_v3  ;;  %vm321_vm10 = vweird.f32 %v2286_v30  ;;  %556 = vmatpush.msra.mxu2 %v535_v9 }
 0x239   :  { %2287 = vrsqrt.f32 %v293_v16  ;;  %v358_v33 = vsel %vm350_vm9, %v346_v28, %v354_v31  ;;  %v355_v36 = vmul.f32 0.01, %v347_v34  ;;  %vm351_vm11 = vcmp.gt.f32.partialorder %v347_v34, 0.0  ;;  %vm322_vm13 = vmor %vm320_vm12, %vm321_vm10 }
 0x23a   :  { %v316_v35 = vmul.f32 %v2286_v30, %v315_v32  ;;  %2176 = vmatmul.msk.f32.vlgmr.msra.gmra.mxu1 %vm67_vm0, %v358_v33  ;;  %vm330_vm15 = vweird.f32 %v293_v16  ;;  %557 = vmatpush.msra.mxu2 %v534_v26 }
 0x23b   :  { %v359_v43 = vsel %vm351_vm11, %v347_v34, %v355_v36  ;;  %v2633_v34 = vld [vmem:[#allocation4 + $0x98] sm:$0xff] }
 0x23c   :  { %v317_v13 = vmul.f32 0.5, %v316_v35  ;;  %v2635_v35 = vld [vmem:[#allocation4 + $0x90] sm:$0xff]  ;;  %909 = vmatpush.msrb.mxu0 %v2633_v34 }
 0x23e   :  { %v318_v37 = vsub.f32 1.5, %v317_v13  ;;  %v532_v13 = vld [vmem:[#allocation4 + $0x58] sm:$0xff]  ;;  %910 = vmatpush.msrb.mxu0 %v2635_v35 }
 0x23f   :  { %v2288_v39 = vpop.eup %2287  ;;  %584 = vmatpush.msra.mxu3 %v532_v13 }
 0x240   :  { %v319_v40 = vmul.f32 %v2286_v30, %v318_v37  ;;  %v325_v41 = vmul.f32 %v2288_v39, %v293_v16  ;;  %vm331_vm14 = vweird.f32 %v2288_v39  ;;  %v533_v16 = vld [vmem:[#allocation4 + $0x60] sm:$0xff] }
 0x241   :  { %vm332_vm1 = vmor %vm330_vm15, %vm331_vm14  ;;  %558 = vmatpush.msra.mxu2 %v533_v16 }
 0x242   :  { %v323_v44 = vsel %vm322_vm13, %v2286_v30, %v319_v40  ;;  %v326_v45 = vmul.f32 %v2288_v39, %v325_v41  ;;  %2177 = vmatmul.msk.f32.gmra.mxu1 %vm67_vm0, %v359_v43  ;;  %v531_v43 = vld [vmem:[#allocation4 + $0x50] sm:$0xff] }
 0x243   :  { %v336_v46 = vmul.f32 %v323_v44, %v288_v42  ;;  %620 = vmatpush.msrb.mxu2 %v2633_v34  ;;  %v2646_v42 = vld [vmem:[#allocation4 + $0x88] sm:$0xff]  ;;  %585 = vmatpush.msra.mxu3 %v531_v43 }
 0x244   :  { %v327_v47 = vmul.f32 0.5, %v326_v45  ;;  %v530_v44 = vld [vmem:[#allocation4 + $0x48] sm:$0xff]  ;;  %911 = vmatpush.msrb.mxu0 %v2646_v42 }
 0x245   :  { %v342_v48 = vmul.f32 %v2253_v25, %v336_v46  ;;  %621 = vmatpush.msrb.mxu2 %v2635_v35  ;;  %586 = vmatpush.msra.mxu3 %v530_v44 }
 0x246   :  { %v328_v49 = vsub.f32 1.5, %v327_v47  ;;  %v2653_v47 = vld [vmem:[#allocation4 + $0x80] sm:$0xff] }
 0x247   :  { %v348_v50 = vadd.f32 %v2254_v15, %v342_v48  ;;  %622 = vmatpush.msrb.mxu2 %v2646_v42  ;;  %v529_v48 = vld [vmem:[#allocation4 + $0x40] sm:$0xff]  ;;  %912 = vmatpush.msrb.mxu0 %v2653_v47 }
 0x248   :  { %v329_v51 = vmul.f32 %v2288_v39, %v328_v49  ;;  %587 = vmatpush.msra.mxu3 %v529_v48 }
 0x249   :  { %vm352_vm2 = vcmp.gt.f32.partialorder %v348_v50, 0.0  ;;  %v356_v53 = vmul.f32 0.01, %v348_v50  ;;  %623 = vmatpush.msrb.mxu2 %v2653_v47 }
 0x24a   :  { %v333_v21 = vsel %vm332_vm1, %v2288_v39, %v329_v51  ;;  %687 = vmatpush.msrb.mxu3 %v2633_v34 }
 0x24b   :  { %v360_v54 = vsel %vm352_vm2, %v348_v50, %v356_v53  ;;  %v337_v55 = vmul.f32 %v333_v21, %v289_v52 }
 0x24c   :  { %2178 = vmatmul.msk.f32.gmra.mxu1 %vm67_vm0, %v360_v54  ;;  %688 = vmatpush.msrb.mxu3 %v2635_v35 }
 0x24d   :  { %v343_v56 = vmul.f32 %v2253_v25, %v337_v55 }
 0x24e   :  { %689 = vmatpush.msrb.mxu3 %v2646_v42 }
 0x24f   :  { %v349_v57 = vadd.f32 %v2254_v15, %v343_v56 }
 0x250   :  { %690 = vmatpush.msrb.mxu3 %v2653_v47 }
 0x251   :  { %vm353_vm3 = vcmp.gt.f32.partialorder %v349_v57, 0.0  ;;  %v357_v58 = vmul.f32 0.01, %v349_v57 }
 0x253   :  { %v361_v59 = vsel %vm353_vm3, %v349_v57, %v357_v58 }
 0x254   :  { %2179 = vmatmul.msk.f32.gmra.mxu1 %vm67_vm0, %v361_v59 }
 0x2b7   :  { %v397_v60 = vpop.f32.mrf.mxu1 }
 0x2b8   :  { %v2609_v25 = vadd.f32 %v2255_v27, %v397_v60 }
 0x2ba   :  { %v409_v10 = vsel %vm67_vm0, %v2609_v25, 0.0  ;;  %v425_v15 = vmul.f32 %v2609_v25, %v2609_v25 }
 0x2bc   :  { %v429_v5 = vsel %vm67_vm0, %v425_v15, 0.0 }
 0x2bf   :  { %v400_v61 = vpop.f32.mrf.mxu1 }
 0x2c0   :  { %v2623_v17 = vadd.f32 %v2255_v27, %v400_v61 }
 0x2c2   :  { %v412_v18 = vsel %vm67_vm0, %v2623_v17, 0.0 }
 0x2c9   :  { %v403_v62 = vpop.f32.mrf.mxu1 }
 0x2ca   :  { %v2602_v20 = vadd.f32 %v2255_v27, %v403_v62  ;;  %v2670_v62 = vld [vmem:[%s3051_s2 + $0x8] ss:$0 sm:$0xff] }
 0x2cc   :  { %v415_v63 = vsel %vm67_vm0, %v2602_v20, 0.0  ;;  %v427_v1 = vmul.f32 %v2602_v20, %v2602_v20 }
 0x2cd   :  { %416 = vadd.xlane.f32.xlu0 %v415_v63 }
 0x2ce   :  { %v435_v2 = vsel %vm67_vm0, %v427_v1, 0.0 }
 0x2cf   :  { %436 = vadd.xlane.f32.xlu1 %v435_v2 }
 0x2d1   :  { %v406_v3 = vpop.f32.mrf.mxu1 }
 0x2d2   :  { %v2611_v4 = vadd.f32 %v2255_v27, %v406_v3  ;;  %v2675_v3 = vld [vmem:[%s3051_s2 + $0x9] ss:$0 sm:$0xff] }
 0x2d4   :  { %v418_v6 = vsel %vm67_vm0, %v2611_v4, 0.0  ;;  %v428_v8 = vmul.f32 %v2611_v4, %v2611_v4 }
 0x2d5   :  { %419 = vadd.xlane.f32.xlu2 %v418_v6 }
 0x2d6   :  { %v438_v14 = vsel %vm67_vm0, %v428_v8, 0.0 }
 0x2d7   :  { %410 = vadd.xlane.f32.xlu1 %v409_v10  ;;  %439 = vadd.xlane.f32.xlu0 %v438_v14 }
 0x2dd   :  { %430 = vadd.xlane.f32.xlu2 %v429_v5 }
 0x2e5   :  { %413 = vadd.xlane.f32.xlu2 %v412_v18 }
 0x340   :  { %v417_v23 = vpop.xlane.xlu0 %416 }
 0x341   :  { %v2628_v24 = vmul.f32 %v417_v23, %v2511_v38 }
 0x342   :  { %v437_v28 = vpop.xlane.xlu1 %436 }
 0x343   :  { %v447_v29 = vmul.f32 %v2628_v24, %v2628_v24  ;;  %v443_v30 = vmul.f32 %v437_v28, %v2511_v38  ;;  %v455_v27 = vsub.f32 %v2602_v20, %v2628_v24 }
 0x345   :  { %v451_v31 = vsub.f32 %v443_v30, %v447_v29 }
 0x347   :  { %v459_v32 = vadd.f32 1e-05, %v451_v31 }
 0x348   :  { %v420_v33 = vpop.xlane.xlu2 %419 }
 0x349   :  { %2289 = vrsqrt.f32 %v459_v32  ;;  %v2638_v36 = vmul.f32 %v420_v33, %v2511_v38  ;;  %vm487_vm5 = vweird.f32 %v459_v32 }
 0x34a   :  { %v411_v37 = vpop.xlane.xlu1 %410  ;;  %v440_v39 = vpop.xlane.xlu0 %439 }
 0x34b   :  { %v448_v40 = vmul.f32 %v2638_v36, %v2638_v36  ;;  %v444_v41 = vmul.f32 %v440_v39, %v2511_v38  ;;  %v2650_v45 = vmul.f32 %v411_v37, %v2511_v38  ;;  %v456_v19 = vsub.f32 %v2611_v4, %v2638_v36 }
 0x34d   :  { %v452_v46 = vsub.f32 %v444_v41, %v448_v40  ;;  %v445_v53 = vmul.f32 %v2650_v45, %v2650_v45  ;;  %v453_v4 = vsub.f32 %v2609_v25, %v2650_v45  ;;  %v2416_v41 = vmov 0.0   ;;  %v2708_v45 = vld [vmem:[%s3051_s2 + $0xb] ss:$0 sm:$0xff] }
 0x34f   :  { %v2290_v49 = vpop.eup %2289  ;;  %v460_v50 = vadd.f32 1e-05, %v452_v46 }
 0x350   :  { %v482_v51 = vmul.f32 %v2290_v49, %v459_v32  ;;  %v431_v52 = vpop.xlane.xlu2 %430  ;;  %vm488_vm4 = vweird.f32 %v2290_v49 }
 0x351   :  { %2291 = vrsqrt.f32 %v460_v50  ;;  %v441_v21 = vmul.f32 %v431_v52, %v2511_v38  ;;  %vm489_vm6 = vmor %vm487_vm5, %vm488_vm4  ;;  %vm497_vm8 = vweird.f32 %v460_v50 }
 0x352   :  { %v483_v54 = vmul.f32 %v2290_v49, %v482_v51 }
 0x353   :  { %v449_v55 = vsub.f32 %v441_v21, %v445_v53  ;;  %v2718_v53 = vld [vmem:[%s3051_s2 + $0xa] ss:$0 sm:$0xff] }
 0x354   :  { %v484_v56 = vmul.f32 0.5, %v483_v54 }
 0x355   :  { %v457_v57 = vadd.f32 1e-05, %v449_v55 }
 0x356   :  { %v485_v58 = vsub.f32 1.5, %v484_v56 }
 0x357   :  { %v2292_v59 = vpop.eup %2291  ;;  %2293 = vrsqrt.f32 %v457_v57  ;;  %vm467_vm12 = vweird.f32 %v457_v57 }
 0x358   :  { %v486_v60 = vmul.f32 %v2290_v49, %v485_v58  ;;  %v492_v61 = vmul.f32 %v2292_v59, %v460_v50  ;;  %vm498_vm7 = vweird.f32 %v2292_v59 }
 0x359   :  { %vm499_vm9 = vmor %vm497_vm8, %vm498_vm7 }
 0x35a   :  { %v490_v63 = vsel %vm489_vm6, %v2290_v49, %v486_v60  ;;  %v493_v1 = vmul.f32 %v2292_v59, %v492_v61  ;;  %v426_v49 = vmul.f32 %v2623_v17, %v2623_v17 }
 0x35b   :  { %v503_v2 = vmul.f32 %v490_v63, %v455_v27 }
 0x35c   :  { %v494_v6 = vmul.f32 0.5, %v493_v1  ;;  %v432_v50 = vsel %vm67_vm0, %v426_v49, 0.0 }
 0x35d   :  { %v2294_v8 = vpop.eup %2293  ;;  %v509_v10 = vmul.f32 %v2670_v62, %v503_v2 }
 0x35e   :  { %v495_v14 = vsub.f32 1.5, %v494_v6  ;;  %v462_v20 = vmul.f32 %v2294_v8, %v457_v57  ;;  %vm468_vm11 = vweird.f32 %v2294_v8 }
 0x35f   :  { %v515_v15 = vadd.f32 %v2675_v3, %v509_v10  ;;  %vm469_vm13 = vmor %vm467_vm12, %vm468_vm11 }
 0x360   :  { %v496_v5 = vmul.f32 %v2292_v59, %v495_v14  ;;  %v463_v18 = vmul.f32 %v2294_v8, %v462_v20  ;;  %v414_v20 = vpop.xlane.xlu2 %413 }
 0x361   :  { %vm519_vm10 = vcmp.gt.f32.partialorder %v515_v15, 0.0  ;;  %v523_v9 = vmul.f32 0.01, %v515_v15 }
 0x362   :  { %v500_v23 = vsel %vm499_vm9, %v2292_v59, %v496_v5  ;;  %v464_v24 = vmul.f32 0.5, %v463_v18  ;;  %vm671_vm9 = vcmask 254976  }
 0x363   :  { %v527_v26 = vsel %vm519_vm10, %v515_v15, %v523_v9  ;;  %v504_v28 = vmul.f32 %v500_v23, %v456_v19  ;;  %v422_v15 = vmul.f32 %v414_v20, %v2511_v38 }
 0x364   :  { %v465_v29 = vsub.f32 1.5, %v464_v24  ;;  %2180 = vmatmul.msk.f32.vlgmr.msra.gmra.mxu2 %vm67_vm0, %v527_v26 }
 0x365   :  { %v510_v30 = vmul.f32 %v2670_v62, %v504_v28  ;;  %761 = vmatpush.msra.mxu2 %v2633_v34  ;;  %v446_v18 = vmul.f32 %v422_v15, %v422_v15 }
 0x366   :  { %v466_v16 = vmul.f32 %v2294_v8, %v465_v29 }
 0x367   :  { %v516_v31 = vadd.f32 %v2675_v3, %v510_v30  ;;  %762 = vmatpush.msra.mxu2 %v2635_v35 }
 0x368   :  { %v470_v32 = vsel %vm469_vm13, %v2294_v8, %v466_v16 }
 0x369   :  { %vm520_vm14 = vcmp.gt.f32.partialorder %v516_v31, 0.0  ;;  %v524_v33 = vmul.f32 0.01, %v516_v31  ;;  %v501_v13 = vmul.f32 %v470_v32, %v453_v4  ;;  %763 = vmatpush.msra.mxu2 %v2646_v42  ;;  %v454_v4 = vsub.f32 %v2623_v17, %v422_v15 }
 0x36b   :  { %v528_v36 = vsel %vm520_vm14, %v516_v31, %v524_v33  ;;  %v507_v37 = vmul.f32 %v2670_v62, %v501_v13  ;;  %764 = vmatpush.msra.mxu2 %v2653_v47 }
 0x36c   :  { %2181 = vmatmul.msk.f32.gmra.mxu2 %vm67_vm0, %v528_v36 }
 0x36d   :  { %v513_v25 = vadd.f32 %v2675_v3, %v507_v37 }
 0x36f   :  { %vm517_vm15 = vcmp.gt.f32.partialorder %v513_v25, 0.0  ;;  %v521_v39 = vmul.f32 0.01, %v513_v25 }
 0x371   :  { %v525_v40 = vsel %vm517_vm15, %v513_v25, %v521_v39 }
 0x372   :  { %2182 = vmatmul.msk.f32.vlgmr.msra.gmra.mxu3 %vm67_vm0, %v525_v40 }
 0x373   :  { %835 = vmatpush.msra.mxu3 %v2633_v34 }
 0x374   :  { %624 = vmatmul.f32.vlgmr.msrb.gmra.mxu2 %v2416_v41 }
 0x375   :  { %836 = vmatpush.msra.mxu3 %v2635_v35  ;;  %1049 = vmatpush.msrb.mxu2 %v2633_v34 }
 0x377   :  { %837 = vmatpush.msra.mxu3 %v2646_v42  ;;  %1050 = vmatpush.msrb.mxu2 %v2635_v35 }
 0x379   :  { %838 = vmatpush.msra.mxu3 %v2653_v47  ;;  %1051 = vmatpush.msrb.mxu2 %v2646_v42 }
 0x37b   :  { %1052 = vmatpush.msrb.mxu2 %v2653_v47 }
 0x3e7   :  { %v560_v43 = vpop.f32.mrf.mxu2 }
 0x3ef   :  { %v2703_v44 = vpop.f32.mrf.mxu2 }
 0x3f5   :  { %v589_v51 = vpop.f32.mrf.mxu3 }
 0x3f6   :  { %v590_v52 = vadd.f32 %v589_v51, %v560_v43 }
 0x3f7   :  { %v625_v46 = vpop.f32.mrf.mxu2 }
 0x3f8   :  { %v626_v48 = vadd.f32 %v2708_v45, %v625_v46  ;;  %v2721_v21 = vadd.f32 %v2718_v53, %v590_v52 }
 0x3fa   :  { %649 = vrot.lane.b32.xlu0 %v626_v48, %s2417_s1  ;;  %v628_v54 = vadd.f32 %v626_v48, %v2721_v21 }
 0x3fc   :  { %v2184_v55 = vmul.f32 -1.442695, %v628_v54 }
 0x3fe   :  { %2295 = vpow2.f32 %v2184_v55 }
 0x404   :  { %v2296_v56 = vpop.eup %2295 }
 0x405   :  { %v632_v57 = vadd.f32 1.0, %v2296_v56 }
 0x407   :  { %2297 = vrcp.f32 %v632_v57  ;;  %v644_v63 = vand.u32 2147483648, %v632_v57  ;;  %vm638_vm2 = vweird.f32 %v632_v57  ;;  %v642_v1 = vand.u32 2147483647, %v632_v57 }
 0x409   :  { %v645_v6 = vor.u32 1.1754944e-38, %v644_v63  ;;  %vm643_vm4 = vcmp.eq.f32.partialorder %v642_v1, 8.507059e+37 }
 0x40d   :  { %v2298_v58 = vpop.eup %2297 }
 0x40e   :  { %v634_v59 = vmul.f32 %v2298_v58, %v632_v57  ;;  %vm639_vm1 = vweird.f32 %v2298_v58 }
 0x40f   :  { %vm640_vm3 = vmor %vm638_vm2, %vm639_vm1 }
 0x410   :  { %v635_v60 = vsub.f32 1.0, %v634_v59 }
 0x412   :  { %v636_v61 = vmul.f32 %v2298_v58, %v635_v60 }
 0x414   :  { %v637_v27 = vadd.f32 %v2298_v58, %v636_v61 }
 0x416   :  { %v641_v2 = vsel %vm640_vm3, %v2298_v58, %v637_v27 }
 0x417   :  { %v646_v10 = vsel %vm643_vm4, %v645_v6, %v641_v2 }
 0x418   :  { %v659_v17 = vsub.f32 1.0, %v646_v10  ;;  %v665_v46 = vmul.f32 0.0, %v646_v10 }
 0x424   :  { %433 = vadd.xlane.f32.xlu0 %v432_v50 }
 0x46c   :  { %v650_v8 = vpop.permute.xlu0 %649 }
 0x46d   :  { %v652_v14 = vmul.f32 %v650_v8, %v646_v10 }
 0x46f   :  { %654 = vrot.lane.b32.xlu1 %v652_v14, %s2417_s1 }
 0x497   :  { %v434_v5 = vpop.xlane.xlu0 %433 }
 0x498   :  { %v442_v19 = vmul.f32 %v434_v5, %v2511_v38 }
 0x49a   :  { %v450_v9 = vsub.f32 %v442_v19, %v446_v18 }
 0x49c   :  { %v458_v23 = vadd.f32 1e-05, %v450_v9 }
 0x49e   :  { %2299 = vrsqrt.f32 %v458_v23  ;;  %vm477_vm6 = vweird.f32 %v458_v23 }
 0x4a4   :  { %v2300_v24 = vpop.eup %2299 }
 0x4a5   :  { %v472_v26 = vmul.f32 %v2300_v24, %v458_v23  ;;  %vm478_vm5 = vweird.f32 %v2300_v24 }
 0x4a6   :  { %vm479_vm7 = vmor %vm477_vm6, %vm478_vm5 }
 0x4a7   :  { %v473_v28 = vmul.f32 %v2300_v24, %v472_v26 }
 0x4a9   :  { %v474_v29 = vmul.f32 0.5, %v473_v28 }
 0x4ab   :  { %v475_v30 = vsub.f32 1.5, %v474_v29 }
 0x4ad   :  { %v476_v16 = vmul.f32 %v2300_v24, %v475_v30 }
 0x4af   :  { %v480_v31 = vsel %vm479_vm7, %v2300_v24, %v476_v16 }
 0x4b0   :  { %v502_v32 = vmul.f32 %v480_v31, %v454_v4 }
 0x4b2   :  { %v508_v33 = vmul.f32 %v2670_v62, %v502_v32 }
 0x4b4   :  { %v514_v13 = vadd.f32 %v2675_v3, %v508_v33 }
 0x4b6   :  { %vm518_vm8 = vcmp.gt.f32.partialorder %v514_v13, 0.0  ;;  %v522_v36 = vmul.f32 0.01, %v514_v13 }
 0x4b8   :  { %v526_v37 = vsel %vm518_vm8, %v514_v13, %v522_v36 }
 0x4b9   :  { %2183 = vmatmul.msk.f32.gmra.mxu3 %vm67_vm0, %v526_v37 }
 0x4e1   :  { %v655_v25 = vpop.permute.xlu1 %654 }
 0x4e2   :  { %v657_v39 = vadd.f32 %v655_v25, %v2721_v21 }
 0x4e4   :  { %2301 = vtanh.f32 %v657_v39 }
 0x4ea   :  { %v2302_v40 = vpop.eup %2301 }
 0x4eb   :  { %661 = vrot.lane.b32.xlu2 %v2302_v40, %s2418_s23 }
 0x53c   :  { %v2740_v49 = vpop.f32.mrf.mxu3 }
 0x545   :  { %v662_v43 = vpop.permute.xlu2 %661 }
 0x546   :  { %v664_v48 = vmul.f32 %v662_v43, %v659_v17 }
 0x548   :  { %v666_v62 = vadd.f32 %v665_v46, %v664_v48 }
 0x54a   :  { %668 = vrot.lane.b32.xlu1 %v666_v62, %s2418_s23  ;;  %v734_v18 = vrot.slane %v666_v62, 6 }
 0x5bc   :  { %v669_v3 = vpop.permute.xlu1 %668 }
 0x5bd   :  { %672 = vst.msk [vmem:[#allocation3] sm:$0x3] %vm671_vm9, %v669_v3  ;;  %2185 = vmatmul.msk.f32.vlgmr.msrb.gmra.mxu3 %vm67_vm0, %v669_v3 }
 0x5be   :  { %976 = vmatpush.msrb.mxu3 %v2633_v34 }
 0x5c0   :  { %977 = vmatpush.msrb.mxu3 %v2635_v35 }
 0x5c2   :  { %978 = vmatpush.msrb.mxu3 %v2646_v42 }
 0x5c4   :  { %979 = vmatpush.msrb.mxu3 %v2653_v47 }
 0x640   :  { %v692_v50 = vpop.f32.mrf.mxu3 }
 0x641   :  { %v693_v51 = vadd.f32 %v2708_v45, %v692_v50 }
 0x643   :  { %v696_v52 = vrot.slane %v693_v51, 6 }
 0x645   :  { %718 = vrot.lane.b32.xlu1 %v696_v52, %s2417_s1  ;;  %v698_v54 = vadd.f32 %v696_v52, %v2721_v21 }
 0x647   :  { %v2186_v55 = vmul.f32 -1.442695, %v698_v54 }
 0x649   :  { %2303 = vpow2.f32 %v2186_v55 }
 0x64f   :  { %v2304_v56 = vpop.eup %2303 }
 0x650   :  { %v702_v57 = vadd.f32 1.0, %v2304_v56 }
 0x652   :  { %2305 = vrcp.f32 %v702_v57  ;;  %v714_v63 = vand.u32 2147483648, %v702_v57  ;;  %vm708_vm11 = vweird.f32 %v702_v57  ;;  %v712_v1 = vand.u32 2147483647, %v702_v57 }
 0x654   :  { %v715_v6 = vor.u32 1.1754944e-38, %v714_v63  ;;  %vm713_vm13 = vcmp.eq.f32.partialorder %v712_v1, 8.507059e+37 }
 0x658   :  { %v2306_v58 = vpop.eup %2305 }
 0x659   :  { %v704_v59 = vmul.f32 %v2306_v58, %v702_v57  ;;  %vm709_vm10 = vweird.f32 %v2306_v58 }
 0x65a   :  { %vm710_vm12 = vmor %vm708_vm11, %vm709_vm10 }
 0x65b   :  { %v705_v60 = vsub.f32 1.0, %v704_v59 }
 0x65d   :  { %v706_v61 = vmul.f32 %v2306_v58, %v705_v60 }
 0x65f   :  { %v707_v27 = vadd.f32 %v2306_v58, %v706_v61 }
 0x661   :  { %v711_v2 = vsel %vm710_vm12, %v2306_v58, %v707_v27 }
 0x662   :  { %v716_v10 = vsel %vm713_vm13, %v715_v6, %v711_v2 }
 0x663   :  { %v728_v19 = vsub.f32 1.0, %v716_v10  ;;  %v736_v24 = vmul.f32 %v734_v18, %v716_v10 }
 0x6b7   :  { %v719_v8 = vpop.permute.xlu1 %718 }
 0x6b8   :  { %v721_v14 = vmul.f32 %v719_v8, %v716_v10 }
 0x6ba   :  { %723 = vrot.lane.b32.xlu2 %v721_v14, %s2417_s1 }
 0x714   :  { %v724_v20 = vpop.permute.xlu2 %723 }
 0x715   :  { %v726_v15 = vadd.f32 %v724_v20, %v2721_v21 }
 0x717   :  { %2307 = vtanh.f32 %v726_v15 }
 0x71d   :  { %v2308_v5 = vpop.eup %2307 }
 0x71e   :  { %730 = vrot.lane.b32.xlu1 %v2308_v5, %s2418_s23 }
 0x790   :  { %v731_v9 = vpop.permute.xlu1 %730 }
 0x791   :  { %v733_v23 = vmul.f32 %v731_v9, %v728_v19 }
 0x793   :  { %v2748_v26 = vadd.f32 %v736_v24, %v733_v23 }
 0x795   :  { %v744_v28 = vrot.slane %v2748_v26, 2  ;;  %v808_v56 = vrot.slane %v2748_v26, 6 }
 0x797   :  { %745 = vrot.lane.b32.xlu2 %v744_v28, %s2418_s23 }
 0x7f1   :  { %v746_v29 = vpop.permute.xlu2 %745 }
 0x7f2   :  { %2187 = vmatmul.msk.f32.vlgmr.msra.gmra.mxu2 %vm67_vm0, %v746_v29 }
 0x875   :  { %v766_v30 = vpop.f32.mrf.mxu2 }
 0x876   :  { %v767_v16 = vadd.f32 %v2708_v45, %v766_v30 }
 0x878   :  { %v770_v4 = vrot.slane %v767_v16, 4 }
 0x87a   :  { %792 = vrot.lane.b32.xlu1 %v770_v4, %s2417_s1  ;;  %v772_v31 = vadd.f32 %v770_v4, %v2721_v21 }
 0x87c   :  { %v2188_v32 = vmul.f32 -1.442695, %v772_v31 }
 0x87e   :  { %2309 = vpow2.f32 %v2188_v32 }
 0x884   :  { %v2310_v33 = vpop.eup %2309 }
 0x885   :  { %v776_v13 = vadd.f32 1.0, %v2310_v33 }
 0x887   :  { %2311 = vrcp.f32 %v776_v13  ;;  %v788_v17 = vand.u32 2147483648, %v776_v13  ;;  %vm782_vm15 = vweird.f32 %v776_v13  ;;  %v786_v43 = vand.u32 2147483647, %v776_v13 }
 0x889   :  { %v789_v48 = vor.u32 1.1754944e-38, %v788_v17  ;;  %vm787_vm2 = vcmp.eq.f32.partialorder %v786_v43, 8.507059e+37 }
 0x88d   :  { %v2312_v36 = vpop.eup %2311 }
 0x88e   :  { %v778_v37 = vmul.f32 %v2312_v36, %v776_v13  ;;  %vm783_vm14 = vweird.f32 %v2312_v36 }
 0x88f   :  { %vm784_vm1 = vmor %vm782_vm15, %vm783_vm14 }
 0x890   :  { %v779_v25 = vsub.f32 1.0, %v778_v37 }
 0x892   :  { %v780_v39 = vmul.f32 %v2312_v36, %v779_v25 }
 0x894   :  { %v781_v40 = vadd.f32 %v2312_v36, %v780_v39  ;;  %v593_v39 = vadd.f32 %v2740_v49, %v2703_v44 }
 0x896   :  { %v785_v46 = vsel %vm784_vm1, %v2312_v36, %v781_v40  ;;  %v2786_v40 = vadd.f32 %v2718_v53, %v593_v39 }
 0x897   :  { %v790_v3 = vsel %vm787_vm2, %v789_v48, %v785_v46 }
 0x898   :  { %v802_v55 = vsub.f32 1.0, %v790_v3  ;;  %v810_v58 = vmul.f32 %v808_v56, %v790_v3 }
 0x8ec   :  { %v793_v62 = vpop.permute.xlu1 %792 }
 0x8ed   :  { %v795_v50 = vmul.f32 %v793_v62, %v790_v3 }
 0x8ef   :  { %797 = vrot.lane.b32.xlu2 %v795_v50, %s2417_s1 }
 0x949   :  { %v798_v51 = vpop.permute.xlu2 %797 }
 0x94a   :  { %v800_v52 = vadd.f32 %v798_v51, %v2721_v21 }
 0x94c   :  { %2313 = vtanh.f32 %v800_v52 }
 0x952   :  { %v2314_v54 = vpop.eup %2313 }
 0x953   :  { %804 = vrot.lane.b32.xlu1 %v2314_v54, %s2418_s23 }
 0x9c5   :  { %v805_v57 = vpop.permute.xlu1 %804 }
 0x9c6   :  { %v807_v59 = vmul.f32 %v805_v57, %v802_v55 }
 0x9c8   :  { %v2760_v60 = vadd.f32 %v810_v58, %v807_v59 }
 0x9ca   :  { %v818_v61 = vrot.slane %v2760_v60, 4  ;;  %v882_v4 = vrot.slane %v2760_v60, 6 }
 0x9cc   :  { %819 = vrot.lane.b32.xlu0 %v818_v61, %s2418_s23 }
 0xa3e   :  { %v820_v27 = vpop.permute.xlu0 %819 }
 0xa3f   :  { %2189 = vmatmul.msk.f32.vlgmr.msra.gmra.mxu3 %vm67_vm0, %v820_v27 }
 0xa40   :  { %1122 = vmatpush.msra.mxu3 %v2633_v34 }
 0xa42   :  { %1123 = vmatpush.msra.mxu3 %v2635_v35 }
 0xa44   :  { %1124 = vmatpush.msra.mxu3 %v2646_v42 }
 0xa46   :  { %1125 = vmatpush.msra.mxu3 %v2653_v47 }
 0xac2   :  { %v840_v63 = vpop.f32.mrf.mxu3 }
 0xac3   :  { %v841_v1 = vadd.f32 %v2708_v45, %v840_v63 }
 0xac5   :  { %v844_v2 = vrot.slane %v841_v1, 2 }
 0xac7   :  { %866 = vrot.lane.b32.xlu2 %v844_v2, %s2417_s1  ;;  %v846_v6 = vadd.f32 %v844_v2, %v2721_v21 }
 0xac9   :  { %v2190_v8 = vmul.f32 -1.442695, %v846_v6 }
 0xacb   :  { %2315 = vpow2.f32 %v2190_v8 }
 0xad1   :  { %v2316_v10 = vpop.eup %2315 }
 0xad2   :  { %v850_v14 = vadd.f32 1.0, %v2316_v10 }
 0xad4   :  { %2317 = vrcp.f32 %v850_v14  ;;  %v862_v47 = vand.u32 2147483648, %v850_v14  ;;  %vm856_vm4 = vweird.f32 %v850_v14  ;;  %v860_v5 = vand.u32 2147483647, %v850_v14 }
 0xad6   :  { %v863_v19 = vor.u32 1.1754944e-38, %v862_v47  ;;  %vm861_vm6 = vcmp.eq.f32.partialorder %v860_v5, 8.507059e+37 }
 0xada   :  { %v2318_v34 = vpop.eup %2317 }
 0xadb   :  { %v852_v20 = vmul.f32 %v2318_v34, %v850_v14  ;;  %vm857_vm3 = vweird.f32 %v2318_v34 }
 0xadc   :  { %vm858_vm5 = vmor %vm856_vm4, %vm857_vm3 }
 0xadd   :  { %v853_v35 = vsub.f32 1.0, %v852_v20 }
 0xadf   :  { %v854_v15 = vmul.f32 %v2318_v34, %v853_v35 }
 0xae1   :  { %v855_v42 = vadd.f32 %v2318_v34, %v854_v15 }
 0xae3   :  { %v859_v18 = vsel %vm858_vm5, %v2318_v34, %v855_v42 }
 0xae4   :  { %v864_v23 = vsel %vm861_vm6, %v863_v19, %v859_v18 }
 0xae5   :  { %v876_v16 = vsub.f32 1.0, %v864_v23  ;;  %v884_v32 = vmul.f32 %v882_v4, %v864_v23 }
 0xb21   :  { %v867_v9 = vpop.permute.xlu2 %866 }
 0xb22   :  { %v869_v24 = vmul.f32 %v867_v9, %v864_v23 }
 0xb24   :  { %871 = vrot.lane.b32.xlu1 %v869_v24, %s2417_s1 }
 0xb96   :  { %v872_v28 = vpop.permute.xlu1 %871 }
 0xb97   :  { %v874_v29 = vadd.f32 %v872_v28, %v2721_v21 }
 0xb99   :  { %2319 = vtanh.f32 %v874_v29 }
 0xb9f   :  { %v2320_v30 = vpop.eup %2319 }
 0xba0   :  { %878 = vrot.lane.b32.xlu2 %v2320_v30, %s2418_s23 }
 0xbfa   :  { %v879_v31 = vpop.permute.xlu2 %878 }
 0xbfb   :  { %v881_v33 = vmul.f32 %v879_v31, %v876_v16 }
 0xbfd   :  { %v2776_v13 = vadd.f32 %v884_v32, %v881_v33 }
 0xbff   :  { %v892_v36 = vrot.slane %v2776_v13, 6 }
 0xc01   :  { %893 = vrot.lane.b32.xlu1 %v892_v36, %s2418_s23 }
 0xc73   :  { %v894_v37 = vpop.permute.xlu1 %893 }
 0xc74   :  { %2191 = vmatmul.msk.f32.vlgmr.msrb.gmra.mxu0 %vm67_vm0, %v894_v37 }
 0xcf1   :  { %v914_v21 = vpop.f32.mrf.mxu0 }
 0xcf2   :  { %v915_v25 = vadd.f32 %v2708_v45, %v914_v21 }
 0xcf4   :  { %938 = vrot.lane.b32.xlu2 %v915_v25, %s2417_s1  ;;  %v917_v17 = vadd.f32 %v915_v25, %v2786_v40 }
 0xcf6   :  { %v2192_v43 = vmul.f32 -1.442695, %v917_v17 }
 0xcf8   :  { %2321 = vpow2.f32 %v2192_v43 }
 0xcfe   :  { %v2322_v46 = vpop.eup %2321 }
 0xcff   :  { %v921_v48 = vadd.f32 1.0, %v2322_v46 }
 0xd01   :  { %2323 = vrcp.f32 %v921_v48  ;;  %v933_v54 = vand.u32 2147483648, %v921_v48  ;;  %vm927_vm8 = vweird.f32 %v921_v48  ;;  %v931_v55 = vand.u32 2147483647, %v921_v48 }
 0xd03   :  { %v934_v53 = vor.u32 1.1754944e-38, %v933_v54  ;;  %vm932_vm11 = vcmp.eq.f32.partialorder %v931_v55, 8.507059e+37 }
 0xd07   :  { %v2324_v62 = vpop.eup %2323 }
 0xd08   :  { %v923_v3 = vmul.f32 %v2324_v62, %v921_v48  ;;  %vm928_vm7 = vweird.f32 %v2324_v62 }
 0xd09   :  { %vm929_vm10 = vmor %vm927_vm8, %vm928_vm7  ;;  %vm742_vm8 = vcmask 257026  }
 0xd0a   :  { %v924_v50 = vsub.f32 1.0, %v923_v3 }
 0xd0c   :  { %v925_v51 = vmul.f32 %v2324_v62, %v924_v50 }
 0xd0e   :  { %v926_v52 = vadd.f32 %v2324_v62, %v925_v51 }
 0xd10   :  { %v930_v44 = vsel %vm929_vm10, %v2324_v62, %v926_v52  ;;  %vm816_vm10 = vcmask 259076  }
 0xd11   :  { %v935_v56 = vsel %vm932_vm11, %v934_v53, %v930_v44  ;;  %vm890_vm11 = vcmask 261126  }
 0xd12   :  { %v948_v27 = vsub.f32 1.0, %v935_v56  ;;  %v955_v1 = vmul.f32 %v935_v56, %v892_v36 }
 0xd4e   :  { %v939_v49 = vpop.permute.xlu2 %938 }
 0xd4f   :  { %v941_v57 = vmul.f32 %v939_v49, %v935_v56 }
 0xd51   :  { %943 = vrot.lane.b32.xlu1 %v941_v57, %s2417_s1 }
 0xdc3   :  { %v944_v58 = vpop.permute.xlu1 %943 }
 0xdc4   :  { %v946_v59 = vadd.f32 %v944_v58, %v2786_v40 }
 0xdc6   :  { %2325 = vtanh.f32 %v946_v59 }
 0xdcc   :  { %v2326_v61 = vpop.eup %2325 }
 0xdcd   :  { %950 = vrot.lane.b32.xlu0 %v2326_v61, %s2418_s23 }
 0xe3f   :  { %v951_v63 = vpop.permute.xlu0 %950 }
 0xe40   :  { %v953_v2 = vmul.f32 %v951_v63, %v948_v27 }
 0xe42   :  { %v956_v6 = vadd.f32 %v955_v1, %v953_v2 }
 0xe44   :  { %958 = vrot.lane.b32.xlu2 %v956_v6, %s2418_s23  ;;  %v1023_v36 = vrot.slane %v956_v6, 6 }
 0xe9e   :  { %v959_v8 = vpop.permute.xlu2 %958 }
 0xe9f   :  { %961 = vst.msk [vmem:[#allocation3 + $0x8] sm:$0x3] %vm671_vm9, %v959_v8  ;;  %2193 = vmatmul.msk.f32.vlgmr.msrb.gmra.mxu3 %vm67_vm0, %v959_v8 }
 0xf22   :  { %v981_v10 = vpop.f32.mrf.mxu3 }
 0xf23   :  { %v982_v14 = vadd.f32 %v2708_v45, %v981_v10 }
 0xf25   :  { %v985_v34 = vrot.slane %v982_v14, 6 }
 0xf27   :  { %1007 = vrot.lane.b32.xlu1 %v985_v34, %s2417_s1  ;;  %v987_v20 = vadd.f32 %v985_v34, %v2786_v40 }
 0xf29   :  { %v2194_v35 = vmul.f32 -1.442695, %v987_v20 }
 0xf2b   :  { %2327 = vpow2.f32 %v2194_v35 }
 0xf31   :  { %v2328_v15 = vpop.eup %2327 }
 0xf32   :  { %v991_v42 = vadd.f32 1.0, %v2328_v15 }
 0xf34   :  { %2329 = vrcp.f32 %v991_v42  ;;  %v1003_v23 = vand.u32 2147483648, %v991_v42  ;;  %vm997_vm12 = vweird.f32 %v991_v42  ;;  %v1001_v24 = vand.u32 2147483647, %v991_v42 }
 0xf36   :  { %v1004_v29 = vor.u32 1.1754944e-38, %v1003_v23  ;;  %vm1002_vm14 = vcmp.eq.f32.partialorder %v1001_v24, 8.507059e+37 }
 0xf3a   :  { %v2330_v47 = vpop.eup %2329 }
 0xf3b   :  { %v993_v5 = vmul.f32 %v2330_v47, %v991_v42  ;;  %vm998_vm9 = vweird.f32 %v2330_v47 }
 0xf3c   :  { %vm999_vm13 = vmor %vm997_vm12, %vm998_vm9 }
 0xf3d   :  { %v994_v18 = vsub.f32 1.0, %v993_v5 }
 0xf3f   :  { %v995_v19 = vmul.f32 %v2330_v47, %v994_v18 }
 0xf41   :  { %v996_v9 = vadd.f32 %v2330_v47, %v995_v19 }
 0xf43   :  { %v1000_v28 = vsel %vm999_vm13, %v2330_v47, %v996_v9 }
 0xf44   :  { %v1005_v16 = vsel %vm1002_vm14, %v1004_v29, %v1000_v28 }
 0xf45   :  { %v1017_v37 = vsub.f32 1.0, %v1005_v16  ;;  %v1025_v39 = vmul.f32 %v1023_v36, %v1005_v16 }
 0xf99   :  { %v1008_v30 = vpop.permute.xlu1 %1007 }
 0xf9a   :  { %v1010_v4 = vmul.f32 %v1008_v30, %v1005_v16 }
 0xf9c   :  { %1012 = vrot.lane.b32.xlu0 %v1010_v4, %s2417_s1 }
0x100e   :  { %v1013_v31 = vpop.permute.xlu0 %1012 }
0x100f   :  { %v1015_v32 = vadd.f32 %v1013_v31, %v2786_v40 }
0x1011   :  { %2331 = vtanh.f32 %v1015_v32 }
0x1017   :  { %v2332_v33 = vpop.eup %2331 }
0x1018   :  { %1019 = vrot.lane.b32.xlu2 %v2332_v33, %s2418_s23 }
0x1072   :  { %v1020_v21 = vpop.permute.xlu2 %1019 }
0x1073   :  { %v1022_v25 = vmul.f32 %v1020_v21, %v1017_v37 }
0x1075   :  { %v1026_v17 = vadd.f32 %v1025_v39, %v1022_v25 }
0x1077   :  { %v1032_v43 = vrot.slane %v1026_v17, 2  ;;  %v1096_v14 = vrot.slane %v1026_v17, 6 }
0x1079   :  { %1033 = vrot.lane.b32.xlu1 %v1032_v43, %s2418_s23 }
0x10eb   :  { %v1034_v46 = vpop.permute.xlu1 %1033 }
0x10ec   :  { %2195 = vmatmul.msk.f32.vlgmr.msrb.gmra.mxu2 %vm67_vm0, %v1034_v46 }
0x116f   :  { %v1054_v48 = vpop.f32.mrf.mxu2 }
0x1170   :  { %v1055_v62 = vadd.f32 %v2708_v45, %v1054_v48 }
0x1172   :  { %v1058_v3 = vrot.slane %v1055_v62, 4 }
0x1174   :  { %1080 = vrot.lane.b32.xlu0 %v1058_v3, %s2417_s1  ;;  %v1060_v50 = vadd.f32 %v1058_v3, %v2786_v40  ;;  %v1182_v3 = vld [vmem:[#allocation4 + $0xb0] sm:$0xff] }
0x1176   :  { %v2196_v51 = vmul.f32 -1.442695, %v1060_v50  ;;  %v1181_v50 = vld [vmem:[#allocation4 + $0xa8] sm:$0xff] }
0x1178   :  { %2333 = vpow2.f32 %v2196_v51  ;;  %v1180_v51 = vld [vmem:[#allocation4 + $0xa0] sm:$0xff] }
0x117e   :  { %v2334_v52 = vpop.eup %2333 }
0x117f   :  { %v1064_v54 = vadd.f32 1.0, %v2334_v52 }
0x1181   :  { %2335 = vrcp.f32 %v1064_v54  ;;  %v1076_v57 = vand.u32 2147483648, %v1064_v54  ;;  %vm1070_vm1 = vweird.f32 %v1064_v54  ;;  %v1074_v58 = vand.u32 2147483647, %v1064_v54 }
0x1183   :  { %v1077_v61 = vor.u32 1.1754944e-38, %v1076_v57  ;;  %vm1075_vm3 = vcmp.eq.f32.partialorder %v1074_v58, 8.507059e+37  ;;  %v2260_v58 = vld [vmem:[%s3051_s2 + $0xc] ss:$0 sm:$0xff] }
0x1187   :  { %v2336_v55 = vpop.eup %2335 }
0x1188   :  { %v1066_v44 = vmul.f32 %v2336_v55, %v1064_v54  ;;  %vm1071_vm15 = vweird.f32 %v2336_v55 }
0x1189   :  { %vm1072_vm2 = vmor %vm1070_vm1, %vm1071_vm15 }
0x118a   :  { %v1067_v53 = vsub.f32 1.0, %v1066_v44 }
0x118c   :  { %v1068_v49 = vmul.f32 %v2336_v55, %v1067_v53 }
0x118e   :  { %v1069_v56 = vadd.f32 %v2336_v55, %v1068_v49 }
0x1190   :  { %v1073_v59 = vsel %vm1072_vm2, %v2336_v55, %v1069_v56 }
0x1191   :  { %v1078_v63 = vsel %vm1075_vm3, %v1077_v61, %v1073_v59  ;;  %v2249_v59 = vld [vmem:[%s3051_s2 + $0xd] ss:$0 sm:$0xff]  ;;  %v1186_v61 = vmul.f32 %v2260_v58, %v2471_v7 }
0x1192   :  { %v1090_v10 = vsub.f32 1.0, %v1078_v63  ;;  %v1098_v20 = vmul.f32 %v1096_v14, %v1078_v63 }
0x11e6   :  { %v1081_v27 = vpop.permute.xlu0 %1080 }
0x11e7   :  { %v1083_v1 = vmul.f32 %v1081_v27, %v1078_v63  ;;  %v1219_v63 = vmul.f32 %v2249_v59, %v2478_v11 }
0x11e9   :  { %1085 = vrot.lane.b32.xlu2 %v1083_v1, %s2417_s1 }
0x1243   :  { %v1086_v2 = vpop.permute.xlu2 %1085 }
0x1244   :  { %v1088_v6 = vadd.f32 %v1086_v2, %v2786_v40  ;;  %v2261_v2 = vld [vmem:[%s3051_s2 + $0xe] ss:$0 sm:$0xff] }
0x1246   :  { %2337 = vtanh.f32 %v1088_v6 }
0x124c   :  { %v2338_v8 = vpop.eup %2337 }
0x124d   :  { %1092 = vrot.lane.b32.xlu1 %v2338_v8, %s2418_s23 }
0x12bf   :  { %v1093_v34 = vpop.permute.xlu1 %1092 }
0x12c0   :  { %v1095_v35 = vmul.f32 %v1093_v34, %v1090_v10 }
0x12c2   :  { %v2809_v15 = vadd.f32 %v1098_v20, %v1095_v35  ;;  %v1187_v20 = vmul.f32 %v2260_v58, %v2480_v12 }
0x12c4   :  { %v1105_v42 = vrot.slane %v2809_v15, 4  ;;  %v1169_v52 = vrot.slane %v2809_v15, 6 }
0x12c6   :  { %1106 = vrot.lane.b32.xlu0 %v1105_v42, %s2418_s23 }
0x1338   :  { %v1107_v47 = vpop.permute.xlu0 %1106 }
0x1339   :  { %2197 = vmatmul.msk.f32.vlgmr.msra.gmra.mxu3 %vm67_vm0, %v1107_v47 }
0x13bc   :  { %v1127_v5 = vpop.f32.mrf.mxu3 }
0x13bd   :  { %v1128_v18 = vadd.f32 %v2708_v45, %v1127_v5 }
0x13bf   :  { %v1131_v19 = vrot.slane %v1128_v18, 2 }
0x13c1   :  { %1153 = vrot.lane.b32.xlu2 %v1131_v19, %s2417_s1  ;;  %v1133_v9 = vadd.f32 %v1131_v19, %v2786_v40  ;;  %v1292_v19 = vld [vmem:[#allocation4 + $0xd8] sm:$0xff] }
0x13c2   :  { %1313 = vmatpush.msrb.mxu1 %v1292_v19 }
0x13c3   :  { %v2198_v23 = vmul.f32 -1.442695, %v1133_v9  ;;  %v1291_v9 = vld [vmem:[#allocation4 + $0xd0] sm:$0xff] }
0x13c4   :  { %1314 = vmatpush.msrb.mxu1 %v1291_v9  ;;  %v1387_v9 = vld [vmem:[#allocation4 + $0xe8] sm:$0xff] }
0x13c5   :  { %2339 = vpow2.f32 %v2198_v23 }
0x13c9   :  { %739 = vrot.lane.b32.xlu2 %v2748_v26, %s2418_s23 }
0x13cb   :  { %v2340_v24 = vpop.eup %2339 }
0x13cc   :  { %v1137_v28 = vadd.f32 1.0, %v2340_v24  ;;  %v1290_v24 = vld [vmem:[#allocation4 + $0xc8] sm:$0xff] }
0x13cd   :  { %1315 = vmatpush.msrb.mxu1 %v1290_v24 }
0x13ce   :  { %2341 = vrcp.f32 %v1137_v28  ;;  %v1149_v31 = vand.u32 2147483648, %v1137_v28  ;;  %vm1143_vm5 = vweird.f32 %v1137_v28  ;;  %v1147_v32 = vand.u32 2147483647, %v1137_v28 }
0x13d0   :  { %v1150_v33 = vor.u32 1.1754944e-38, %v1149_v31  ;;  %vm1148_vm7 = vcmp.eq.f32.partialorder %v1147_v32, 8.507059e+37 }
0x13d1   :  { %1028 = vrot.lane.b32.xlu2 %v1026_v17, %s2418_s23 }
0x13d4   :  { %v2342_v29 = vpop.eup %2341 }
0x13d5   :  { %v1139_v30 = vmul.f32 %v2342_v29, %v1137_v28  ;;  %vm1144_vm4 = vweird.f32 %v2342_v29  ;;  %v1289_v28 = vld [vmem:[#allocation4 + $0xc0] sm:$0xff] }
0x13d6   :  { %vm1145_vm6 = vmor %vm1143_vm5, %vm1144_vm4  ;;  %1316 = vmatpush.msrb.mxu1 %v1289_v28 }
0x13d7   :  { %v1140_v16 = vsub.f32 1.0, %v1139_v30 }
0x13d9   :  { %v1141_v4 = vmul.f32 %v2342_v29, %v1140_v16 }
0x13db   :  { %v1142_v45 = vadd.f32 %v2342_v29, %v1141_v4 }
0x13dd   :  { %v1146_v26 = vsel %vm1145_vm6, %v2342_v29, %v1142_v45 }
0x13de   :  { %v1151_v37 = vsel %vm1148_vm7, %v1150_v33, %v1146_v26 }
0x13df   :  { %v1171_v55 = vmul.f32 %v1169_v52, %v1151_v37 }
0x141b   :  { %v1154_v36 = vpop.permute.xlu2 %1153 }
0x141c   :  { %v1156_v21 = vmul.f32 %v1154_v36, %v1151_v37 }
0x141e   :  { %1158 = vrot.lane.b32.xlu1 %v1156_v21, %s2417_s1 }
0x1423   :  { %v740_v25 = vpop.permute.xlu2 %739 }
0x1424   :  { %743 = vst.msk [vmem:[#allocation3] sm:$0xc] %vm742_vm8, %v740_v25 }
0x1426   :  { %813 = vrot.lane.b32.xlu1 %v2760_v60, %s2418_s23  ;;  %v1183_v60 = vld [vmem:[#allocation4 + $0xb8] sm:$0xff] }
0x1427   :  { %1206 = vmatpush.msra.mxu0 %v1183_v60 }
0x1429   :  { %1207 = vmatpush.msra.mxu0 %v1182_v3 }
0x142b   :  { %v1029_v39 = vpop.permute.xlu2 %1028  ;;  %1208 = vmatpush.msra.mxu0 %v1181_v50 }
0x142c   :  { %1031 = vst.msk [vmem:[#allocation3 + $0x8] sm:$0xc] %vm742_vm8, %v1029_v39  ;;  %v2262_v39 = vld [vmem:[%s3051_s2 + $0xf] ss:$0 sm:$0xff] }
0x142d   :  { %1209 = vmatpush.msra.mxu0 %v1180_v51 }
0x142e   :  { %1101 = vrot.lane.b32.xlu1 %v2809_v15, %s2418_s23  ;;  %v1220_v15 = vmul.f32 %v2249_v59, %v2496_v22 }
0x1490   :  { %v1159_v17 = vpop.permute.xlu1 %1158 }
0x1491   :  { %v1161_v43 = vadd.f32 %v1159_v17, %v2786_v40  ;;  %v1163_v40 = vsub.f32 1.0, %v1151_v37 }
0x1493   :  { %2343 = vtanh.f32 %v1161_v43 }
0x1498   :  { %v814_v46 = vpop.permute.xlu1 %813 }
0x1499   :  { %v2344_v48 = vpop.eup %2343  ;;  %817 = vst.msk [vmem:[#allocation3] sm:$0x30] %vm816_vm10, %v814_v46  ;;  %v2263_v46 = vld [vmem:[%s3051_s2 + $0x10] ss:$0 sm:$0xff] }
0x149a   :  { %1165 = vrot.lane.b32.xlu0 %v2344_v48, %s2418_s23 }
0x14a0   :  { %v1102_v62 = vpop.permute.xlu1 %1101 }
0x14a1   :  { %1104 = vst.msk [vmem:[#allocation3 + $0x8] sm:$0x30] %vm816_vm10, %v1102_v62 }
0x14a2   :  { %887 = vrot.lane.b32.xlu0 %v2776_v13, %s2418_s23 }
0x150c   :  { %v1166_v54 = vpop.permute.xlu0 %1165 }
0x150d   :  { %v1168_v44 = vmul.f32 %v1166_v54, %v1163_v40 }
0x150f   :  { %v1172_v53 = vadd.f32 %v1171_v55, %v1168_v44 }
0x1511   :  { %1174 = vrot.lane.b32.xlu0 %v1172_v53, %s2418_s23  ;;  %s2420_s23 = smov 127  }
0x1514   :  { %v888_v49 = vpop.permute.xlu0 %887 }
0x1515   :  { %891 = vst.msk [vmem:[#allocation3] sm:$0xc0] %vm890_vm11, %v888_v49 }
0x151c   :  { %v1178_v13 = vld [vmem:[#allocation3] sm:$0xff] }
0x151d   :  { %2199 = vmatmul.msk.f32.vlgmr.msra.gmra.mxu0 %vm67_vm0, %v1178_v13 }
0x1583   :  { %v1175_v56 = vpop.permute.xlu0 %1174 }
0x1584   :  { %1177 = vst.msk [vmem:[#allocation3 + $0x8] sm:$0xc0] %vm890_vm11, %v1175_v56 }
0x158b   :  { %v1179_v57 = vld [vmem:[#allocation3 + $0x8] sm:$0xff] }
0x158c   :  { %2200 = vmatmul.msk.f32.gmra.mxu0 %vm67_vm0, %v1179_v57 }
0x159a   :  { %v1211_v27 = vpop.f32.mrf.mxu0 }
0x159b   :  { %v1212_v1 = vadd.f32 %v1211_v27, %v1186_v61 }
0x159d   :  { %v1221_v6 = vadd.f32 %v1219_v63, %v1212_v1 }
0x159f   :  { %v1225_v8 = vadd.f32 %v2261_v2, %v1221_v6 }
0x15a1   :  { %v1227_v10 = vsel %vm67_vm0, %v1225_v8, 0.0  ;;  %v1235_v14 = vmul.f32 %v1225_v8, %v1225_v8 }
0x15a2   :  { %1228 = vadd.xlane.f32.xlu2 %v1227_v10 }
0x15a3   :  { %v1237_v34 = vsel %vm67_vm0, %v1235_v14, 0.0 }
0x15a4   :  { %1238 = vadd.xlane.f32.xlu1 %v1237_v34 }
0x1609   :  { %v1214_v35 = vpop.f32.mrf.mxu0 }
0x160a   :  { %v1215_v11 = vadd.f32 %v1214_v35, %v1187_v20 }
0x160c   :  { %v1222_v42 = vadd.f32 %v1220_v15, %v1215_v11 }
0x160e   :  { %v1226_v47 = vadd.f32 %v2261_v2, %v1222_v42 }
0x1610   :  { %v1230_v5 = vsel %vm67_vm0, %v1226_v47, 0.0  ;;  %v1236_v18 = vmul.f32 %v1226_v47, %v1226_v47 }
0x1611   :  { %1231 = vadd.xlane.f32.xlu0 %v1230_v5  ;;  %v1389_v5 = vld [vmem:[#allocation4 + $0xf8] sm:$0xff] }
0x1612   :  { %v1240_v23 = vsel %vm67_vm0, %v1236_v18, 0.0  ;;  %v1388_v18 = vld [vmem:[#allocation4 + $0xf0] sm:$0xff]  ;;  %1410 = vmatpush.msra.mxu2 %v1389_v5 }
0x1613   :  { %1241 = vadd.xlane.f32.xlu2 %v1240_v23  ;;  %v1386_v23 = vld [vmem:[#allocation4 + $0xe0] sm:$0xff] }
0x1614   :  { %1411 = vmatpush.msra.mxu2 %v1388_v18 }
0x1615   :  { %v1229_v29 = vpop.xlane.xlu2 %1228 }
0x1616   :  { %v1233_v22 = vmul.f32 %v1229_v29, %v2511_v38  ;;  %1412 = vmatpush.msra.mxu2 %v1387_v9 }
0x1617   :  { %v1239_v30 = vpop.xlane.xlu1 %1238 }
0x1618   :  { %v1245_v16 = vmul.f32 %v1233_v22, %v1233_v22  ;;  %v1243_v4 = vmul.f32 %v1239_v30, %v2511_v38  ;;  %v1249_v25 = vsub.f32 %v1225_v8, %v1233_v22  ;;  %v2264_v8 = vld [vmem:[%s3051_s2 + $0x11] ss:$0 sm:$0xff]  ;;  %1413 = vmatpush.msra.mxu2 %v1386_v23 }
0x161a   :  { %v1247_v45 = vsub.f32 %v1243_v4, %v1245_v16 }
0x161c   :  { %v1251_v31 = vadd.f32 1e-05, %v1247_v45 }
0x161e   :  { %2345 = vrsqrt.f32 %v1251_v31  ;;  %vm1259_vm12 = vweird.f32 %v1251_v31 }
0x1624   :  { %v2346_v32 = vpop.eup %2345 }
0x1625   :  { %v1254_v26 = vmul.f32 %v2346_v32, %v1251_v31  ;;  %vm1260_vm9 = vweird.f32 %v2346_v32 }
0x1626   :  { %vm1261_vm13 = vmor %vm1259_vm12, %vm1260_vm9 }
0x1627   :  { %v1255_v33 = vmul.f32 %v2346_v32, %v1254_v26 }
0x1629   :  { %v1256_v36 = vmul.f32 0.5, %v1255_v33 }
0x162b   :  { %v1257_v37 = vsub.f32 1.5, %v1256_v36 }
0x162d   :  { %v1258_v21 = vmul.f32 %v2346_v32, %v1257_v37 }
0x162f   :  { %v1262_v17 = vsel %vm1261_vm13, %v2346_v32, %v1258_v21  ;;  %v2265_v21 = vld [vmem:[%s3051_s2 + $0x12] ss:$0 sm:$0xff] }
0x1630   :  { %v1273_v43 = vmul.f32 %v1262_v17, %v1249_v25  ;;  %v2266_v17 = vld [vmem:[%s3051_s2 + $0x13] ss:$0 sm:$0xff] }
0x1632   :  { %v1277_v48 = vmul.f32 %v2262_v39, %v1273_v43 }
0x1634   :  { %v1281_v62 = vadd.f32 %v2263_v46, %v1277_v48 }
0x1636   :  { %vm1283_vm14 = vcmp.gt.f32.partialorder %v1281_v62, 0.0  ;;  %v1285_v60 = vmul.f32 0.01, %v1281_v62 }
0x1638   :  { %v1287_v3 = vsel %vm1283_vm14, %v1281_v62, %v1285_v60 }
0x1639   :  { %2201 = vmatmul.msk.f32.vlgmr.msrb.gmra.mxu1 %vm67_vm0, %v1287_v3 }
0x1684   :  { %v1232_v50 = vpop.xlane.xlu0 %1231 }
0x1685   :  { %v1234_v51 = vmul.f32 %v1232_v50, %v2511_v38 }
0x1686   :  { %v1242_v40 = vpop.xlane.xlu2 %1241 }
0x1687   :  { %v1246_v52 = vmul.f32 %v1234_v51, %v1234_v51  ;;  %v1244_v54 = vmul.f32 %v1242_v40, %v2511_v38  ;;  %v1250_v59 = vsub.f32 %v1226_v47, %v1234_v51 }
0x1689   :  { %v1248_v55 = vsub.f32 %v1244_v54, %v1246_v52 }
0x168b   :  { %v1252_v44 = vadd.f32 1e-05, %v1248_v55 }
0x168d   :  { %2347 = vrsqrt.f32 %v1252_v44  ;;  %vm1269_vm1 = vweird.f32 %v1252_v44 }
0x1693   :  { %v2348_v53 = vpop.eup %2347 }
0x1694   :  { %v1264_v49 = vmul.f32 %v2348_v53, %v1252_v44  ;;  %vm1270_vm15 = vweird.f32 %v2348_v53 }
0x1695   :  { %vm1271_vm2 = vmor %vm1269_vm1, %vm1270_vm15 }
0x1696   :  { %v1265_v13 = vmul.f32 %v2348_v53, %v1264_v49 }
0x1698   :  { %v1266_v56 = vmul.f32 0.5, %v1265_v13 }
0x169a   :  { %v1267_v57 = vsub.f32 1.5, %v1266_v56 }
0x169c   :  { %v1268_v58 = vmul.f32 %v2348_v53, %v1267_v57 }
0x169e   :  { %v1272_v61 = vsel %vm1271_vm2, %v2348_v53, %v1268_v58 }
0x169f   :  { %v1274_v27 = vmul.f32 %v1272_v61, %v1250_v59 }
0x16a1   :  { %v1278_v63 = vmul.f32 %v2262_v39, %v1274_v27 }
0x16a3   :  { %v1282_v1 = vadd.f32 %v2263_v46, %v1278_v63 }
0x16a5   :  { %vm1284_vm3 = vcmp.gt.f32.partialorder %v1282_v1, 0.0  ;;  %v1286_v2 = vmul.f32 0.01, %v1282_v1 }
0x16a7   :  { %v1288_v6 = vsel %vm1284_vm3, %v1282_v1, %v1286_v2  ;;  %v2267_v2 = vld [vmem:[%s3051_s2 + $0x14] ss:$0 sm:$0xff]  ;;  %vm1673_vm3 = vcmask 64512  }
0x16a8   :  { %2202 = vmatmul.msk.f32.gmra.mxu1 %vm67_vm0, %v1288_v6 }
0x16b6   :  { %v1318_v10 = vpop.f32.mrf.mxu1 }
0x16b7   :  { %v1319_v14 = vadd.f32 %v2264_v8, %v1318_v10  ;;  %v1582_v10 = vlaneseq }
0x16b9   :  { %v1324_v34 = vsel %vm67_vm0, %v1319_v14, 0.0  ;;  %v1332_v20 = vmul.f32 %v1319_v14, %v1319_v14 }
0x16ba   :  { %1325 = vadd.xlane.f32.xlu1 %v1324_v34 }
0x16bb   :  { %v1334_v35 = vsel %vm67_vm0, %v1332_v20, 0.0 }
0x16bc   :  { %1335 = vadd.xlane.f32.xlu0 %v1334_v35  ;;  %v2887_v35 = vand.u32 127, %v1582_v10 }
0x1725   :  { %v1321_v15 = vpop.f32.mrf.mxu1 }
0x1726   :  { %v1322_v11 = vadd.f32 %v2264_v8, %v1321_v15  ;;  %v1584_v15 = vadd.s32 1, %v2887_v35 }
0x1728   :  { %v1327_v42 = vsel %vm67_vm0, %v1322_v11, 0.0  ;;  %v1333_v47 = vmul.f32 %v1322_v11, %v1322_v11 }
0x1729   :  { %1328 = vadd.xlane.f32.xlu2 %v1327_v42 }
0x172a   :  { %v1337_v19 = vsel %vm67_vm0, %v1333_v47, 0.0 }
0x172b   :  { %1338 = vadd.xlane.f32.xlu1 %v1337_v19 }
0x172d   :  { %v1326_v24 = vpop.xlane.xlu1 %1325 }
0x172e   :  { %v1330_v28 = vmul.f32 %v1326_v24, %v2511_v38  ;;  %v1486_v24 = vld [vmem:[#allocation4 + $0x118] sm:$0xff] }
0x172f   :  { %v1336_v29 = vpop.xlane.xlu0 %1335  ;;  %1507 = vmatpush.msrb.mxu3 %v1486_v24  ;;  %v2270_v24 = vld [vmem:[%s3051_s2 + $0x17] ss:$0 sm:$0xff] }
0x1730   :  { %v1342_v22 = vmul.f32 %v1330_v28, %v1330_v28  ;;  %v1340_v30 = vmul.f32 %v1336_v29, %v2511_v38  ;;  %v1346_v37 = vsub.f32 %v1319_v14, %v1330_v28  ;;  %v1485_v28 = vld [vmem:[#allocation4 + $0x110] sm:$0xff]  ;;  %v1484_v29 = vld [vmem:[#allocation4 + $0x108] sm:$0xff] }
0x1731   :  { %1508 = vmatpush.msrb.mxu3 %v1485_v28 }
0x1732   :  { %v1344_v16 = vsub.f32 %v1340_v30, %v1342_v22  ;;  %v1483_v22 = vld [vmem:[#allocation4 + $0x100] sm:$0xff] }
0x1733   :  { %1509 = vmatpush.msrb.mxu3 %v1484_v29 }
0x1734   :  { %v1348_v4 = vadd.f32 1e-05, %v1344_v16 }
0x1735   :  { %1510 = vmatpush.msrb.mxu3 %v1483_v22 }
0x1736   :  { %2349 = vrsqrt.f32 %v1348_v4  ;;  %vm1356_vm5 = vweird.f32 %v1348_v4 }
0x173c   :  { %v2350_v45 = vpop.eup %2349 }
0x173d   :  { %v1351_v31 = vmul.f32 %v2350_v45, %v1348_v4  ;;  %vm1357_vm4 = vweird.f32 %v2350_v45 }
0x173e   :  { %vm1358_vm6 = vmor %vm1356_vm5, %vm1357_vm4 }
0x173f   :  { %v1352_v32 = vmul.f32 %v2350_v45, %v1351_v31 }
0x1741   :  { %v1353_v26 = vmul.f32 0.5, %v1352_v32 }
0x1743   :  { %v1354_v33 = vsub.f32 1.5, %v1353_v26 }
0x1745   :  { %v1355_v36 = vmul.f32 %v2350_v45, %v1354_v33 }
0x1747   :  { %v1359_v25 = vsel %vm1358_vm6, %v2350_v45, %v1355_v36 }
0x1748   :  { %v1370_v39 = vmul.f32 %v1359_v25, %v1346_v37 }
0x174a   :  { %v1374_v43 = vmul.f32 %v2265_v21, %v1370_v39 }
0x174c   :  { %v1378_v46 = vadd.f32 %v2266_v17, %v1374_v43 }
0x174e   :  { %vm1380_vm7 = vcmp.gt.f32.partialorder %v1378_v46, 0.0  ;;  %v1382_v48 = vmul.f32 0.01, %v1378_v46 }
0x1750   :  { %v1384_v62 = vsel %vm1380_vm7, %v1378_v46, %v1382_v48 }
0x1751   :  { %2203 = vmatmul.msk.f32.vlgmr.msra.gmra.mxu2 %vm67_vm0, %v1384_v62 }
0x179c   :  { %v1329_v60 = vpop.xlane.xlu2 %1328 }
0x179d   :  { %v1331_v3 = vmul.f32 %v1329_v60, %v2511_v38 }
0x179e   :  { %v1339_v50 = vpop.xlane.xlu1 %1338 }
0x179f   :  { %v1343_v51 = vmul.f32 %v1331_v3, %v1331_v3  ;;  %v1341_v40 = vmul.f32 %v1339_v50, %v2511_v38  ;;  %v1347_v57 = vsub.f32 %v1322_v11, %v1331_v3  ;;  %v1585_v11 = vcvt.s32.f32 %v1584_v15  ;;  %v2269_v3 = vld [vmem:[%s3051_s2 + $0x16] ss:$0 sm:$0xff] }
0x17a1   :  { %v1345_v52 = vsub.f32 %v1341_v40, %v1343_v51  ;;  %v1586_v42 = vmul.f32 %v1585_v11, %v2471_v7  ;;  %v1587_v33 = vmul.f32 %v1585_v11, %v2480_v12  ;;  %v2268_v12 = vld [vmem:[%s3051_s2 + $0x15] ss:$0 sm:$0xff] }
0x17a3   :  { %v1349_v54 = vadd.f32 1e-05, %v1345_v52  ;;  %vm1588_vm12 = vcmp.lt.f32.partialorder %v1586_v42, 32.0  ;;  %vm1589_vm13 = vcmp.lt.f32.partialorder %v1587_v33, 32.0 }
0x17a4   :  { %v2209_v47 = vsel %vm1588_vm12, 1.0, %v2416_v41 }
0x17a5   :  { %2351 = vrsqrt.f32 %v1349_v54  ;;  %vm1366_vm10 = vweird.f32 %v1349_v54  ;;  %v1594_v5 = vadd.f32 0.0001, %v2209_v47 }
0x17ab   :  { %v2352_v55 = vpop.eup %2351 }
0x17ac   :  { %v1361_v44 = vmul.f32 %v2352_v55, %v1349_v54  ;;  %vm1367_vm8 = vweird.f32 %v2352_v55  ;;  %v2913_v54 = vshrl.u32 %v1582_v10, 7 }
0x17ad   :  { %vm1368_vm11 = vmor %vm1366_vm10, %vm1367_vm8 }
0x17ae   :  { %v1362_v53 = vmul.f32 %v2352_v55, %v1361_v44 }
0x17b0   :  { %v1363_v49 = vmul.f32 0.5, %v1362_v53 }
0x17b2   :  { %v1364_v13 = vsub.f32 1.5, %v1363_v49 }
0x17b4   :  { %v1365_v56 = vmul.f32 %v2352_v55, %v1364_v13 }
0x17b6   :  { %v1369_v58 = vsel %vm1368_vm11, %v2352_v55, %v1365_v56  ;;  %v1665_v56 = vcvt.s32.f32 %v2913_v54 }
0x17b7   :  { %v1371_v59 = vmul.f32 %v1369_v58, %v1347_v57  ;;  %v1666_v57 = vcvt.s32.f32 %v2887_v35 }
0x17b9   :  { %v1375_v61 = vmul.f32 %v2265_v21, %v1371_v59  ;;  %v2210_v21 = vsel %vm1589_vm13, 1.0, %v2416_v41  ;;  %v1667_v59 = vmul.f32 16.0, %v1665_v56 }
0x17ba   :  { %v1595_v39 = vadd.f32 0.0001, %v2210_v21 }
0x17bb   :  { %v1379_v27 = vadd.f32 %v2266_v17, %v1375_v61 }
0x17bd   :  { %vm1381_vm9 = vcmp.gt.f32.partialorder %v1379_v27, 0.0  ;;  %v1383_v63 = vmul.f32 0.01, %v1379_v27 }
0x17bf   :  { %v1385_v1 = vsel %vm1381_vm9, %v1379_v27, %v1383_v63  ;;  %v1668_v27 = vsub.f32 %v1666_v57, %v1667_v59 }
0x17c0   :  { %2204 = vmatmul.msk.f32.gmra.mxu2 %vm67_vm0, %v1385_v1 }
0x17c1   :  { %v1669_v63 = vadd.f32 1.0, %v1668_v27 }
0x17c3   :  { %v1670_v1 = vmax.f32 %v1669_v63, 0.0 }
0x17d4   :  { %v1415_v6 = vpop.f32.mrf.mxu2 }
0x17d5   :  { %v1416_v8 = vadd.f32 %v2267_v2, %v1415_v6 }
0x17d7   :  { %v1421_v14 = vsel %vm67_vm0, %v1416_v8, 0.0  ;;  %v1429_v34 = vmul.f32 %v1416_v8, %v1416_v8 }
0x17d8   :  { %1422 = vadd.xlane.f32.xlu0 %v1421_v14  ;;  %v34_v14 = vld [vmem:[%s3049_s0 + $0x20] sm:$0x3] }
0x17d9   :  { %v1431_v20 = vsel %vm67_vm0, %v1429_v34, 0.0 }
0x17da   :  { %1432 = vadd.xlane.f32.xlu2 %v1431_v20 }
0x17f2   :  { %1598 = vrot.lane.b32.xlu2 %v1594_v5, %s2419_s15 }
0x1843   :  { %v1418_v18 = vpop.f32.mrf.mxu2 }
0x1844   :  { %v2893_v19 = vadd.f32 %v2267_v2, %v1418_v18  ;;  %v1671_v2 = vmin.f32 %v1670_v1, 16.0 }
0x1846   :  { %v1424_v9 = vsel %vm67_vm0, %v2893_v19, 0.0  ;;  %v1430_v23 = vmul.f32 %v2893_v19, %v2893_v19  ;;  %v1672_v10 = vmul.f32 0.09817477, %v1671_v2 }
0x1847   :  { %1425 = vadd.xlane.f32.xlu1 %v1424_v9 }
0x1848   :  { %v1434_v7 = vsel %vm67_vm0, %v1430_v23, 0.0  ;;  %1692 = vmatpush.msrb.mxu0 %v1672_v10 }
0x1849   :  { %1435 = vadd.xlane.f32.xlu0 %v1434_v7  ;;  %2211 = vmatmul.msk.f32.vlgmr.msrb.gmra.mxu0 %vm1673_vm3, %v34_v14 }
0x184b   :  { %v1423_v30 = vpop.xlane.xlu0 %1422 }
0x184c   :  { %v1427_v16 = vmul.f32 %v1423_v30, %v2511_v38 }
0x184d   :  { %v1433_v4 = vpop.xlane.xlu2 %1432 }
0x184e   :  { %v1439_v45 = vmul.f32 %v1427_v16, %v1427_v16  ;;  %v1437_v31 = vmul.f32 %v1433_v4, %v2511_v38  ;;  %v1443_v48 = vsub.f32 %v1416_v8, %v1427_v16 }
0x1850   :  { %v1441_v32 = vsub.f32 %v1437_v31, %v1439_v45 }
0x1852   :  { %v1445_v26 = vadd.f32 1e-05, %v1441_v32 }
0x1854   :  { %2353 = vrsqrt.f32 %v1445_v26  ;;  %vm1453_vm15 = vweird.f32 %v1445_v26 }
0x185a   :  { %v2354_v36 = vpop.eup %2353 }
0x185b   :  { %v1448_v37 = vmul.f32 %v2354_v36, %v1445_v26  ;;  %vm1454_vm14 = vweird.f32 %v2354_v36 }
0x185c   :  { %vm1455_vm1 = vmor %vm1453_vm15, %vm1454_vm14 }
0x185d   :  { %v1449_v25 = vmul.f32 %v2354_v36, %v1448_v37 }
0x185f   :  { %v1450_v17 = vmul.f32 0.5, %v1449_v25 }
0x1860   :  { %1600 = vrot.lane.b32.xlu1 %v1595_v39, %s2419_s15 }
0x1861   :  { %v1451_v43 = vsub.f32 1.5, %v1450_v17 }
0x1863   :  { %v1452_v46 = vmul.f32 %v2354_v36, %v1451_v43 }
0x1865   :  { %v1456_v62 = vsel %vm1455_vm1, %v2354_v36, %v1452_v46 }
0x1866   :  { %v1467_v60 = vmul.f32 %v1456_v62, %v1443_v48 }
0x1868   :  { %v1471_v50 = vmul.f32 %v2268_v12, %v1467_v60 }
0x186a   :  { %v1475_v51 = vadd.f32 %v2269_v3, %v1471_v50 }
0x186c   :  { %vm1477_vm2 = vcmp.gt.f32.partialorder %v1475_v51, 0.0  ;;  %v1479_v40 = vmul.f32 0.01, %v1475_v51 }
0x186e   :  { %v1481_v52 = vsel %vm1477_vm2, %v1475_v51, %v1479_v40  ;;  %vm1614_vm2 = vcmask 121856  }
0x186f   :  { %2205 = vmatmul.msk.f32.vlgmr.msrb.gmra.mxu3 %vm67_vm0, %v1481_v52 }
0x18ba   :  { %v1426_v55 = vpop.xlane.xlu1 %1425 }
0x18bb   :  { %v1428_v44 = vmul.f32 %v1426_v55, %v2511_v38 }
0x18bc   :  { %v1436_v53 = vpop.xlane.xlu0 %1435 }
0x18bd   :  { %v1440_v49 = vmul.f32 %v1428_v44, %v1428_v44  ;;  %v1438_v13 = vmul.f32 %v1436_v53, %v2511_v38  ;;  %v1444_v11 = vsub.f32 %v2893_v19, %v1428_v44  ;;  %v1599_v53 = vpop.permute.xlu2 %1598 }
0x18bf   :  { %v1442_v58 = vsub.f32 %v1438_v13, %v1440_v49 }
0x18c1   :  { %v1446_v61 = vadd.f32 1e-05, %v1442_v58 }
0x18c3   :  { %2355 = vrsqrt.f32 %v1446_v61  ;;  %vm1463_vm5 = vweird.f32 %v1446_v61 }
0x18c6   :  { %v2937_v56 = vpop.f32.mrf.mxu0 }
0x18c7   :  { %v1700_v57 = vand.u32 2139095040, %v2937_v56 }
0x18c9   :  { %v2356_v6 = vpop.eup %2355  ;;  %v1701_v58 = vshrl.u32 %v1700_v57, 23 }
0x18ca   :  { %v1458_v8 = vmul.f32 %v2356_v6, %v1446_v61  ;;  %vm1464_vm4 = vweird.f32 %v2356_v6 }
0x18cb   :  { %vm1465_vm6 = vmor %vm1463_vm5, %vm1464_vm4  ;;  %v2212_v61 = vadd.s32 4294967169, %v1701_v58  ;;  %vm1699_vm5 = vcmp.lt.s32.totalorder %v2937_v56, 0 }
0x18cc   :  { %v1459_v38 = vmul.f32 %v2356_v6, %v1458_v8 }
0x18cd   :  { %v1707_v63 = vadd.s32 1, %v2212_v61 }
0x18ce   :  { %v1460_v34 = vmul.f32 0.5, %v1459_v38 }
0x18d0   :  { %v1461_v20 = vsub.f32 1.5, %v1460_v34 }
0x18d2   :  { %v1462_v15 = vmul.f32 %v2356_v6, %v1461_v20 }
0x18d4   :  { %v1466_v42 = vsel %vm1465_vm6, %v2356_v6, %v1462_v15  ;;  %v1697_v15 = vand.u32 2147483647, %v2937_v56 }
0x18d5   :  { %v1468_v47 = vmul.f32 %v1466_v42, %v1444_v11 }
0x18d6   :  { %vm1698_vm6 = vcmp.le.f32.partialorder %v1697_v15, 0.7853982 }
0x18d7   :  { %v1472_v5 = vmul.f32 %v2268_v12, %v1468_v47  ;;  %v2421_v47 = vmov 683565275  }
0x18d9   :  { %v1476_v18 = vadd.f32 %v2269_v3, %v1472_v5 }
0x18db   :  { %vm1478_vm7 = vcmp.gt.f32.partialorder %v1476_v18, 0.0  ;;  %v1480_v9 = vmul.f32 0.01, %v1476_v18 }
0x18dd   :  { %v1482_v23 = vsel %vm1478_vm7, %v1476_v18, %v1480_v9  ;;  %v2422_v18 = vmov 2475754826  }
0x18de   :  { %2206 = vmatmul.msk.f32.gmra.mxu3 %vm67_vm0, %v1482_v23  ;;  %vm1708_vm0 = vcmp.gt.s32.totalorder %v1707_v63, 0 }
0x18df   :  { %v1709_v10 = vsel %vm1708_vm0, %v1707_v63, 0 }
0x18e0   :  { %v1711_v34 = vand.u32 31, %v1709_v10  ;;  %v2950_v42 = vshrl.u32 %v1709_v10, 5 }
0x18e2   :  { %v2948_v11 = vsub.s32 32, %v1711_v34  ;;  %v1714_v5 = vshll.u32 %v2421_v47, %v1711_v34  ;;  %v1717_v23 = vshll.u32 %v2422_v18, %v1711_v34  ;;  %vm1732_vm8 = vcmp.lt.s32.totalorder %v2950_v42, 4 }
0x18e3   :  { %vm1729_vm10 = vcmp.lt.s32.totalorder %v2950_v42, 1  ;;  %vm1730_vm11 = vcmp.lt.s32.totalorder %v2950_v42, 2  ;;  %vm1731_vm9 = vcmp.lt.s32.totalorder %v2950_v42, 3 }
0x18e4   :  { %v1715_v9 = vshrl.u32 %v2422_v18, %v2948_v11 }
0x18f2   :  { %v1512_v28 = vpop.f32.mrf.mxu3 }
0x18f3   :  { %v1513_v7 = vadd.f32 %v2270_v24, %v1512_v28 }
0x18f5   :  { %v2207_v29 = vadd.f32 -5.0, %v1513_v7  ;;  %v1556_v22 = vand.u32 2147483647, %v1513_v7  ;;  %v1552_v36 = vsub.f32 0.0, %v1513_v7  ;;  %v1704_v7 = vand.u32 8388607, %v1697_v15 }
0x18f7   :  { %v1524_v30 = vand.u32 2147483647, %v2207_v29  ;;  %v1558_v19 = vsub.f32 0.0, %v1556_v22  ;;  %v1520_v37 = vsub.f32 0.0, %v2207_v29  ;;  %v1554_v25 = vmax.f32 %v1552_v36, 0.0 }
0x18f8   :  { %v2957_v22 = vor.u32 %v1715_v9, %v1714_v5 }
0x18f9   :  { %v1526_v16 = vsub.f32 0.0, %v1524_v30  ;;  %v1560_v4 = vmul.f32 1.442695, %v1558_v19  ;;  %v1522_v43 = vmax.f32 %v1520_v37, 0.0  ;;  %v1705_v37 = vor.u32 8388608, %v1704_v7 }
0x18fb   :  { %v1528_v45 = vmul.f32 1.442695, %v1526_v16  ;;  %2357 = vpow2.f32 %v1560_v4  ;;  %v2424_v16 = vmov 2102212464  }
0x18fc   :  { %v1721_v4 = vshrl.u32 %v2424_v16, %v2948_v11 }
0x18fd   :  { %2359 = vpow2.f32 %v1528_v45  ;;  %v1723_v45 = vshll.u32 %v2424_v16, %v1711_v34 }
0x1901   :  { %v2358_v31 = vpop.eup %2357 }
0x1902   :  { %v1564_v32 = vadd.f32 1.0, %v2358_v31  ;;  %v2425_v31 = vmov 920167782  }
0x1903   :  { %v2360_v26 = vpop.eup %2359 }
0x1904   :  { %v1532_v33 = vadd.f32 1.0, %v2360_v26  ;;  %2361 = vlog2.f32 %v1564_v32  ;;  %v1724_v32 = vshrl.u32 %v2425_v31, %v2948_v11 }
0x1906   :  { %2363 = vlog2.f32 %v1532_v33  ;;  %v1726_v33 = vshll.u32 %v2425_v31, %v1711_v34 }
0x190a   :  { %v2362_v21 = vpop.eup %2361 }
0x190b   :  { %v1567_v39 = vmul.f32 0.6931472, %v2362_v21 }
0x190c   :  { %v2364_v17 = vpop.eup %2363 }
0x190d   :  { %v1535_v46 = vmul.f32 0.6931472, %v2364_v17  ;;  %v1570_v48 = vadd.f32 %v1567_v39, %v1554_v25  ;;  %v1725_v25 = vor.u32 %v1724_v32, %v1723_v45  ;;  %v2426_v39 = vmov 1326507024  }
0x190e   :  { %v1727_v17 = vshrl.u32 %v2426_v39, %v2948_v11 }
0x190f   :  { %v1538_v12 = vadd.f32 %v1535_v46, %v1522_v43  ;;  %v1572_v62 = vmul.f32 -2.3025851, %v1570_v48 }
0x1910   :  { %v1728_v46 = vor.u32 %v1727_v17, %v1726_v33 }
0x1911   :  { %v1540_v60 = vmul.f32 -2.3025851, %v1538_v12  ;;  %v1574_v3 = vmul.f32 1.442695, %v1572_v62  ;;  %v1738_v12 = vsel %vm1732_vm8, %v1725_v25, 920167782 }
0x1913   :  { %v1542_v50 = vmul.f32 1.442695, %v1540_v60  ;;  %2365 = vpow2.f32 %v1574_v3 }
0x1915   :  { %2367 = vpow2.f32 %v1542_v50 }
0x1919   :  { %v2366_v51 = vpop.eup %2365 }
0x191a   :  { %v1578_v40 = vmul.f32 2.0, %v2366_v51 }
0x191b   :  { %v2368_v52 = vpop.eup %2367 }
0x191c   :  { %v1546_v55 = vmul.f32 2.0, %v2368_v52  ;;  %v2927_v44 = vadd.f32 1e-07, %v1578_v40  ;;  %v1742_v40 = vsel %vm1732_vm8, %v1728_v46, 1326507024  ;;  %v2985_v52 = vshll.u32 %v1705_v37, 8 }
0x191e   :  { %v1548_v49 = vadd.f32 1e-07, %v1546_v55  ;;  %v2930_v13 = vmul.f32 %v1599_v53, %v2927_v44  ;;  %v1743_v55 = vsel %vm1731_vm9, %v1725_v25, %v1742_v40  ;;  %v1746_v58 = vand.u32 65535, %v2985_v52 }
0x1920   :  { %1550 = vst [vmem:[%s3052_s3] sm:$0xff] %v1548_v49  ;;  %1608 = vrot.lane.b32.xlu0 %v2930_v13, %s2420_s23 }
0x1961   :  { %v1515_v59 = vpop.f32.mrf.mxu3 }
0x1962   :  { %v2940_v27 = vadd.f32 %v2270_v24, %v1515_v59  ;;  %v2423_v24 = vmov 2131351028   ;;  %v1747_v59 = vshrl.u32 %v2985_v52, 16 }
0x1963   :  { %v1718_v28 = vshrl.u32 %v2423_v24, %v2948_v11  ;;  %v1720_v29 = vshll.u32 %v2423_v24, %v1711_v34 }
0x1964   :  { %v2943_v1 = vadd.f32 -5.0, %v2940_v27  ;;  %v1557_v2 = vand.u32 2147483647, %v2940_v27  ;;  %v1553_v62 = vsub.f32 0.0, %v2940_v27 }
0x1965   :  { %v2960_v19 = vor.u32 %v1718_v28, %v1717_v23  ;;  %v1722_v21 = vor.u32 %v1721_v4, %v1720_v29  ;;  %v1713_v23 = vshrl.u32 %v2421_v47, %v2948_v11 }
0x1966   :  { %v1525_v6 = vand.u32 2147483647, %v2943_v1  ;;  %v1559_v8 = vsub.f32 0.0, %v1557_v2  ;;  %v1521_v50 = vsub.f32 0.0, %v2943_v1  ;;  %v1555_v27 = vmax.f32 %v1553_v62, 0.0 }
0x1967   :  { %v1737_v48 = vsel %vm1729_vm10, %v2957_v22, %v2960_v19  ;;  %v1739_v60 = vsel %vm1731_vm9, %v1722_v21, %v1738_v12  ;;  %v1741_v3 = vsel %vm1729_vm10, %v2960_v19, %v1722_v21  ;;  %v1734_v45 = vsel %vm1732_vm8, %v1722_v21, 2102212464 }
0x1968   :  { %v1527_v14 = vsub.f32 0.0, %v1525_v6  ;;  %v1562_v38 = vmul.f32 1.442695, %v1559_v8  ;;  %v1740_v51 = vsel %vm1730_vm11, %v1737_v48, %v1739_v60  ;;  %v1744_v57 = vsel %vm1730_vm11, %v1741_v3, %v1743_v55 }
0x1969   :  { %v1770_v53 = vand.u32 65535, %v1740_v51  ;;  %v1771_v49 = vshrl.u32 %v1740_v51, 16  ;;  %v1748_v63 = vand.u32 65535, %v1744_v57  ;;  %v1749_v1 = vshrl.u32 %v1744_v57, 16 }
0x196a   :  { %v1530_v20 = vmul.f32 1.442695, %v1527_v14  ;;  %2369 = vpow2.f32 %v1562_v38  ;;  %v1523_v2 = vmax.f32 %v1521_v50, 0.0  ;;  %v1733_v12 = vsel %vm1729_vm10, %v1713_v23, %v2957_v22 }
0x196b   :  { %v1772_v8 = vmul.u32 %v1770_v53, %v1746_v58  ;;  %v1773_v10 = vmul.u32 %v1771_v49, %v1746_v58  ;;  %v1750_v38 = vmul.u32 %v1748_v63, %v1746_v58  ;;  %v1751_v34 = vmul.u32 %v1749_v1, %v1746_v58 }
0x196c   :  { %2371 = vpow2.f32 %v1530_v20  ;;  %v1752_v20 = vmul.u32 %v1748_v63, %v1747_v59  ;;  %v1774_v5 = vmul.u32 %v1770_v53, %v1747_v59  ;;  %v1753_v28 = vmul.u32 %v1749_v1, %v1747_v59 }
0x196d   :  { %v1776_v24 = vshll.u32 %v1773_v10, 16  ;;  %v1754_v7 = vshll.u32 %v1751_v34, 16  ;;  %v1755_v31 = vshrl.u32 %v1751_v34, 16  ;;  %v1777_v48 = vshrl.u32 %v1773_v10, 16 }
0x196e   :  { %v1756_v29 = vshll.u32 %v1752_v20, 16  ;;  %v1757_v21 = vshrl.u32 %v1752_v20, 16  ;;  %v1735_v62 = vsel %vm1731_vm9, %v2960_v19, %v1734_v45  ;;  %v1779_v50 = vshrl.u32 %v1774_v5, 16 }
0x196f   :  { %vm1758_vm12 = vc.u32 %v1750_v38, %v1754_v7  ;;  %v1760_v32 = vadd.s32 %v1754_v7, %v1750_v38  ;;  %vm1780_vm13 = vc.u32 %v1772_v8, %v1776_v24  ;;  %v1782_v25 = vadd.s32 %v1776_v24, %v1772_v8 }
0x1970   :  { %v2370_v30 = vpop.eup %2369  ;;  %v1759_v37 = vsel %vm1758_vm12, 1, %v2414_v0  ;;  %v1781_v11 = vsel %vm1780_vm13, 1, %v2414_v0  ;;  %v1736_v55 = vsel %vm1730_vm11, %v1733_v12, %v1735_v62  ;;  %vm1840_vm12 = vweird.f32 %v2937_v56 }
0x1971   :  { %v1565_v26 = vadd.f32 1.0, %v2370_v30  ;;  %v1775_v30 = vmul.u32 %v1771_v49, %v1747_v59  ;;  %v1761_v47 = vadd.s32 %v1759_v37, %v1753_v28  ;;  %vm1762_vm14 = vc.u32 %v1760_v32, %v1756_v29 }
0x1972   :  { %v2372_v36 = vpop.eup %2371  ;;  %v1790_v22 = vmul.u32 %v2985_v52, %v1736_v55  ;;  %vm2063_vm13 = vcmask 1046528  }
0x1973   :  { %v1533_v43 = vadd.f32 1.0, %v2372_v36  ;;  %2373 = vlog2.f32 %v1565_v26  ;;  %v1778_v26 = vshll.u32 %v1774_v5, 16  ;;  %v1783_v39 = vadd.s32 %v1781_v11, %v1775_v30 }
0x1975   :  { %2375 = vlog2.f32 %v1533_v43  ;;  %v1763_v43 = vsel %vm1762_vm14, 1, %v2414_v0  ;;  %vm1784_vm15 = vc.u32 %v1782_v25, %v1778_v26  ;;  %v1786_v40 = vadd.s32 %v1782_v25, %v1778_v26 }
0x1976   :  { %v1765_v46 = vadd.s32 %v1763_v43, %v1761_v47  ;;  %v1785_v60 = vsel %vm1784_vm15, 1, %v2414_v0  ;;  %v1601_v0 = vpop.permute.xlu1 %1600 }
0x1977   :  { %v1787_v51 = vadd.s32 %v1785_v60, %v1783_v39 }
0x1978   :  { %v1766_v3 = vadd.s32 %v1765_v46, %v1755_v31 }
0x1979   :  { %v2374_v61 = vpop.eup %2373  ;;  %v1788_v49 = vadd.s32 %v1787_v51, %v1777_v48 }
0x197a   :  { %v1569_v6 = vmul.f32 0.6931472, %v2374_v61  ;;  %v1767_v53 = vadd.s32 %v1766_v3, %v1757_v21 }
0x197b   :  { %v2376_v14 = vpop.eup %2375  ;;  %v1789_v58 = vadd.s32 %v1788_v49, %v1779_v50 }
0x197c   :  { %v1537_v18 = vmul.f32 0.6931472, %v2376_v14  ;;  %v1571_v9 = vadd.f32 %v1569_v6, %v1555_v27  ;;  %vm1792_vm1 = vc.u32 %v1767_v53, %v1786_v40  ;;  %v1791_v23 = vadd.s32 %v1786_v40, %v1767_v53 }
0x197d   :  { %v1793_v19 = vadd.s32 1, %v1789_v58 }
0x197e   :  { %v1539_v16 = vadd.f32 %v1537_v18, %v1523_v2  ;;  %v1573_v4 = vmul.f32 -2.3025851, %v1571_v9 }
0x197f   :  { %v1794_v2 = vsel %vm1792_vm1, %v1793_v19, %v1789_v58 }
0x1980   :  { %v1541_v33 = vmul.f32 -2.3025851, %v1539_v16  ;;  %v1576_v36 = vmul.f32 1.442695, %v1573_v4  ;;  %v1795_v8 = vadd.s32 %v1794_v2, %v1790_v22 }
0x1982   :  { %v1544_v17 = vmul.f32 1.442695, %v1541_v33  ;;  %2377 = vpow2.f32 %v1576_v36  ;;  %v1796_v42 = vadd.s32 536870912, %v1795_v8 }
0x1984   :  { %2379 = vpow2.f32 %v1544_v17  ;;  %v1797_v52 = vshrl.u32 %v1796_v42, 30 }
0x1986   :  { %v1798_v38 = vshll.u32 %v1797_v52, 30  ;;  %v1821_v33 = vsub.s32 4, %v1797_v52 }
0x1988   :  { %v2378_v57 = vpop.eup %2377  ;;  %v1799_v34 = vsub.s32 %v1795_v8, %v1798_v38  ;;  %v1822_v11 = vsel %vm1699_vm5, %v1821_v33, %v1797_v52 }
0x1989   :  { %v1579_v59 = vmul.f32 2.0, %v2378_v57  ;;  %v1824_v39 = vsel %vm1698_vm6, 0, %v1822_v11 }
0x198a   :  { %v2380_v61 = vpop.eup %2379  ;;  %vm1800_vm3 = vcmp.lt.s32.totalorder %v1799_v34, 0  ;;  %v1801_v20 = vsub.s32 0, %v1799_v34  ;;  %v1841_v48 = vadd.s32 3, %v1824_v39  ;;  %v1996_v51 = vand.u32 3, %v1824_v39 }
0x198b   :  { %v1547_v27 = vmul.f32 2.0, %v2380_v61  ;;  %v1581_v63 = vadd.f32 1e-07, %v1579_v59 }
0x198c   :  { %v1802_v5 = vsel %vm1800_vm3, %v1801_v20, %v1799_v34  ;;  %v1842_v50 = vand.u32 3, %v1841_v48  ;;  %vm2001_vm0 = vcmp.eq.s32.totalorder %v1996_v51, 2  ;;  %vm1998_vm11 = vcmp.eq.s32.totalorder %v1996_v51, 0 }
0x198d   :  { %v1549_v1 = vadd.f32 1e-07, %v1547_v27  ;;  %v3010_v6 = vmul.f32 %v1601_v0, %v1581_v63  ;;  %v1803_v18 = vclz %v1802_v5  ;;  %vm1997_vm9 = vcmp.lt.s32.totalorder %v1996_v51, 2 }
0x198e   :  { %vm1847_vm7 = vcmp.eq.s32.totalorder %v1842_v50, 2  ;;  %vm1843_vm8 = vcmp.lt.s32.totalorder %v1842_v50, 2  ;;  %vm1844_vm10 = vcmp.eq.s32.totalorder %v1842_v50, 0 }
0x198f   :  { %1551 = vst [vmem:[%s3052_s3 + $0x8] sm:$0xff] %v1549_v1  ;;  %1610 = vrot.lane.b32.xlu2 %v3010_v6, %s2420_s23  ;;  %v2213_v9 = vadd.s32 4294967294, %v1803_v18 }
0x1991   :  { %vm2214_vm4 = vcmp.lt.s32.totalorder %v2213_v9, 0 }
0x1992   :  { %v1609_v10 = vpop.permute.xlu0 %1608  ;;  %v1806_v24 = vsel %vm2214_vm4, 0, %v2213_v9 }
0x1993   :  { %v1615_v14 = vsel %vm1614_vm2, %v1609_v10, 0.0  ;;  %v1807_v28 = vsub.s32 32, %v1806_v24  ;;  %v1808_v7 = vshll.u32 %v1799_v34, %v1806_v24  ;;  %v1811_v29 = vsub.s32 4294967266, %v1806_v24 }
0x1994   :  { %1616 = vadd.xlane.f32.xlu0 %v1615_v14 }
0x1995   :  { %v1809_v30 = vshrl.u32 %v1791_v23, %v1807_v28  ;;  %v1812_v16 = vadd.s32 127, %v1811_v29 }
0x1997   :  { %1653 = vperm.xlu2 %2246, %v2927_v44   ;;  %v1810_v4 = vor.u32 %v1809_v30, %v1808_v7  ;;  %v1813_v45 = vshll.u32 %v1812_v16, 23 }
0x1999   :  { %v1814_v31 = vor.u32 4788187, %v1813_v45  ;;  %v1817_v32 = vcvt.s32.f32 %v1810_v4 }
0x199b   :  { %v1815_v26 = vand.u32 2147483647, %v1814_v31 }
0x199d   :  { %v1818_v44 = vmul.f32 %v1817_v32, %v1815_v26 }
0x199f   :  { %1658 = vperm.xlu2 %2246, %v1581_v63   ;;  %v1819_v36 = vxor.u32 2147483648, %v1818_v44 }
0x19a1   :  { %v1820_v37 = vsel %vm1699_vm5, %v1819_v36, %v1818_v44 }
0x19a2   :  { %v1823_v47 = vsel %vm1698_vm6, %v2937_v56, %v1820_v37 }
0x19a3   :  { %v1825_v25 = vmul.f32 %v1823_v47, %v1823_v47 }
0x19a5   :  { %v1826_v17 = vmul.f32 -0.001358992, %v1825_v25  ;;  %v1833_v43 = vmul.f32 -0.00019511016, %v1825_v25 }
0x19a7   :  { %v1827_v21 = vadd.f32 0.041655596, %v1826_v17  ;;  %v1834_v46 = vadd.f32 0.008332121, %v1833_v43 }
0x19a9   :  { %v1828_v12 = vmul.f32 %v1827_v21, %v1825_v25  ;;  %v1835_v62 = vmul.f32 %v1834_v46, %v1825_v25 }
0x19ab   :  { %v1829_v60 = vadd.f32 -0.4999988, %v1828_v12  ;;  %v1836_v3 = vadd.f32 -0.16666654, %v1835_v62 }
0x19ad   :  { %v1830_v40 = vmul.f32 %v1829_v60, %v1825_v25  ;;  %v1837_v15 = vmul.f32 %v1836_v3, %v1825_v25 }
0x19af   :  { %v1831_v55 = vadd.f32 1.0, %v1830_v40  ;;  %v1838_v53 = vadd.f32 1.0, %v1837_v15 }
0x19b1   :  { %v1839_v49 = vmul.f32 %v1838_v53, %v1823_v47  ;;  %v1848_v57 = vxor.u32 2147483648, %v1831_v55 }
0x19b3   :  { %v1845_v58 = vxor.u32 2147483648, %v1839_v49  ;;  %v1849_v59 = vsel %vm1847_vm7, %v1848_v57, %v1839_v49  ;;  %v2003_v61 = vsel %vm2001_vm0, %v1848_v57, %v1839_v49 }
0x19b5   :  { %v1846_v22 = vsel %vm1844_vm10, %v1831_v55, %v1845_v58  ;;  %v2000_v27 = vsel %vm1998_vm11, %v1831_v55, %v1845_v58 }
0x19b6   :  { %v1850_v19 = vsel %vm1843_vm8, %v1846_v22, %v1849_v59  ;;  %v2004_v63 = vsel %vm1997_vm9, %v2000_v27, %v2003_v61 }
0x19b7   :  { %v1851_v0 = vsel %vm1840_vm12, nan, %v1850_v19  ;;  %v2005_v1 = vsel %vm1840_vm12, nan, %v2004_v63 }
0x19b8   :  { %v2006_v2 = vmul.f32 2.0, %v2005_v1  ;;  %2009 = vst [vmem:[#allocation2] sm:$0x1] %v1851_v0 }
0x19ba   :  { %v2010_v8 = vmul.f32 %v2006_v2, %v1851_v0 }
0x19bc   :  { %2011 = vst [vmem:[#allocation2 + $0x1] sm:$0x1] %v2010_v8  ;;  %v2012_v42 = vmul.f32 %v2010_v8, %v2006_v2 }
0x19be   :  { %v2013_v52 = vsub.f32 %v2012_v42, %v1851_v0 }
0x19c0   :  { %2014 = vst [vmem:[#allocation2 + $0x2] sm:$0x1] %v2013_v52  ;;  %v2015_v10 = vmul.f32 %v2013_v52, %v2006_v2 }
0x19c2   :  { %v2016_v14 = vsub.f32 %v2015_v10, %v2010_v8  ;;  %v2008_v10 = vshra.s32 %v2887_v35, 4 }
0x19c4   :  { %2017 = vst [vmem:[#allocation2 + $0x3] sm:$0x1] %v2016_v14  ;;  %v2018_v38 = vmul.f32 %v2016_v14, %v2006_v2 }
0x19c6   :  { %v2019_v34 = vsub.f32 %v2018_v38, %v2013_v52  ;;  %v2007_v38 = vadd.s32 8, %v2913_v54 }
0x19c8   :  { %2020 = vst [vmem:[#allocation2 + $0x4] sm:$0x1] %v2019_v34  ;;  %v2021_v56 = vmul.f32 %v2019_v34, %v2006_v2 }
0x19ca   :  { %v2022_v20 = vsub.f32 %v2021_v56, %v2016_v14 }
0x19cc   :  { %2023 = vst [vmem:[#allocation2 + $0x5] sm:$0x1] %v2022_v20  ;;  %v2024_v5 = vmul.f32 %v2022_v20, %v2006_v2 }
0x19ce   :  { %v2025_v18 = vsub.f32 %v2024_v5, %v2019_v34 }
0x19d0   :  { %2026 = vst [vmem:[#allocation2 + $0x6] sm:$0x1] %v2025_v18  ;;  %v2027_v9 = vmul.f32 %v2025_v18, %v2006_v2 }
0x19d2   :  { %v2028_v23 = vsub.f32 %v2027_v9, %v2022_v20 }
0x19d4   :  { %2029 = vst [vmem:[#allocation2 + $0x7] sm:$0x1] %v2028_v23  ;;  %v2030_v24 = vmul.f32 %v2028_v23, %v2006_v2 }
0x19d6   :  { %v2031_v28 = vsub.f32 %v2030_v24, %v2025_v18 }
0x19d8   :  { %2032 = vst [vmem:[#allocation2 + $0x8] sm:$0x1] %v2031_v28  ;;  %v2033_v7 = vmul.f32 %v2031_v28, %v2006_v2 }
0x19da   :  { %v2034_v29 = vsub.f32 %v2033_v7, %v2028_v23 }
0x19db   :  { %v2051_v30 = vld [vmem:[#allocation2] sm:$0xff] }
0x19dc   :  { %2107 = vst [vmem:[#allocation2 - $0x1] sm:$0x2] %v1851_v0  ;;  %v2036_v45 = vmul.f32 %v2034_v29, %v2006_v2 }
0x19dd   :  { %2108 = vst [vmem:[#allocation2] sm:$0x2] %v2010_v8 }
0x19de   :  { %2109 = vst [vmem:[#allocation2 + $0x1] sm:$0x2] %v2013_v52  ;;  %v2037_v31 = vsub.f32 %v2036_v45, %v2031_v28 }
0x19df   :  { %2110 = vst [vmem:[#allocation2 + $0x2] sm:$0x2] %v2016_v14  ;;  %v2090_v14 = vmul.u32 2, %v2008_v10 }
0x19e0   :  { %2111 = vst [vmem:[#allocation2 + $0x3] sm:$0x2] %v2019_v34  ;;  %v2039_v32 = vmul.f32 %v2037_v31, %v2006_v2 }
0x19e1   :  { %2112 = vst [vmem:[#allocation2 + $0x4] sm:$0x2] %v2022_v20  ;;  %vm2091_vm0 = vcmp.eq.s32.totalorder %v2913_v54, %v2090_v14  ;;  %vm2092_vm8 = vcmp.eq.s32.totalorder %v2007_v38, %v2090_v14 }
0x19e2   :  { %2113 = vst [vmem:[#allocation2 + $0x5] sm:$0x2] %v2025_v18  ;;  %v2040_v26 = vsub.f32 %v2039_v32, %v2034_v29  ;;  %v2221_v56 = vsel %vm2091_vm0, 1.0, %v2416_v41  ;;  %v2222_v5 = vsel %vm2092_vm8, 1.0, %v2416_v41 }
0x19e3   :  { %2114 = vst [vmem:[#allocation2 + $0x6] sm:$0x2] %v2028_v23 }
0x19e4   :  { %2035 = vst [vmem:[#allocation2 + $0x9] sm:$0x1] %v2034_v29  ;;  %v2042_v44 = vmul.f32 %v2040_v26, %v2006_v2 }
0x19e5   :  { %2038 = vst [vmem:[#allocation2 + $0xa] sm:$0x1] %v2037_v31 }
0x19e6   :  { %2041 = vst [vmem:[#allocation2 + $0xb] sm:$0x1] %v2040_v26  ;;  %v2043_v33 = vsub.f32 %v2042_v44, %v2037_v31 }
0x19e8   :  { %2044 = vst [vmem:[#allocation2 + $0xc] sm:$0x1] %v2043_v33  ;;  %v2045_v36 = vmul.f32 %v2043_v33, %v2006_v2 }
0x19e9   :  { %v1611_v16 = vpop.permute.xlu2 %1610 }
0x19ea   :  { %v1618_v4 = vsel %vm1614_vm2, %v1611_v16, 0.0  ;;  %v2046_v37 = vsub.f32 %v2045_v36, %v2040_v26  ;;  %v2122_v60 = vld [vmem:[#allocation2] sm:$0xff] }
0x19eb   :  { %1619 = vadd.xlane.f32.xlu1 %v1618_v4 }
0x19ec   :  { %2047 = vst [vmem:[#allocation2 + $0xd] sm:$0x1] %v2046_v37  ;;  %v2048_v11 = vmul.f32 %v2046_v37, %v2006_v2 }
0x19ee   :  { %v2049_v47 = vsub.f32 %v2048_v11, %v2043_v33 }
0x19f0   :  { %2050 = vst [vmem:[#allocation2 + $0xe] sm:$0x1] %v2049_v47 }
0x19f1   :  { %v1654_v55 = vpop.permute.xlu2 %1653 }
0x19f7   :  { %v2052_v25 = vld [vmem:[#allocation2 + $0x8] sm:$0x7f] }
0x19f8   :  { %2218 = vmatpush.msk.msra.mxu1 %vm2063_vm13, %v2052_v25  ;;  %2115 = vst [vmem:[#allocation2 + $0x7] sm:$0x2] %v2031_v28 }
0x19f9   :  { %2116 = vst [vmem:[#allocation2 + $0x8] sm:$0x2] %v2034_v29 }
0x19fa   :  { %2117 = vst [vmem:[#allocation2 + $0x9] sm:$0x2] %v2037_v31  ;;  %2082 = vmatpush.msra.mxu1 %v2051_v30 }
0x19fb   :  { %2118 = vst [vmem:[#allocation2 + $0xa] sm:$0x2] %v2040_v26 }
0x19fc   :  { %2119 = vst [vmem:[#allocation2 + $0xb] sm:$0x2] %v2043_v33 }
0x19fd   :  { %2120 = vst [vmem:[#allocation2 + $0xc] sm:$0x2] %v2046_v37 }
0x19fe   :  { %2121 = vst [vmem:[#allocation2 + $0xd] sm:$0x2] %v2049_v47 }
0x1a05   :  { %v2123_v62 = vld [vmem:[#allocation2 + $0x8] sm:$0x7f] }
0x1a06   :  { %2223 = vmatpush.msk.msrb.mxu2 %vm2063_vm13, %v2123_v62 }
0x1a07   :  { %v1617_v39 = vpop.xlane.xlu0 %1616 }
0x1a08   :  { %2381 = vrcp.f32 %v1617_v39  ;;  %v1632_v46 = vand.u32 2147483648, %v1617_v39  ;;  %v1630_v12 = vand.u32 2147483647, %v1617_v39  ;;  %vm1626_vm15 = vweird.f32 %v1617_v39  ;;  %2142 = vmatpush.msrb.mxu2 %v2122_v60 }
0x1a0a   :  { %v1633_v50 = vor.u32 1.1754944e-38, %v1632_v46  ;;  %vm1631_vm3 = vcmp.eq.f32.partialorder %v1630_v12, 8.507059e+37 }
0x1a0e   :  { %v2382_v17 = vpop.eup %2381 }
0x1a0f   :  { %v1622_v43 = vmul.f32 %v2382_v17, %v1617_v39  ;;  %vm1627_vm14 = vweird.f32 %v2382_v17 }
0x1a10   :  { %vm1628_vm1 = vmor %vm1626_vm15, %vm1627_vm14 }
0x1a11   :  { %v1623_v21 = vsub.f32 1.0, %v1622_v43 }
0x1a13   :  { %v1624_v48 = vmul.f32 %v2382_v17, %v1623_v21 }
0x1a15   :  { %v1625_v3 = vadd.f32 %v2382_v17, %v1624_v48 }
0x1a17   :  { %v1629_v51 = vsel %vm1628_vm1, %v2382_v17, %v1625_v3 }
0x1a18   :  { %v1634_v40 = vsel %vm1631_vm3, %v1633_v50, %v1629_v51 }
0x1a19   :  { %v1635_v15 = vmul.f32 %v1634_v40, %v2930_v13  ;;  %v1659_v13 = vpop.permute.xlu2 %1658 }
0x1a1b   :  { %v1661_v53 = vmul.f32 %v1654_v55, %v1635_v15 }
0x1a1d   :  { %2055 = vrot.lane.b32.xlu2 %v1661_v53, %s2420_s23 }
0x1a5e   :  { %v1620_v49 = vpop.xlane.xlu1 %1619 }
0x1a5f   :  { %2383 = vrcp.f32 %v1620_v49  ;;  %v1647_v61 = vand.u32 2147483648, %v1620_v49  ;;  %v1645_v27 = vand.u32 2147483647, %v1620_v49  ;;  %vm1641_vm5 = vweird.f32 %v1620_v49 }
0x1a61   :  { %v1648_v63 = vor.u32 1.1754944e-38, %v1647_v61  ;;  %vm1646_vm7 = vcmp.eq.f32.partialorder %v1645_v27, 8.507059e+37 }
0x1a65   :  { %v2384_v57 = vpop.eup %2383 }
0x1a66   :  { %v1637_v58 = vmul.f32 %v2384_v57, %v1620_v49  ;;  %vm1642_vm4 = vweird.f32 %v2384_v57 }
0x1a67   :  { %vm1643_vm6 = vmor %vm1641_vm5, %vm1642_vm4 }
0x1a68   :  { %v1638_v59 = vsub.f32 1.0, %v1637_v58 }
0x1a6a   :  { %v1639_v22 = vmul.f32 %v2384_v57, %v1638_v59 }
0x1a6c   :  { %v1640_v19 = vadd.f32 %v2384_v57, %v1639_v22 }
0x1a6e   :  { %v1644_v0 = vsel %vm1643_vm6, %v2384_v57, %v1640_v19 }
0x1a6f   :  { %v1649_v1 = vsel %vm1646_vm7, %v1648_v63, %v1644_v0 }
0x1a70   :  { %v1650_v2 = vmul.f32 %v1649_v1, %v3010_v6  ;;  %v2150_v6 = vadd.s32 1, %v2090_v14 }
0x1a72   :  { %v1662_v8 = vmul.f32 %v1659_v13, %v1650_v2  ;;  %vm2151_vm10 = vcmp.eq.s32.totalorder %v2913_v54, %v2150_v6 }
0x1a73   :  { %v2226_v24 = vsel %vm2151_vm10, 1.0, %v2416_v41 }
0x1a74   :  { %2057 = vrot.lane.b32.xlu2 %v1662_v8, %s2420_s23 }
0x1a77   :  { %v2056_v42 = vpop.permute.xlu2 %2055 }
0x1a78   :  { %2219 = vmatmul.msk.f32.vlgmr.msra.gmra.mxu1 %vm1614_vm2, %v2056_v42  ;;  %2224 = vmatmul.msk.f32.vlgmr.msrb.gmra.mxu2 %vm1614_vm2, %v2056_v42 }
0x1ace   :  { %v2058_v52 = vpop.permute.xlu2 %2057 }
0x1acf   :  { %2220 = vmatmul.msk.f32.gmra.mxu1 %vm1614_vm2, %v2058_v52  ;;  %2225 = vmatmul.msk.f32.gmra.mxu2 %vm1614_vm2, %v2058_v52  ;;  %vm2152_vm2 = vcmp.eq.s32.totalorder %v2007_v38, %v2150_v6 }
0x1ad0   :  { %v2227_v28 = vsel %vm2152_vm2, 1.0, %v2416_v41 }
0x1af5   :  { %v2084_v34 = vpop.f32.mrf.mxu1 }
0x1af6   :  { %v2097_v9 = vmul.f32 %v2221_v56, %v2084_v34 }
0x1afb   :  { %v2144_v20 = vpop.f32.mrf.mxu2 }
0x1afc   :  { %v2157_v30 = vmul.f32 %v2226_v24, %v2144_v20 }
0x1b4c   :  { %v2087_v18 = vpop.f32.mrf.mxu1 }
0x1b4d   :  { %v2098_v23 = vmul.f32 %v2222_v5, %v2087_v18 }
0x1b4f   :  { %v2099_v35 = vadd.f32 %v2098_v23, %v2097_v9 }
0x1b51   :  { %v2100_v7 = vrot.slane %v2099_v35, 4 }
0x1b52   :  { %v2147_v29 = vpop.f32.mrf.mxu2 }
0x1b53   :  { %v2101_v16 = vadd.f32 %v2100_v7, %v2099_v35  ;;  %v2158_v4 = vmul.f32 %v2227_v28, %v2147_v29 }
0x1b55   :  { %v2102_v45 = vrot.slane %v2101_v16, 2  ;;  %v2159_v31 = vadd.f32 %v2158_v4, %v2157_v30 }
0x1b57   :  { %v2103_v32 = vadd.f32 %v2102_v45, %v2101_v16  ;;  %v2160_v26 = vrot.slane %v2159_v31, 4 }
0x1b59   :  { %v2104_v44 = vrot.slane %v2103_v32, 1  ;;  %v2161_v33 = vadd.f32 %v2160_v26, %v2159_v31 }
0x1b5b   :  { %v2105_v36 = vadd.f32 %v2104_v44, %v2103_v32  ;;  %v2162_v54 = vrot.slane %v2161_v33, 2 }
0x1b5d   :  { %2106 = vst [vmem:[%s3052_s3 + $0x10] sm:$0x1] %v2105_v36  ;;  %v2163_v37 = vadd.f32 %v2162_v54, %v2161_v33 }
0x1b5f   :  { %v2164_v11 = vrot.slane %v2163_v37, 1 }
0x1b61   :  { %v2165_v41 = vadd.f32 %v2164_v11, %v2163_v37 }
0x1b63   :  { %2166 = vst [vmem:[%s3052_s3 + $0x11] sm:$0x1] %v2165_v41 }
0x1b64   :  { %2171 = vsyncpa [#allocation5], 1 }

// kernel: reverse.2
= control target key start
LH: loop header
LB: loop body
LE: loop exit
PB: predicated region body
PF: predicated region fallthrough
CT: control target
= control target key end

     0   :  { %v2_v0 = vlaneseq  ;;  %s109_s0 = inlined_call_operand.vmem [shape: f32[2,127], index: 0, kind: input, shape index: {}]   ;;  %s110_s1 = inlined_call_operand.vmem [shape: f32[2,127], index: 1, kind: output, shape index: {}]  }
   0x2   :  { %v3_v1 = vsub.s32 126, %v2_v0 }
   0x4   :  { %4 = vset.pattern.permute.xlu0 %v3_v1 }
   0x5   :  { %v21_v2 = vld [vmem:[%s109_s0] sm:$0x3] }
   0x6   :  { %22 = vst [vmem:[#allocation1] sm:$0x3] %v21_v2 }
   0xd   :  { %v40_v3 = vld [vmem:[#allocation1] sm:$0x3] }
   0xe   :  { %41 = vst [vmem:[#allocation0] sm:$0x3] %v40_v3 }
  0x15   :  { %v42_v4 = vld [vmem:[#allocation0] sm:$0xff] }
  0x16   :  { %43 = vperm.xlu0 %4, %v42_v4  }
  0x88   :  { %v44_v5 = vpop.permute.xlu0 %43 }
  0x89   :  { %45 = vst [vmem:[#allocation2] sm:$0xff] %v44_v5 }
  0x90   :  { %v48_v6 = vld [vmem:[#allocation2] sm:$0x3] }
  0x91   :  { %51 = vst [vmem:[#allocation3] sm:$0x3] %v48_v6 }
  0x98   :  { %v68_v7 = vld [vmem:[#allocation3] sm:$0x3] }
  0x99   :  { %69 = vst [vmem:[%s110_s1] sm:$0x3] %v68_v7 }

</bundles_post_ra>
